<compile_context>
chip_gen: v5e
topology: v5e:2x2
jax: 0.10.0
libtpu: 0.0.40
codegen_flags: <defaults>
</compile_context>

<pallas_src>
import functools

import jax
import jax.numpy as jnp
from jax.experimental import pallas as pl
from jax.experimental.pallas import tpu as pltpu

BN_EPS = 1e-5
_MAX_BATCH_TILE = 2048  # keeps per-step VMEM ~10-12 MiB -> safe on v7x (64 MiB/TC)


def _round_up(x, m):
    return (x + m - 1) // m * m


def _cdiv(a, b):
    return -(-a // b)


def _pad2d(a, rows, cols):
    r, c = a.shape
    if r == rows and c == cols:
        return a
    return jnp.pad(a, ((0, rows - r), (0, cols - c)))


def _leaky_relu(h, alpha):
    # For 0 <= alpha <= 1 (the standard LeakyReLU regime) max(h, a*h) is exact
    # and one fewer VALU op than cmp + mul + select.
    if 0.0 <= alpha <= 1.0:
        return jnp.maximum(h, alpha * h)
    return jnp.where(h >= 0.0, h, alpha * h)


def _has_megacore():
    """True when the default device has >1 TensorCore sharing a grid (v4 / v7x)."""
    try:
        kind = jax.devices()[0].device_kind.lower()
    except Exception:
        return False
    return any(tag in kind for tag in ("v4", "v7", "7x"))


# --------------------------------------------------------------------------- #
# Kernel
# --------------------------------------------------------------------------- #
def generator_kernel(x_ref, w1_ref, b1_ref, w2_ref, b2_ref, w3_ref, b3_ref, o_ref,
                     *, alpha):
    mm_dtype = w1_ref.dtype  # bf16 (or f32) matmul operands; f32 accumulation

    # ---- block 1: (BN-folded) Linear -> LeakyReLU -> (Dropout = identity) ----
    h1 = jnp.dot(x_ref[...], w1_ref[...], preferred_element_type=jnp.float32) + b1_ref[...]
    h1 = _leaky_relu(h1, alpha).astype(mm_dtype)

    # ---- block 2: (BN-folded) Linear -> LeakyReLU -> (Dropout = identity) ----
    h2 = jnp.dot(h1, w2_ref[...], preferred_element_type=jnp.float32) + b2_ref[...]
    h2 = _leaky_relu(h2, alpha).astype(mm_dtype)

    # ---- block 3: final Linear ----
    out = jnp.dot(h2, w3_ref[...], preferred_element_type=jnp.float32) + b3_ref[...]
    o_ref[...] = out.astype(o_ref.dtype)


# --------------------------------------------------------------------------- #
# One-time parameter preparation (hoisted out of the per-call path)
# --------------------------------------------------------------------------- #
def prepare_params(params, *, use_bf16=True, pad_k_to_128=False):
    """Fold eval-mode BatchNorm into the Linears, pad the output lane dim to a
    128 multiple, and cast matmul operands.  Run once, reuse across calls."""
    mm_dtype = jnp.bfloat16 if use_bf16 else jnp.float32

    noise_len, H1 = params["w1"].shape
    H2 = params["w2"].shape[1]
    n_samples = params["w3"].shape[1]

    s1 = params["g1"] * jax.lax.rsqrt(params["v1"] + BN_EPS)            # (1, H1)
    w1f = params["w1"] * s1
    b1f = (params["b1"] - params["m1"]) * s1 + params["be1"]
    s2 = params["g2"] * jax.lax.rsqrt(params["v2"] + BN_EPS)            # (1, H2)
    w2f = params["w2"] * s2
    b2f = (params["b2"] - params["m2"]) * s2 + params["be2"]

    # K (first contraction) left at its true size by default: a block equal to
    # the full array dim is legal, and x is the only operand scaling with B.
    K_pad = _round_up(noise_len, 128) if pad_k_to_128 else noise_len
    N_pad = _round_up(n_samples, 128)   # lane-dense unmasked output stores

    kernel_params = dict(
        w1=_pad2d(w1f, K_pad, H1).astype(mm_dtype),
        b1=b1f.astype(jnp.float32),
        w2=w2f.astype(mm_dtype),
        b2=b2f.astype(jnp.float32),
        w3=_pad2d(params["w3"], H2, N_pad).astype(mm_dtype),
        b3=_pad2d(params["b3"], 1, N_pad).astype(jnp.float32),
    )
    # f32, unpadded, BN-folded copies for the small-batch XLA fast path.
    xla_params = dict(w1=w1f, b1=b1f, w2=w2f, b2=b2f, w3=params["w3"], b3=params["b3"])

    return dict(
        kernel=kernel_params, xla=xla_params, mm_dtype=mm_dtype,
        noise_len=noise_len, n_samples=n_samples,
        K_pad=K_pad, N_pad=N_pad, H1=H1, H2=H2,
    )


# --------------------------------------------------------------------------- #
# Forward
# --------------------------------------------------------------------------- #
def generator_forward_prepared(x, prep, *, alpha, batch_tile=1024,
                               out_dtype=jnp.float32, min_pallas_batch=128,
                               trim_output=True, megacore=None):
    """x: (B, noise_len) float32.  prep: output of prepare_params()."""
    B, noise_len = x.shape
    assert noise_len == prep["noise_len"], "noise_len mismatch vs prepared params"
    n_samples = prep["n_samples"]

    # ---- small-batch fast path: launch + weight DMA dominate, use plain XLA ----
    if B < min_pallas_batch:
        p = prep["xla"]
        h = _leaky_relu(x @ p["w1"] + p["b1"], alpha)
        h = _leaky_relu(h @ p["w2"] + p["b2"], alpha)
        return (h @ p["w3"] + p["b3"]).astype(out_dtype)

    K_pad, N_pad = prep["K_pad"], prep["N_pad"]
    H1, H2 = prep["H1"], prep["H2"]
    mm_dtype = prep["mm_dtype"]

    # ---- batch tiling: big tiles; balanced even split only on megacore chips ----
    if megacore is None:
        megacore = _has_megacore()
    tile = max(16, _round_up(min(batch_tile, _MAX_BATCH_TILE), 16))
    tile = min(tile, _round_up(B, 16))
    if megacore:
        # aim for an even number of grid steps so both TensorCores get equal work
        while _cdiv(B, tile) % 2 == 1 and tile > 16:
            tile = max(16, _round_up(tile // 2, 16))
    steps = _cdiv(B, tile)
    B_pad = steps * tile

    x_p = _pad2d(x.astype(mm_dtype), B_pad, K_pad)

    def act_spec(cols):
        # per-grid-step batch tile of activations / output
        return pl.BlockSpec((tile, cols), lambda i: (i, 0))

    def param_spec(r, c):
        # whole parameter tensor, resident in VMEM (constant index map ->
        # fetched once, not re-DMA'd per grid step)
        return pl.BlockSpec((r, c), lambda i: (0, 0))

    kp = prep["kernel"]
    out = pl.pallas_call(
        functools.partial(generator_kernel, alpha=alpha),
        out_shape=jax.ShapeDtypeStruct((B_pad, N_pad), out_dtype),
        grid_spec=pltpu.PrefetchScalarGridSpec(
            num_scalar_prefetch=0,
            grid=(steps,),
            in_specs=[
                act_spec(K_pad),                 # x
                param_spec(K_pad, H1),           # w1 (BN1 folded)
                param_spec(1, H1),               # b1 (BN1 folded)
                param_spec(H1, H2),              # w2 (BN2 folded)
                param_spec(1, H2),               # b2 (BN2 folded)
                param_spec(H2, N_pad),           # w3
                param_spec(1, N_pad),            # b3
            ],
            out_specs=act_spec(N_pad),
        ),
        compiler_params=pltpu.CompilerParams(
            dimension_semantics=("parallel",),
        ),
    )(x_p, kp["w1"], kp["b1"], kp["w2"], kp["b2"], kp["w3"], kp["b3"])

    if trim_output and (B_pad != B or N_pad != n_samples):
        out = out[:B, :n_samples]
    return out


def generator_forward(x, params, *, alpha, use_bf16=True, **kwargs):
    """Convenience one-shot wrapper.  Prefer prepare_params() +
    generator_forward_prepared() so the BN fold / padding / casts run once."""
    prep = prepare_params(params, use_bf16=use_bf16)
    return generator_forward_prepared(x, prep, alpha=alpha, **kwargs)


# --------------------------------------------------------------------------- #
# Synthetic params + pure-JAX reference
# --------------------------------------------------------------------------- #
def init_params(key, noise_len, n_samples):
    """Deterministic synthetic parameter init (shapes match the PyTorch module)."""
    H1, H2 = 256, 512
    ks = jax.random.split(key, 14)

    def lin(kw, kb, fan_in, fan_out):
        bound = 1.0 / jnp.sqrt(fan_in)
        # stored already transposed: (in, out)
        w = jax.random.uniform(kw, (fan_in, fan_out), jnp.float32, -bound, bound)
        b = jax.random.uniform(kb, (1, fan_out), jnp.float32, -bound, bound)
        return w, b

    w1, b1 = lin(ks[0], ks[1], noise_len, H1)
    w2, b2 = lin(ks[2], ks[3], H1, H2)
    w3, b3 = lin(ks[4], ks[5], H2, n_samples)

    def bn(kg, kb, km, kv, h):
        g = 1.0 + 0.1 * jax.random.normal(kg, (1, h), jnp.float32)
        be = 0.1 * jax.random.normal(kb, (1, h), jnp.float32)
        m = 0.1 * jax.random.normal(km, (1, h), jnp.float32)
        v = 1.0 + 0.1 * jax.random.uniform(kv, (1, h), jnp.float32)
        return g, be, m, v

    g1, be1, m1, v1 = bn(ks[6], ks[7], ks[8], ks[9], H1)
    g2, be2, m2, v2 = bn(ks[10], ks[11], ks[12], ks[13], H2)

    return dict(
        w1=w1, b1=b1, g1=g1, be1=be1, m1=m1, v1=v1,
        w2=w2, b2=b2, g2=g2, be2=be2, m2=m2, v2=v2,
        w3=w3, b3=b3,
    )


def reference_forward(x, p, alpha):
    """Pure-JAX f32 reference of the eval-mode PyTorch forward (unfolded BN)."""
    def bn_lrelu(h, g, be, m, v):
        h = (h - m) / jnp.sqrt(v + BN_EPS) * g + be
        return jnp.where(h >= 0.0, h, alpha * h)

    h = x @ p["w1"] + p["b1"]
    h = bn_lrelu(h, p["g1"], p["be1"], p["m1"], p["v1"])
    h = h @ p["w2"] + p["b2"]
    h = bn_lrelu(h, p["g2"], p["be2"], p["m2"], p["v2"])
    return h @ p["w3"] + p["b3"]


if __name__ == "__main__":
    noise_len = 32
    n_samples = 64
    alpha = 0.2
    batch = 256          # >= min_pallas_batch -> exercises the Pallas kernel

    key = jax.random.PRNGKey(0)
    k_x, k_p, k_xs = jax.random.split(key, 3)
    x = jax.random.normal(k_x, (batch, noise_len), jnp.float32)
    params = init_params(k_p, noise_len, n_samples)

    # One-time prep (BN fold, pad, bf16 cast) hoisted out of the call path.
    prep = prepare_params(params, use_bf16=True)

    # Pallas kernel path.
    out = generator_forward_prepared(x, prep, alpha=alpha)
    out = jax.block_until_ready(out)
    ref = reference_forward(x, params, alpha)
    assert out.shape == (batch, n_samples)
    # bf16 matmul operands with f32 accumulation -> loose-but-safe tolerance
    assert jnp.allclose(out, ref, atol=3e-2, rtol=3e-2), "kernel mismatch vs JAX reference"

    # Small-batch fast path (pure XLA) sanity check.
    x_small = jax.random.normal(k_xs, (8, noise_len), jnp.float32)
    out_small = jax.block_until_ready(
        generator_forward_prepared(x_small, prep, alpha=alpha))
    ref_small = reference_forward(x_small, params, alpha)
    assert out_small.shape == (8, n_samples)
    assert jnp.allclose(out_small, ref_small, atol=3e-2, rtol=3e-2), "fast-path mismatch"

    print("KERNEL_OK")
</pallas_src>

<mosaic_0001>
module attributes {stable_mosaic.version = 11 : i64} {
  func.func @generator_kernel(%arg0: i32, %arg1: memref<256x32xbf16, #tpu.memory_space<vmem>>, %arg2: memref<32x256xbf16, #tpu.memory_space<vmem>>, %arg3: memref<1x256xf32, #tpu.memory_space<vmem>>, %arg4: memref<256x512xbf16, #tpu.memory_space<vmem>>, %arg5: memref<1x512xf32, #tpu.memory_space<vmem>>, %arg6: memref<512x128xbf16, #tpu.memory_space<vmem>>, %arg7: memref<1x128xf32, #tpu.memory_space<vmem>>, %arg8: memref<256x128xf32, #tpu.memory_space<vmem>>) attributes {dimension_semantics = [#tpu.dimension_semantics<parallel>], iteration_bounds = array<i64: 1>, scalar_prefetch = 0 : i64, scratch_operands = 0 : i64, tpu.core_type = #tpu.core_type<tc>, window_params = [{transform_indices = @transform_0, window_bounds = array<i64: 256, 32>}, {pipeline_mode = #tpu.pipeline_mode<synchronous>, transform_indices = @transform_1, window_bounds = array<i64: 32, 256>}, {pipeline_mode = #tpu.pipeline_mode<synchronous>, transform_indices = @transform_2, window_bounds = array<i64: 1, 256>}, {pipeline_mode = #tpu.pipeline_mode<synchronous>, transform_indices = @transform_3, window_bounds = array<i64: 256, 512>}, {pipeline_mode = #tpu.pipeline_mode<synchronous>, transform_indices = @transform_4, window_bounds = array<i64: 1, 512>}, {pipeline_mode = #tpu.pipeline_mode<synchronous>, transform_indices = @transform_5, window_bounds = array<i64: 512, 128>}, {pipeline_mode = #tpu.pipeline_mode<synchronous>, transform_indices = @transform_6, window_bounds = array<i64: 1, 128>}, {transform_indices = @transform_7, window_bounds = array<i64: 256, 128>}]} {
    %c0 = arith.constant 0 : index
    %c0_0 = arith.constant 0 : index
    %0 = vector.load %arg1[%c0, %c0_0] : memref<256x32xbf16, #tpu.memory_space<vmem>>, vector<256x32xbf16>
    %c0_1 = arith.constant 0 : index
    %c0_2 = arith.constant 0 : index
    %1 = vector.load %arg2[%c0_1, %c0_2] : memref<32x256xbf16, #tpu.memory_space<vmem>>, vector<32x256xbf16>
    %cst = arith.constant dense<0.000000e+00> : vector<256x256xf32>
    %2 = tpu.matmul %0, %1, %cst {dimension_numbers = #tpu.dot_dimension_numbers<[1], [0], [0], [1], [0, 0, 1, 1], [], []>} : vector<256x32xbf16>, vector<32x256xbf16>, vector<256x256xf32> -> vector<256x256xf32>
    %c0_3 = arith.constant 0 : index
    %c0_4 = arith.constant 0 : index
    %3 = vector.load %arg3[%c0_3, %c0_4] : memref<1x256xf32, #tpu.memory_space<vmem>>, vector<1x256xf32>
    %4 = vector.broadcast %3 : vector<1x256xf32> to vector<256x256xf32>
    %5 = arith.addf %2, %4 : vector<256x256xf32>
    %cst_5 = arith.constant 2.000000e-01 : f32
    %6 = vector.broadcast %cst_5 : f32 to vector<256x256xf32>
    %7 = arith.mulf %6, %5 : vector<256x256xf32>
    %8 = arith.maximumf %5, %7 : vector<256x256xf32>
    %9 = arith.truncf %8 : vector<256x256xf32> to vector<256x256xbf16>
    %c0_6 = arith.constant 0 : index
    %c0_7 = arith.constant 0 : index
    %10 = vector.load %arg4[%c0_6, %c0_7] : memref<256x512xbf16, #tpu.memory_space<vmem>>, vector<256x512xbf16>
    %cst_8 = arith.constant dense<0.000000e+00> : vector<256x512xf32>
    %11 = tpu.matmul %9, %10, %cst_8 {dimension_numbers = #tpu.dot_dimension_numbers<[1], [0], [0], [1], [0, 0, 1, 1], [], []>} : vector<256x256xbf16>, vector<256x512xbf16>, vector<256x512xf32> -> vector<256x512xf32>
    %c0_9 = arith.constant 0 : index
    %c0_10 = arith.constant 0 : index
    %12 = vector.load %arg5[%c0_9, %c0_10] : memref<1x512xf32, #tpu.memory_space<vmem>>, vector<1x512xf32>
    %13 = vector.broadcast %12 : vector<1x512xf32> to vector<256x512xf32>
    %14 = arith.addf %11, %13 : vector<256x512xf32>
    %cst_11 = arith.constant 2.000000e-01 : f32
    %15 = vector.broadcast %cst_11 : f32 to vector<256x512xf32>
    %16 = arith.mulf %15, %14 : vector<256x512xf32>
    %17 = arith.maximumf %14, %16 : vector<256x512xf32>
    %18 = arith.truncf %17 : vector<256x512xf32> to vector<256x512xbf16>
    %c0_12 = arith.constant 0 : index
    %c0_13 = arith.constant 0 : index
    %19 = vector.load %arg6[%c0_12, %c0_13] : memref<512x128xbf16, #tpu.memory_space<vmem>>, vector<512x128xbf16>
    %cst_14 = arith.constant dense<0.000000e+00> : vector<256x128xf32>
    %20 = tpu.matmul %18, %19, %cst_14 {dimension_numbers = #tpu.dot_dimension_numbers<[1], [0], [0], [1], [0, 0, 1, 1], [], []>} : vector<256x512xbf16>, vector<512x128xbf16>, vector<256x128xf32> -> vector<256x128xf32>
    %c0_15 = arith.constant 0 : index
    %c0_16 = arith.constant 0 : index
    %21 = vector.load %arg7[%c0_15, %c0_16] : memref<1x128xf32, #tpu.memory_space<vmem>>, vector<1x128xf32>
    %22 = vector.broadcast %21 : vector<1x128xf32> to vector<256x128xf32>
    %23 = arith.addf %20, %22 : vector<256x128xf32>
    %c0_17 = arith.constant 0 : index
    %c0_18 = arith.constant 0 : index
    %24 = vector.load %arg8[%c0_17, %c0_18] : memref<256x128xf32, #tpu.memory_space<vmem>>, vector<256x128xf32>
    tpu.vector_store %arg8[%c0_17, %c0_18], %23 {strides = array<i32>} : memref<256x128xf32, #tpu.memory_space<vmem>>, vector<256x128xf32>,
    return
  }
  func.func @transform_0(%arg0: i32) -> (i32, i32) {
    %c0_i32 = arith.constant 0 : i32
    %c0_i32_0 = arith.constant 0 : i32
    return %arg0, %c0_i32 : i32, i32
  }
  func.func @transform_1(%arg0: i32) -> (i32, i32) {
    %c0_i32 = arith.constant 0 : i32
    %c0_i32_0 = arith.constant 0 : i32
    %c0_i32_1 = arith.constant 0 : i32
    return %c0_i32, %c0_i32_0 : i32, i32
  }
  func.func @transform_2(%arg0: i32) -> (i32, i32) {
    %c0_i32 = arith.constant 0 : i32
    %c0_i32_0 = arith.constant 0 : i32
    %c0_i32_1 = arith.constant 0 : i32
    return %c0_i32, %c0_i32_0 : i32, i32
  }
  func.func @transform_3(%arg0: i32) -> (i32, i32) {
    %c0_i32 = arith.constant 0 : i32
    %c0_i32_0 = arith.constant 0 : i32
    %c0_i32_1 = arith.constant 0 : i32
    return %c0_i32, %c0_i32_0 : i32, i32
  }
  func.func @transform_4(%arg0: i32) -> (i32, i32) {
    %c0_i32 = arith.constant 0 : i32
    %c0_i32_0 = arith.constant 0 : i32
    %c0_i32_1 = arith.constant 0 : i32
    return %c0_i32, %c0_i32_0 : i32, i32
  }
  func.func @transform_5(%arg0: i32) -> (i32, i32) {
    %c0_i32 = arith.constant 0 : i32
    %c0_i32_0 = arith.constant 0 : i32
    %c0_i32_1 = arith.constant 0 : i32
    return %c0_i32, %c0_i32_0 : i32, i32
  }
  func.func @transform_6(%arg0: i32) -> (i32, i32) {
    %c0_i32 = arith.constant 0 : i32
    %c0_i32_0 = arith.constant 0 : i32
    %c0_i32_1 = arith.constant 0 : i32
    return %c0_i32, %c0_i32_0 : i32, i32
  }
  func.func @transform_7(%arg0: i32) -> (i32, i32) {
    %c0_i32 = arith.constant 0 : i32
    %c0_i32_0 = arith.constant 0 : i32
    return %arg0, %c0_i32 : i32, i32
  }
}

</mosaic_0001>

<bundles_post_ra>
// kernel: tpu_custom_call.1
= control target key start
LH: loop header
LB: loop body
LE: loop exit
PB: predicated region body
PF: predicated region fallthrough
CT: control target
= control target key end

     0   :  { %12 = vsyncpa [#allocation3], 0  ;;  %s4310_s0 = inlined_call_operand.vmem [shape: bf16[256,32], index: 0, kind: input, shape index: {}]   ;;  %s4311_s1 = inlined_call_operand.vmem [shape: bf16[32,256], index: 1, kind: input, shape index: {}]   ;;  %s4312_s2 = inlined_call_operand.vmem [shape: f32[1,256], index: 2, kind: input, shape index: {}]   ;;  %s4313_s3 = inlined_call_operand.hbm [shape: bf16[256,512], index: 3, kind: input, shape index: {}]   ;;  %s4314_s4 = inlined_call_operand.vmem [shape: f32[1,512], index: 4, kind: input, shape index: {}]   ;;  %s4315_s5 = inlined_call_operand.hbm [shape: bf16[512,128], index: 5, kind: input, shape index: {}]   ;;  %s4316_s6 = inlined_call_operand.vmem [shape: f32[1,128], index: 6, kind: input, shape index: {}]   ;;  %s4317_s7 = inlined_call_operand.hbm [shape: f32[256,128], index: 7, kind: output, shape index: {}]  }
   0x1   :  { %13 = vsyncpa [#allocation6], 0 }
   0x2   :  { %14 = vsyncpa [#allocation4], 0  ;;  %s25_s26 = sshll.u32 %s4313_s3, 4  ;;  %s3396_s27 = smov [#allocation2]   ;;  %s26_s26 = int_to_ptr.hbm [resolvable:$true] %s25_s26 }
   0x3   :  { %s27_s28 = sshll.u32 %s3396_s27, 4  ;;  %s40_s8 = sshll.u32 %s4315_s5, 4  ;;  %s28_s28 = int_to_ptr.vmem [resolvable:$true] %s27_s28  ;;  %s41_s8 = int_to_ptr.hbm [resolvable:$true] %s40_s8 }
   0x4   :  { %s3397_s9 = smov 256   ;;  %s3398_s10 = smov 16  }
   0x5   :  { %33 = dma.hbm_to_vmem [thread:$0]  %s26_s26, 8192, %s28_s28, [#allocation3], %s3397_s9, %s3397_s9, %s3398_s10  }
   0x6   :  { %s3399_s11 = smov [#allocation5]   ;;  %s3400_s13 = smov 64  }
   0x7   :  { %s42_s12 = sshll.u32 %s3399_s11, 4  ;;  %s3401_s14 = smov 4   ;;  %s43_s12 = int_to_ptr.vmem [resolvable:$true] %s42_s12 }
   0x8   :  { %48 = dma.hbm_to_vmem [thread:$0]  %s41_s8, 4096, %s43_s12, [#allocation6], %s3400_s13, %s3400_s13, %s3401_s14  }
   0x9   :  { %3390 = dma.done.wait [#allocation3], 8192  }
   0xa   :  { %3391 = vsyncadd [#allocation3], 4294959104 }
   0xb   :  { %3392 = dma.done.wait [#allocation6], 4096  }
   0xc   :  { %3393 = vsyncadd [#allocation6], 4294963200  ;;  %v2757_v0 = vld [vmem:[%s4311_s1 + $0x10] sm:$0xf]  ;;  %v3198_v1 = vld [vmem:[%s4311_s1 + $0x14] sm:$0xf0] }
   0xd   :  { %v3197_v2 = vld [vmem:[%s4311_s1 + $0x14] sm:$0xf]  ;;  %v2758_v3 = vor.u32 %v3198_v1, %v2757_v0  ;;  %v2759_v4 = vld [vmem:[%s4311_s1 + $0x18] sm:$0xf0]  ;;  %v2749_v5 = vld [vmem:[%s4311_s1] sm:$0xf] }
   0xe   :  { %v3196_v6 = vld [vmem:[%s4311_s1 + $0x4] sm:$0xf0]  ;;  %v2762_v7 = vor.u32 %v3197_v2, %v2759_v4  ;;  %v3195_v8 = vld [vmem:[%s4311_s1 + $0x4] sm:$0xf]  ;;  %v2751_v9 = vld [vmem:[%s4311_s1 + $0x8] sm:$0xf0] }
   0xf   :  { %257 = vmatpush.bf16.msra.mxu0 %v2758_v3  ;;  %v2750_v10 = vor.u32 %v3196_v6, %v2749_v5  ;;  %3295 = vmatpush.bf16.msra.mxu2 %v2758_v3  ;;  %v2754_v11 = vor.u32 %v3195_v8, %v2751_v9  ;;  %v3037_v12 = vld [vmem:[#allocation2 + $0x1e0] sm:$0xf]  ;;  %v3261_v13 = vld [vmem:[#allocation2 + $0x1ec] sm:$0xf0]  ;;  %v3188_v18 = vld [vmem:[%s4310_s0 + $0x48] sm:$0xff]  ;;  %vm202_vm0 = vcmask 261120  }
  0x10   :  { %346 = vmatpush.bf16.msra.mxu1 %v2762_v7  ;;  %3297 = vmatpush.bf16.msra.mxu3 %v2762_v7  ;;  %v2909_v14 = vld [vmem:[#allocation2 + $0xe0] sm:$0xf]  ;;  %v3038_v15 = vor.u32 %v3261_v13, %v3037_v12  ;;  %v3229_v16 = vld [vmem:[#allocation2 + $0xec] sm:$0xf0]  ;;  %v3227_v21 = vld [vmem:[#allocation2 + $0xe4] sm:$0xf] }
  0x11   :  { %v3179_v17 = vld [vmem:[%s4310_s0] sm:$0xff]  ;;  %v2910_v19 = vor.u32 %v3229_v16, %v2909_v14  ;;  %v2911_v22 = vld [vmem:[#allocation2 + $0xf0] sm:$0xf0]  ;;  %v3225_v28 = vld [vmem:[#allocation2 + $0xcc] sm:$0xf0]  ;;  %s2669_s17 = sshll.u32 %s4317_s7, 4  ;;  %s2670_s17 = int_to_ptr.hbm [resolvable:$true] %s2669_s17 }
  0x12   :  { %v3484_v20 = vld [vmem:[%s4310_s0 + $0x40] sm:$0xff]  ;;  %v2914_v23 = vor.u32 %v3227_v21, %v2911_v22  ;;  %v3039_v25 = vld [vmem:[#allocation2 + $0x1f0] sm:$0xf0]  ;;  %v3257_v30 = vld [vmem:[#allocation2 + $0x1cc] sm:$0xf0]  ;;  %s3403_s18 = smov 128  }
  0x13   :  { %258 = vmatpush.bf16.msra.mxu0 %v2750_v10  ;;  %3296 = vmatpush.bf16.msra.mxu2 %v2750_v10  ;;  %v3259_v24 = vld [vmem:[#allocation2 + $0x1e4] sm:$0xf]  ;;  %v2893_v26 = vld [vmem:[#allocation2 + $0xc0] sm:$0xf]  ;;  %v3180_v33 = vld [vmem:[%s4310_s0 + $0x8] sm:$0xff]  ;;  %s3404_s19 = smov 8  }
  0x14   :  { %347 = vmatpush.bf16.msra.mxu1 %v2754_v11  ;;  %3298 = vmatpush.bf16.msra.mxu3 %v2754_v11  ;;  %v3042_v27 = vor.u32 %v3259_v24, %v3039_v25  ;;  %v3021_v29 = vld [vmem:[#allocation2 + $0x1c0] sm:$0xf]  ;;  %v2894_v31 = vor.u32 %v3225_v28, %v2893_v26  ;;  %v3189_v34 = vld [vmem:[%s4310_s0 + $0x50] sm:$0xff]  ;;  %v3223_v35 = vld [vmem:[#allocation2 + $0xc4] sm:$0xf] }
  0x15   :  { %v3022_v32 = vor.u32 %v3257_v30, %v3021_v29  ;;  %v2895_v36 = vld [vmem:[#allocation2 + $0xd0] sm:$0xf0]  ;;  %v3255_v38 = vld [vmem:[#allocation2 + $0x1c4] sm:$0xf]  ;;  %v2877_v40 = vld [vmem:[#allocation2 + $0xa0] sm:$0xf] }
  0x16   :  { %2763 = vmatmul.msk.bf16.vlgmr.msra.gmra.mxu0 %vm202_vm0, %v3179_v17  ;;  %2772 = vmatmul.msk.bf16.vlgmr.msra.gmra.mxu2 %vm202_vm0, %v3188_v18  ;;  %v2898_v37 = vor.u32 %v3223_v35, %v2895_v36  ;;  %v3023_v39 = vld [vmem:[#allocation2 + $0x1d0] sm:$0xf0]  ;;  %v3221_v42 = vld [vmem:[#allocation2 + $0xac] sm:$0xf0]  ;;  %v3005_v43 = vld [vmem:[#allocation2 + $0x1a0] sm:$0xf] }
  0x17   :  { %983 = vmatpush.bf16.msrb.mxu2 %v2910_v19  ;;  %2779 = vmatmul.msk.bf16.vlgmr.msra.gmra.mxu1 %vm202_vm0, %v3179_v17  ;;  %v3026_v41 = vor.u32 %v3255_v38, %v3023_v39  ;;  %v3253_v44 = vld [vmem:[#allocation2 + $0x1ac] sm:$0xf0]  ;;  %v2878_v45 = vor.u32 %v3221_v42, %v2877_v40  ;;  %v3190_v48 = vld [vmem:[%s4310_s0 + $0x58] sm:$0xff]  ;;  %v3251_v49 = vld [vmem:[#allocation2 + $0x1a4] sm:$0xf] }
  0x18   :  { %1072 = vmatpush.bf16.msrb.mxu3 %v3038_v15  ;;  %1161 = vmatpush.bf16.msrb.mxu0 %v2914_v23  ;;  %v3006_v46 = vor.u32 %v3253_v44, %v3005_v43  ;;  %v3181_v47 = vld [vmem:[%s4310_s0 + $0x10] sm:$0xff]  ;;  %v2861_v52 = vld [vmem:[#allocation2 + $0x80] sm:$0xf]  ;;  %v3219_v54 = vld [vmem:[#allocation2 + $0xa4] sm:$0xf] }
  0x19   :  { %2787 = vmatmul.msk.bf16.vlgmr.msra.gmra.mxu3 %vm202_vm0, %v3484_v20  ;;  %1250 = vmatpush.bf16.msrb.mxu1 %v3042_v27  ;;  %v3007_v50 = vld [vmem:[#allocation2 + $0x1b0] sm:$0xf0]  ;;  %v3217_v53 = vld [vmem:[#allocation2 + $0x8c] sm:$0xf0]  ;;  %v2989_v57 = vld [vmem:[#allocation2 + $0x180] sm:$0xf] }
  0x1a   :  { %v3010_v51 = vor.u32 %v3251_v49, %v3007_v50  ;;  %v2862_v55 = vor.u32 %v3217_v53, %v2861_v52  ;;  %v2879_v56 = vld [vmem:[#allocation2 + $0xb0] sm:$0xf0]  ;;  %v3249_v58 = vld [vmem:[#allocation2 + $0x18c] sm:$0xf0]  ;;  %v3182_v61 = vld [vmem:[%s4310_s0 + $0x18] sm:$0xff] }
  0x1b   :  { %984 = vmatpush.bf16.msrb.mxu2 %v2894_v31  ;;  %v2882_v59 = vor.u32 %v3219_v54, %v2879_v56  ;;  %v2990_v60 = vor.u32 %v3249_v58, %v2989_v57  ;;  %v3191_v62 = vld [vmem:[%s4310_s0 + $0x60] sm:$0xff]  ;;  %v3213_v0 = vld [vmem:[#allocation2 + $0x6c] sm:$0xf0]  ;;  %v2991_v3 = vld [vmem:[#allocation2 + $0x190] sm:$0xf0] }
  0x1c   :  { %1073 = vmatpush.bf16.msrb.mxu3 %v3022_v32  ;;  %1162 = vmatpush.bf16.msrb.mxu0 %v2898_v37  ;;  %v2845_v63 = vld [vmem:[#allocation2 + $0x60] sm:$0xf]  ;;  %v3247_v2 = vld [vmem:[#allocation2 + $0x184] sm:$0xf]  ;;  %v2863_v6 = vld [vmem:[#allocation2 + $0x90] sm:$0xf0] }
  0x1d   :  { %1251 = vmatpush.bf16.msrb.mxu1 %v3026_v41  ;;  %v2846_v1 = vor.u32 %v3213_v0, %v2845_v63  ;;  %v3215_v4 = vld [vmem:[#allocation2 + $0x84] sm:$0xf]  ;;  %v2994_v5 = vor.u32 %v3247_v2, %v2991_v3  ;;  %v2973_v7 = vld [vmem:[#allocation2 + $0x160] sm:$0xf]  ;;  %v3245_v8 = vld [vmem:[#allocation2 + $0x16c] sm:$0xf0] }
  0x1e   :  { %v2866_v9 = vor.u32 %v3215_v4, %v2863_v6  ;;  %v2974_v10 = vor.u32 %v3245_v8, %v2973_v7  ;;  %v3183_v11 = vld [vmem:[%s4310_s0 + $0x20] sm:$0xff]  ;;  %v3192_v12 = vld [vmem:[%s4310_s0 + $0x68] sm:$0xff]  ;;  %v3209_v14 = vld [vmem:[#allocation2 + $0x4c] sm:$0xf0] }
  0x1f   :  { %985 = vmatpush.bf16.msrb.mxu2 %v2878_v45  ;;  %v2829_v13 = vld [vmem:[#allocation2 + $0x40] sm:$0xf]  ;;  %v3243_v16 = vld [vmem:[#allocation2 + $0x164] sm:$0xf]  ;;  %v2975_v17 = vld [vmem:[#allocation2 + $0x170] sm:$0xf0] }
  0x20   :  { %1074 = vmatpush.bf16.msrb.mxu3 %v3006_v46  ;;  %1163 = vmatpush.bf16.msrb.mxu0 %v2882_v59  ;;  %v2830_v15 = vor.u32 %v3209_v14, %v2829_v13  ;;  %v2978_v19 = vor.u32 %v3243_v16, %v2975_v17  ;;  %v3241_v21 = vld [vmem:[#allocation2 + $0x14c] sm:$0xf0]  ;;  %v3211_v22 = vld [vmem:[#allocation2 + $0x64] sm:$0xf]  ;;  %v2847_v23 = vld [vmem:[#allocation2 + $0x70] sm:$0xf0] }
  0x21   :  { %1252 = vmatpush.bf16.msrb.mxu1 %v3010_v51  ;;  %v2850_v25 = vor.u32 %v3211_v22, %v2847_v23  ;;  %v3184_v26 = vld [vmem:[%s4310_s0 + $0x28] sm:$0xff]  ;;  %v3193_v27 = vld [vmem:[%s4310_s0 + $0x70] sm:$0xff]  ;;  %v2813_v28 = vld [vmem:[#allocation2 + $0x20] sm:$0xf] }
  0x22   :  { %v3205_v29 = vld [vmem:[#allocation2 + $0x2c] sm:$0xf0]  ;;  %v3239_v31 = vld [vmem:[#allocation2 + $0x144] sm:$0xf]  ;;  %v2959_v32 = vld [vmem:[#allocation2 + $0x150] sm:$0xf0] }
  0x23   :  { %986 = vmatpush.bf16.msrb.mxu2 %v2862_v55  ;;  %v2814_v30 = vor.u32 %v3205_v29, %v2813_v28  ;;  %v3237_v35 = vld [vmem:[#allocation2 + $0x12c] sm:$0xf0]  ;;  %v3194_v38 = vld [vmem:[%s4310_s0 + $0x78] sm:$0xff]  ;;  %v3207_v39 = vld [vmem:[#allocation2 + $0x44] sm:$0xf] }
  0x24   :  { %1075 = vmatpush.bf16.msrb.mxu3 %v2990_v60  ;;  %1164 = vmatpush.bf16.msrb.mxu0 %v2866_v9  ;;  %v3185_v37 = vld [vmem:[%s4310_s0 + $0x30] sm:$0xff]  ;;  %v2797_v41 = vld [vmem:[#allocation2] sm:$0xf]  ;;  %v3235_v45 = vld [vmem:[#allocation2 + $0x124] sm:$0xf] }
  0x25   :  { %1253 = vmatpush.bf16.msrb.mxu1 %v2994_v5  ;;  %v2831_v40 = vld [vmem:[#allocation2 + $0x50] sm:$0xf0]  ;;  %v3201_v43 = vld [vmem:[#allocation2 + $0xc] sm:$0xf0]  ;;  %v2925_v51 = vld [vmem:[#allocation2 + $0x100] sm:$0xf] }
  0x26   :  { %2764 = vmatmul.msk.bf16.gmra.mxu0 %vm202_vm0, %v3180_v33  ;;  %2773 = vmatmul.msk.bf16.gmra.mxu2 %vm202_vm0, %v3189_v34  ;;  %v2834_v42 = vor.u32 %v3207_v39, %v2831_v40  ;;  %v2798_v44 = vor.u32 %v3201_v43, %v2797_v41  ;;  %v2943_v46 = vld [vmem:[#allocation2 + $0x130] sm:$0xf0]  ;;  %v3233_v52 = vld [vmem:[#allocation2 + $0x10c] sm:$0xf0]  ;;  %v3231_v53 = vld [vmem:[#allocation2 + $0x104] sm:$0xf] }
  0x27   :  { %2780 = vmatmul.msk.bf16.gmra.mxu1 %vm202_vm0, %v3180_v33  ;;  %987 = vmatpush.bf16.msrb.mxu2 %v2846_v1  ;;  %v2941_v33 = vld [vmem:[#allocation2 + $0x120] sm:$0xf]  ;;  %v2815_v49 = vld [vmem:[#allocation2 + $0x30] sm:$0xf0]  ;;  %v2926_v54 = vor.u32 %v3233_v52, %v2925_v51  ;;  %v3199_v57 = vld [vmem:[#allocation2 + $0x4] sm:$0xf] }
  0x28   :  { %1076 = vmatpush.bf16.msrb.mxu3 %v2974_v10  ;;  %1165 = vmatpush.bf16.msrb.mxu0 %v2850_v25  ;;  %v2942_v36 = vor.u32 %v3237_v35, %v2941_v33  ;;  %v2927_v55 = vld [vmem:[#allocation2 + $0x110] sm:$0xf0]  ;;  %v3186_v59 = vld [vmem:[%s4310_s0 + $0x38] sm:$0xff]  ;;  %v96_v0 = vld [vmem:[%s4312_s2] sm:$0x3] }
  0x29   :  { %2788 = vmatmul.msk.bf16.gmra.mxu3 %vm202_vm0, %v3188_v18  ;;  %v2957_v18 = vld [vmem:[#allocation2 + $0x140] sm:$0xf]  ;;  %1254 = vmatpush.bf16.msrb.mxu1 %v2978_v19  ;;  %v2930_v56 = vor.u32 %v3231_v53, %v2927_v55  ;;  %v2799_v58 = vld [vmem:[#allocation2 + $0x10] sm:$0xf0]  ;;  %v3560_v2 = vperm.slane %v96_v0, 1  ;;  %v3562_v5 = vperm.slane %v96_v0, 0 }
  0x2a   :  { %v2958_v24 = vor.u32 %v3241_v21, %v2957_v18  ;;  %v2802_v60 = vor.u32 %v3199_v57, %v2799_v58  ;;  %v3045_v3 = vld [vmem:[#allocation2 + $0x1e8] sm:$0xf]  ;;  %v3262_v4 = vld [vmem:[#allocation2 + $0x1f4] sm:$0xf0]  ;;  %v3260_v28 = vld [vmem:[#allocation2 + $0x1ec] sm:$0xf] }
  0x2b   :  { %988 = vmatpush.bf16.msrb.mxu2 %v2830_v15  ;;  %v3046_v7 = vor.u32 %v3262_v4, %v3045_v3  ;;  %v3047_v29 = vld [vmem:[#allocation2 + $0x1f8] sm:$0xf0]  ;;  %v2901_v35 = vld [vmem:[#allocation2 + $0xc8] sm:$0xf] }
  0x2c   :  { %1077 = vmatpush.bf16.msrb.mxu3 %v2958_v24  ;;  %1166 = vmatpush.bf16.msrb.mxu0 %v2834_v42  ;;  %v2919_v40 = vld [vmem:[#allocation2 + $0xf8] sm:$0xf0] }
  0x2f   :  { %989 = vmatpush.bf16.msrb.mxu2 %v2814_v30 }
  0x30   :  { %1078 = vmatpush.bf16.msrb.mxu3 %v2942_v36  ;;  %v3226_v36 = vld [vmem:[#allocation2 + $0xd4] sm:$0xf0] }
  0x31   :  { %v2902_v39 = vor.u32 %v3226_v36, %v2901_v35  ;;  %v3222_v35 = vld [vmem:[#allocation2 + $0xb4] sm:$0xf0]  ;;  %v3224_v36 = vld [vmem:[#allocation2 + $0xcc] sm:$0xf] }
  0x33   :  { %990 = vmatpush.bf16.msrb.mxu2 %v2798_v44 }
  0x34   :  { %1079 = vmatpush.bf16.msrb.mxu3 %v2926_v54 }
  0x36   :  { %2765 = vmatmul.msk.bf16.gmra.mxu0 %vm202_vm0, %v3181_v47  ;;  %2774 = vmatmul.msk.bf16.gmra.mxu2 %vm202_vm0, %v3190_v48 }
  0x37   :  { %2781 = vmatmul.msk.bf16.gmra.mxu1 %vm202_vm0, %v3181_v47  ;;  %v2946_v47 = vor.u32 %v3235_v45, %v2943_v46 }
  0x38   :  { %1428 = vmatpush.bf16.msra.mxu3 %v3046_v7 }
  0x39   :  { %2789 = vmatmul.msk.bf16.gmra.mxu3 %vm202_vm0, %v3189_v34  ;;  %v2962_v34 = vor.u32 %v3239_v31, %v2959_v32  ;;  %v3050_v31 = vor.u32 %v3260_v28, %v3047_v29 }
  0x3b   :  { %1255 = vmatpush.bf16.msrb.mxu1 %v2962_v34 }
  0x3f   :  { %1256 = vmatpush.bf16.msrb.mxu1 %v2946_v47 }
  0x43   :  { %1257 = vmatpush.bf16.msrb.mxu1 %v2930_v56 }
  0x46   :  { %2766 = vmatmul.msk.bf16.gmra.mxu0 %vm202_vm0, %v3182_v61  ;;  %2775 = vmatmul.msk.bf16.gmra.mxu2 %vm202_vm0, %v3191_v62 }
  0x47   :  { %2782 = vmatmul.msk.bf16.gmra.mxu1 %vm202_vm0, %v3182_v61  ;;  %v2917_v61 = vld [vmem:[#allocation2 + $0xe8] sm:$0xf] }
  0x48   :  { %1606 = vmatpush.bf16.msra.mxu1 %v3050_v31 }
  0x49   :  { %2790 = vmatmul.msk.bf16.gmra.mxu3 %vm202_vm0, %v3190_v48  ;;  %v3203_v48 = vld [vmem:[#allocation2 + $0x24] sm:$0xf] }
  0x4a   :  { %v2818_v50 = vor.u32 %v3203_v48, %v2815_v49 }
  0x4c   :  { %1167 = vmatpush.bf16.msrb.mxu0 %v2818_v50 }
  0x50   :  { %1168 = vmatpush.bf16.msrb.mxu0 %v2802_v60  ;;  %v3258_v60 = vld [vmem:[#allocation2 + $0x1d4] sm:$0xf0] }
  0x56   :  { %2767 = vmatmul.msk.bf16.gmra.mxu0 %vm202_vm0, %v3183_v11  ;;  %2776 = vmatmul.msk.bf16.gmra.mxu2 %vm202_vm0, %v3192_v12 }
  0x57   :  { %2783 = vmatmul.msk.bf16.gmra.mxu1 %vm202_vm0, %v3183_v11 }
  0x59   :  { %2791 = vmatmul.msk.bf16.gmra.mxu3 %vm202_vm0, %v3191_v62  ;;  %v3230_v62 = vld [vmem:[#allocation2 + $0xf4] sm:$0xf0] }
  0x5a   :  { %v2918_v63 = vor.u32 %v3230_v62, %v2917_v61 }
  0x5c   :  { %1339 = vmatpush.bf16.msra.mxu2 %v2918_v63 }
  0x60   :  { %1340 = vmatpush.bf16.msra.mxu2 %v2902_v39 }
  0x66   :  { %2768 = vmatmul.msk.bf16.gmra.mxu0 %vm202_vm0, %v3184_v26  ;;  %2777 = vmatmul.msk.bf16.gmra.mxu2 %vm202_vm0, %v3193_v27 }
  0x67   :  { %2784 = vmatmul.msk.bf16.gmra.mxu1 %vm202_vm0, %v3184_v26 }
  0x69   :  { %2792 = vmatmul.msk.bf16.gmra.mxu3 %vm202_vm0, %v3192_v12 }
  0x76   :  { %2769 = vmatmul.msk.bf16.gmra.mxu0 %vm202_vm0, %v3185_v37  ;;  %2778 = vmatmul.msk.bf16.gmra.mxu2 %vm202_vm0, %v3194_v38 }
  0x77   :  { %2785 = vmatmul.msk.bf16.gmra.mxu1 %vm202_vm0, %v3185_v37  ;;  %v3228_v37 = vld [vmem:[#allocation2 + $0xec] sm:$0xf] }
  0x78   :  { %v2922_v43 = vor.u32 %v3228_v37, %v2919_v40  ;;  %v2903_v40 = vld [vmem:[#allocation2 + $0xd8] sm:$0xf0] }
  0x79   :  { %2793 = vmatmul.msk.bf16.gmra.mxu3 %vm202_vm0, %v3193_v27 }
  0x7a   :  { %1517 = vmatpush.bf16.msra.mxu0 %v2922_v43  ;;  %v2906_v43 = vor.u32 %v3224_v36, %v2903_v40  ;;  %v3252_v40 = vld [vmem:[#allocation2 + $0x1ac] sm:$0xf] }
  0x7e   :  { %1518 = vmatpush.bf16.msra.mxu0 %v2906_v43 }
  0x86   :  { %2770 = vmatmul.msk.bf16.gmra.mxu0 %vm202_vm0, %v3186_v59 }
  0x87   :  { %2786 = vmatmul.msk.bf16.gmra.mxu1 %vm202_vm0, %v3186_v59  ;;  %v3029_v59 = vld [vmem:[#allocation2 + $0x1c8] sm:$0xf] }
  0x88   :  { %v3030_v62 = vor.u32 %v3258_v60, %v3029_v59 }
  0x89   :  { %2794 = vmatmul.msk.bf16.gmra.mxu3 %vm202_vm0, %v3194_v38 }
  0x8a   :  { %1429 = vmatpush.bf16.msra.mxu3 %v3030_v62 }
  0x93   :  { %v260_v1 = vpop.f32.mrf.mxu0 }
  0x94   :  { %v349_v6 = vpop.f32.mrf.mxu1  ;;  %v261_v9 = vadd.f32 %v260_v1, %v3562_v5 }
  0x95   :  { %v350_v8 = vadd.f32 %v349_v6, %v3560_v2 }
  0x96   :  { %2771 = vmatmul.msk.bf16.gmra.mxu0 %vm202_vm0, %v3484_v20  ;;  %v429_v13 = vmul.f32 0.2, %v261_v9 }
  0x97   :  { %v430_v11 = vmul.f32 0.2, %v350_v8 }
  0x98   :  { %v493_v21 = vmax.f32 %v261_v9, %v429_v13 }
  0x99   :  { %v3572_v17 = vpop.f32.mrf.mxu2  ;;  %v494_v19 = vmax.f32 %v350_v8, %v430_v11 }
  0x9b   :  { %v262_v12 = vpop.f32.mrf.mxu0 }
  0x9c   :  { %v3568_v10 = vpop.f32.mrf.mxu3  ;;  %v263_v14 = vadd.f32 %v262_v12, %v3562_v5  ;;  %v351_v15 = vpop.f32.mrf.mxu1 }
  0x9d   :  { %v352_v16 = vadd.f32 %v351_v15, %v3560_v2 }
  0x9e   :  { %v431_v18 = vmul.f32 0.2, %v263_v14 }
  0x9f   :  { %v432_v20 = vmul.f32 0.2, %v352_v16 }
  0xa0   :  { %v495_v22 = vmax.f32 %v263_v14, %v431_v18 }
  0xa1   :  { %v496_v23 = vmax.f32 %v352_v16, %v432_v20  ;;  %v3585_v33 = vpop.f32.mrf.mxu2 }
  0xa2   :  { %v3574_v24 = vpack.c.bf16 %v495_v22, %v493_v21 }
  0xa3   :  { %v3578_v26 = vpack.c.bf16 %v496_v23, %v494_v19  ;;  %v265_v27 = vpop.f32.mrf.mxu0  ;;  %v3256_v23 = vld [vmem:[#allocation2 + $0x1cc] sm:$0xf] }
  0xa4   :  { %v3576_v25 = vpop.f32.mrf.mxu3  ;;  %v354_v30 = vpop.f32.mrf.mxu1  ;;  %991 = vmatmul.bf16.vlgmr.msrb.gmra.mxu2 %v3574_v24  ;;  %v266_v34 = vadd.f32 %v265_v27, %v3562_v5  ;;  %v3031_v27 = vld [vmem:[#allocation2 + $0x1d8] sm:$0xf0] }
  0xa5   :  { %1080 = vmatmul.bf16.vlgmr.msrb.gmra.mxu3 %v3578_v26  ;;  %1258 = vmatmul.bf16.vlgmr.msrb.gmra.mxu1 %v3578_v26  ;;  %v355_v32 = vadd.f32 %v354_v30, %v3560_v2  ;;  %v3034_v29 = vor.u32 %v3256_v23, %v3031_v27 }
  0xa6   :  { %1169 = vmatmul.bf16.vlgmr.msrb.gmra.mxu0 %v3574_v24  ;;  %v433_v44 = vmul.f32 0.2, %v266_v34 }
  0xa7   :  { %v434_v41 = vmul.f32 0.2, %v355_v32  ;;  %1607 = vmatpush.bf16.msra.mxu1 %v3034_v29 }
  0xa8   :  { %v497_v51 = vmax.f32 %v266_v34, %v433_v44  ;;  %v2885_v34 = vld [vmem:[#allocation2 + $0xa8] sm:$0xf] }
  0xa9   :  { %v498_v49 = vmax.f32 %v355_v32, %v434_v41  ;;  %v3592_v54 = vpop.f32.mrf.mxu2  ;;  %v2886_v39 = vor.u32 %v3222_v35, %v2885_v34 }
  0xab   :  { %v267_v42 = vpop.f32.mrf.mxu0  ;;  %1341 = vmatpush.bf16.msra.mxu2 %v2886_v39 }
  0xac   :  { %v3588_v38 = vpop.f32.mrf.mxu3  ;;  %v268_v45 = vadd.f32 %v267_v42, %v3562_v5  ;;  %v356_v46 = vpop.f32.mrf.mxu1 }
  0xad   :  { %v357_v47 = vadd.f32 %v356_v46, %v3560_v2 }
  0xae   :  { %v435_v48 = vmul.f32 0.2, %v268_v45 }
  0xaf   :  { %v436_v50 = vmul.f32 0.2, %v357_v47 }
  0xb0   :  { %v499_v52 = vmax.f32 %v268_v45, %v435_v48 }
  0xb1   :  { %v500_v53 = vmax.f32 %v357_v47, %v436_v50  ;;  %v3608_v6 = vpop.f32.mrf.mxu2 }
  0xb2   :  { %v3594_v55 = vpack.c.bf16 %v499_v52, %v497_v51 }
  0xb3   :  { %v3598_v57 = vpack.c.bf16 %v500_v53, %v498_v49  ;;  %v270_v58 = vpop.f32.mrf.mxu0 }
  0xb4   :  { %v3596_v56 = vpop.f32.mrf.mxu3  ;;  %v359_v61 = vpop.f32.mrf.mxu1  ;;  %996 = vmatmul.bf16.gmra.mxu2 %v3594_v55  ;;  %v271_v0 = vadd.f32 %v270_v58, %v3562_v5 }
  0xb5   :  { %1085 = vmatmul.bf16.gmra.mxu3 %v3598_v57  ;;  %1263 = vmatmul.bf16.gmra.mxu1 %v3598_v57  ;;  %v360_v63 = vadd.f32 %v359_v61, %v3560_v2 }
  0xb6   :  { %1174 = vmatmul.bf16.gmra.mxu0 %v3594_v55  ;;  %v437_v7 = vmul.f32 0.2, %v271_v0 }
  0xb7   :  { %v438_v3 = vmul.f32 0.2, %v360_v63 }
  0xb8   :  { %v501_v15 = vmax.f32 %v271_v0, %v437_v7  ;;  %v3254_v0 = vld [vmem:[#allocation2 + $0x1b4] sm:$0xf0] }
  0xb9   :  { %v502_v13 = vmax.f32 %v360_v63, %v438_v3  ;;  %v3621_v30 = vpop.f32.mrf.mxu2  ;;  %v3013_v63 = vld [vmem:[#allocation2 + $0x1a8] sm:$0xf] }
  0xbb   :  { %v272_v4 = vpop.f32.mrf.mxu0 }
  0xbc   :  { %v3606_v1 = vpop.f32.mrf.mxu3  ;;  %v273_v8 = vadd.f32 %v272_v4, %v3562_v5  ;;  %v361_v9 = vpop.f32.mrf.mxu1  ;;  %v3014_v4 = vor.u32 %v3254_v0, %v3013_v63 }
  0xbd   :  { %v362_v11 = vadd.f32 %v361_v9, %v3560_v2 }
  0xbe   :  { %v439_v12 = vmul.f32 0.2, %v273_v8  ;;  %1430 = vmatpush.bf16.msra.mxu3 %v3014_v4 }
  0xbf   :  { %v440_v14 = vmul.f32 0.2, %v362_v11 }
  0xc0   :  { %v503_v16 = vmax.f32 %v273_v8, %v439_v12 }
  0xc1   :  { %v504_v18 = vmax.f32 %v362_v11, %v440_v14  ;;  %v3630_v51 = vpop.f32.mrf.mxu2 }
  0xc2   :  { %v3612_v19 = vpack.c.bf16 %v503_v16, %v501_v15 }
  0xc3   :  { %v3616_v21 = vpack.c.bf16 %v504_v18, %v502_v13  ;;  %v275_v22 = vpop.f32.mrf.mxu0 }
  0xc4   :  { %v3614_v20 = vpop.f32.mrf.mxu3  ;;  %v364_v28 = vpop.f32.mrf.mxu1  ;;  %1001 = vmatmul.bf16.gmra.mxu2 %v3612_v19  ;;  %v276_v32 = vadd.f32 %v275_v22, %v3562_v5 }
  0xc5   :  { %1090 = vmatmul.bf16.gmra.mxu3 %v3616_v21  ;;  %1268 = vmatmul.bf16.gmra.mxu1 %v3616_v21  ;;  %v365_v31 = vadd.f32 %v364_v28, %v3560_v2 }
  0xc6   :  { %1179 = vmatmul.bf16.gmra.mxu0 %v3612_v19  ;;  %v441_v44 = vmul.f32 0.2, %v276_v32 }
  0xc7   :  { %v442_v41 = vmul.f32 0.2, %v365_v31 }
  0xc8   :  { %v505_v52 = vmax.f32 %v276_v32, %v441_v44 }
  0xc9   :  { %v506_v49 = vmax.f32 %v365_v31, %v442_v41  ;;  %v3644_v9 = vpop.f32.mrf.mxu2  ;;  %v3015_v41 = vld [vmem:[#allocation2 + $0x1b8] sm:$0xf0] }
  0xca   :  { %v3018_v43 = vor.u32 %v3252_v40, %v3015_v41 }
  0xcb   :  { %v277_v42 = vpop.f32.mrf.mxu0 }
  0xcc   :  { %v3626_v37 = vpop.f32.mrf.mxu3  ;;  %v278_v45 = vadd.f32 %v277_v42, %v3562_v5  ;;  %v366_v46 = vpop.f32.mrf.mxu1  ;;  %1608 = vmatpush.bf16.msra.mxu1 %v3018_v43 }
  0xcd   :  { %v367_v47 = vadd.f32 %v366_v46, %v3560_v2  ;;  %v2869_v46 = vld [vmem:[#allocation2 + $0x88] sm:$0xf] }
  0xce   :  { %v443_v48 = vmul.f32 0.2, %v278_v45 }
  0xcf   :  { %v444_v50 = vmul.f32 0.2, %v367_v47 }
  0xd0   :  { %v507_v53 = vmax.f32 %v278_v45, %v443_v48  ;;  %v3220_v48 = vld [vmem:[#allocation2 + $0xac] sm:$0xf] }
  0xd1   :  { %v508_v58 = vmax.f32 %v367_v47, %v444_v50  ;;  %v3656_v39 = vpop.f32.mrf.mxu2  ;;  %v3218_v47 = vld [vmem:[#allocation2 + $0x94] sm:$0xf0]  ;;  %v2887_v50 = vld [vmem:[#allocation2 + $0xb8] sm:$0xf0] }
  0xd2   :  { %v3632_v59 = vpack.c.bf16 %v507_v53, %v505_v52 }
  0xd3   :  { %v3636_v61 = vpack.c.bf16 %v508_v58, %v506_v49  ;;  %v280_v62 = vpop.f32.mrf.mxu0  ;;  %v2870_v49 = vor.u32 %v3218_v47, %v2869_v46  ;;  %v2890_v58 = vor.u32 %v3220_v48, %v2887_v50 }
  0xd4   :  { %4342 = vst [vmem:[#allocation11_spill] sm:$0xff] %v3632_v59  ;;  %v3634_v60 = vpop.f32.mrf.mxu3  ;;  %v369_v3 = vpop.f32.mrf.mxu1  ;;  %1006 = vmatmul.bf16.gmra.mxu2 %v3632_v59  ;;  %v281_v8 = vadd.f32 %v280_v62, %v3562_v5 }
  0xd5   :  { %4343 = vst [vmem:[#allocation12_spill] sm:$0xff] %v3636_v61  ;;  %1095 = vmatmul.bf16.gmra.mxu3 %v3636_v61  ;;  %1273 = vmatmul.bf16.gmra.mxu1 %v3636_v61  ;;  %v370_v7 = vadd.f32 %v369_v3, %v3560_v2 }
  0xd6   :  { %1184 = vmatmul.bf16.gmra.mxu0 %v3632_v59  ;;  %v445_v14 = vmul.f32 0.2, %v281_v8  ;;  %1342 = vmatpush.bf16.msra.mxu2 %v2870_v49 }
  0xd7   :  { %v446_v12 = vmul.f32 0.2, %v370_v7  ;;  %1519 = vmatpush.bf16.msra.mxu0 %v2890_v58 }
  0xd8   :  { %v509_v28 = vmax.f32 %v281_v8, %v445_v14 }
  0xd9   :  { %v510_v23 = vmax.f32 %v370_v7, %v446_v12  ;;  %v3668_v7 = vpop.f32.mrf.mxu2 }
  0xdb   :  { %v282_v13 = vpop.f32.mrf.mxu0 }
  0xdc   :  { %v3646_v11 = vpop.f32.mrf.mxu3  ;;  %v283_v15 = vadd.f32 %v282_v13, %v3562_v5  ;;  %v371_v16 = vpop.f32.mrf.mxu1 }
  0xdd   :  { %v372_v18 = vadd.f32 %v371_v16, %v3560_v2 }
  0xde   :  { %v447_v22 = vmul.f32 0.2, %v283_v15 }
  0xdf   :  { %v448_v27 = vmul.f32 0.2, %v372_v18 }
  0xe0   :  { %v511_v29 = vmax.f32 %v283_v15, %v447_v22 }
  0xe1   :  { %v512_v31 = vmax.f32 %v372_v18, %v448_v27  ;;  %v2997_v27 = vld [vmem:[#allocation2 + $0x188] sm:$0xf]  ;;  %v3681_v41 = vpop.f32.mrf.mxu2 }
  0xe2   :  { %v3650_v32 = vpack.c.bf16 %v511_v29, %v509_v28  ;;  %v3250_v28 = vld [vmem:[#allocation2 + $0x194] sm:$0xf0] }
  0xe3   :  { %v3654_v35 = vpack.c.bf16 %v512_v31, %v510_v23  ;;  %v285_v36 = vpop.f32.mrf.mxu0  ;;  %v2998_v31 = vor.u32 %v3250_v28, %v2997_v27 }
  0xe4   :  { %4344 = vst [vmem:[#allocation13_spill] sm:$0xff] %v3650_v32  ;;  %v3652_v34 = vpop.f32.mrf.mxu3  ;;  %v374_v42 = vpop.f32.mrf.mxu1  ;;  %1011 = vmatmul.bf16.gmra.mxu2 %v3650_v32  ;;  %v286_v45 = vadd.f32 %v285_v36, %v3562_v5 }
  0xe5   :  { %4345 = vst [vmem:[#allocation14_spill] sm:$0xff] %v3654_v35  ;;  %1100 = vmatmul.bf16.gmra.mxu3 %v3654_v35  ;;  %1278 = vmatmul.bf16.gmra.mxu1 %v3654_v35  ;;  %v375_v44 = vadd.f32 %v374_v42, %v3560_v2 }
  0xe6   :  { %1189 = vmatmul.bf16.gmra.mxu0 %v3650_v32  ;;  %v449_v62 = vmul.f32 0.2, %v286_v45  ;;  %1431 = vmatpush.bf16.msra.mxu3 %v2998_v31  ;;  %v3214_v31 = vld [vmem:[#allocation2 + $0x74] sm:$0xf0] }
  0xe7   :  { %v450_v52 = vmul.f32 0.2, %v375_v44 }
  0xe8   :  { %v513_v14 = vmax.f32 %v286_v45, %v449_v62 }
  0xe9   :  { %v514_v12 = vmax.f32 %v375_v44, %v450_v52 }
  0xeb   :  { %v287_v53 = vpop.f32.mrf.mxu0 }
  0xec   :  { %v288_v63 = vadd.f32 %v287_v53, %v3562_v5  ;;  %v376_v0 = vpop.f32.mrf.mxu1  ;;  %v3665_v3 = vpop.f32.mrf.mxu3 }
  0xed   :  { %v377_v4 = vadd.f32 %v376_v0, %v3560_v2  ;;  %v3688_v0 = vpop.f32.mrf.mxu2 }
  0xee   :  { %v451_v8 = vmul.f32 0.2, %v288_v63 }
  0xef   :  { %v452_v13 = vmul.f32 0.2, %v377_v4 }
  0xf0   :  { %v515_v15 = vmax.f32 %v288_v63, %v451_v8  ;;  %v3248_v8 = vld [vmem:[#allocation2 + $0x18c] sm:$0xf] }
  0xf1   :  { %v516_v16 = vmax.f32 %v377_v4, %v452_v13 }
  0xf2   :  { %v3670_v18 = vpack.c.bf16 %v515_v15, %v513_v14 }
  0xf3   :  { %v3672_v22 = vpack.c.bf16 %v516_v16, %v514_v12  ;;  %v290_v23 = vpop.f32.mrf.mxu0  ;;  %v2999_v12 = vld [vmem:[#allocation2 + $0x198] sm:$0xf0] }
  0xf4   :  { %4346 = vst [vmem:[#allocation15_spill] sm:$0xff] %v3670_v18  ;;  %v379_v29 = vpop.f32.mrf.mxu1  ;;  %1016 = vmatmul.bf16.gmra.mxu2 %v3670_v18  ;;  %v3678_v36 = vpop.f32.mrf.mxu3  ;;  %v291_v42 = vadd.f32 %v290_v23, %v3562_v5  ;;  %v3002_v15 = vor.u32 %v3248_v8, %v2999_v12 }
  0xf5   :  { %4347 = vst [vmem:[#allocation16_spill] sm:$0xff] %v3672_v22  ;;  %1105 = vmatmul.bf16.gmra.mxu3 %v3672_v22  ;;  %1283 = vmatmul.bf16.gmra.mxu1 %v3672_v22  ;;  %v380_v40 = vadd.f32 %v379_v29, %v3560_v2  ;;  %v2853_v29 = vld [vmem:[#allocation2 + $0x68] sm:$0xf] }
  0xf6   :  { %1194 = vmatmul.bf16.gmra.mxu0 %v3670_v18  ;;  %v453_v45 = vmul.f32 0.2, %v291_v42  ;;  %1609 = vmatpush.bf16.msra.mxu1 %v3002_v15 }
  0xf7   :  { %v454_v43 = vmul.f32 0.2, %v380_v40 }
  0xf8   :  { %v517_v53 = vmax.f32 %v291_v42, %v453_v45  ;;  %v3702_v42 = vpop.f32.mrf.mxu2 }
  0xf9   :  { %v518_v50 = vmax.f32 %v380_v40, %v454_v43 }
  0xfb   :  { %v292_v44 = vpop.f32.mrf.mxu0 }
  0xfc   :  { %v293_v46 = vadd.f32 %v292_v44, %v3562_v5  ;;  %v381_v47 = vpop.f32.mrf.mxu1  ;;  %v3686_v62 = vpop.f32.mrf.mxu3  ;;  %v2854_v44 = vor.u32 %v3214_v31, %v2853_v29 }
  0xfd   :  { %v382_v48 = vadd.f32 %v381_v47, %v3560_v2 }
  0xfe   :  { %v455_v49 = vmul.f32 0.2, %v293_v46  ;;  %1343 = vmatpush.bf16.msra.mxu2 %v2854_v44  ;;  %v2981_v44 = vld [vmem:[#allocation2 + $0x168] sm:$0xf] }
  0xff   :  { %v456_v52 = vmul.f32 0.2, %v382_v48 }
 0x100   :  { %v519_v58 = vmax.f32 %v293_v46, %v455_v49 }
 0x101   :  { %v520_v63 = vmax.f32 %v382_v48, %v456_v52  ;;  %v2871_v52 = vld [vmem:[#allocation2 + $0x98] sm:$0xf0] }
 0x102   :  { %v3690_v4 = vpack.c.bf16 %v519_v58, %v517_v53 }
 0x103   :  { %v3692_v13 = vpack.c.bf16 %v520_v63, %v518_v50  ;;  %v295_v14 = vpop.f32.mrf.mxu0  ;;  %v3216_v50 = vld [vmem:[#allocation2 + $0x8c] sm:$0xf] }
 0x104   :  { %4348 = vst [vmem:[#allocation17_spill] sm:$0xff] %v3690_v4  ;;  %v384_v16 = vpop.f32.mrf.mxu1  ;;  %1021 = vmatmul.bf16.gmra.mxu2 %v3690_v4  ;;  %v296_v27 = vadd.f32 %v295_v14, %v3562_v5  ;;  %v3700_v28 = vpop.f32.mrf.mxu3  ;;  %v2874_v63 = vor.u32 %v3216_v50, %v2871_v52 }
 0x105   :  { %4349 = vst [vmem:[#allocation18_spill] sm:$0xff] %v3692_v13  ;;  %1110 = vmatmul.bf16.gmra.mxu3 %v3692_v13  ;;  %1288 = vmatmul.bf16.gmra.mxu1 %v3692_v13  ;;  %v385_v23 = vadd.f32 %v384_v16, %v3560_v2 }
 0x106   :  { %1199 = vmatmul.bf16.gmra.mxu0 %v3690_v4  ;;  %v457_v45 = vmul.f32 0.2, %v296_v27 }
 0x107   :  { %v458_v40 = vmul.f32 0.2, %v385_v23  ;;  %1520 = vmatpush.bf16.msra.mxu0 %v2874_v63 }
 0x108   :  { %v521_v8 = vmax.f32 %v296_v27, %v457_v45  ;;  %v392_v27 = vadd.f32 %v3576_v25, %v3560_v2  ;;  %v3246_v45 = vld [vmem:[#allocation2 + $0x174] sm:$0xf0] }
 0x109   :  { %v522_v53 = vmax.f32 %v385_v23, %v458_v40  ;;  %v390_v23 = vadd.f32 %v3568_v10, %v3560_v2 }
 0x10b   :  { %v297_v43 = vpop.f32.mrf.mxu0 }
 0x10c   :  { %v298_v46 = vadd.f32 %v297_v43, %v3562_v5  ;;  %v386_v47 = vpop.f32.mrf.mxu1  ;;  %v3711_v31 = vpop.f32.mrf.mxu3 }
 0x10d   :  { %v387_v48 = vadd.f32 %v386_v47, %v3560_v2  ;;  %v3713_v43 = vpop.f32.mrf.mxu2  ;;  %v462_v47 = vmul.f32 0.2, %v390_v23 }
 0x10e   :  { %v459_v49 = vmul.f32 0.2, %v298_v46 }
 0x10f   :  { %v460_v58 = vmul.f32 0.2, %v387_v48  ;;  %v526_v25 = vmax.f32 %v390_v23, %v462_v47 }
 0x110   :  { %v523_v12 = vmax.f32 %v298_v46, %v459_v49  ;;  %v2982_v46 = vor.u32 %v3246_v45, %v2981_v44 }
 0x111   :  { %v524_v14 = vmax.f32 %v387_v48, %v460_v58  ;;  %v464_v48 = vmul.f32 0.2, %v392_v27 }
 0x112   :  { %v3706_v15 = vpack.c.bf16 %v523_v12, %v521_v8  ;;  %1432 = vmatpush.bf16.msra.mxu3 %v2982_v46  ;;  %v3244_v46 = vld [vmem:[#allocation2 + $0x16c] sm:$0xf] }
 0x113   :  { %v3708_v16 = vpack.c.bf16 %v524_v14, %v522_v53  ;;  %v300_v29 = vpop.f32.mrf.mxu0  ;;  %v653_v53 = vld [vmem:[%s4314_s4] sm:$0xf]  ;;  %v528_v63 = vmax.f32 %v392_v27, %v464_v48  ;;  %v306_v27 = vadd.f32 %v3572_v17, %v3562_v5  ;;  %v397_v48 = vadd.f32 %v3596_v56, %v3560_v2 }
 0x114   :  { %4350 = vst [vmem:[#allocation19_spill] sm:$0xff] %v3706_v15  ;;  %1026 = vmatmul.bf16.gmra.mxu2 %v3706_v15  ;;  %v301_v40 = vadd.f32 %v300_v29, %v3562_v5  ;;  %v3727_v58 = vpop.f32.mrf.mxu3  ;;  %v3731_v29 = vperm.slane %v653_v53, 1  ;;  %v3739_v23 = vperm.slane %v653_v53, 0 }
 0x115   :  { %4351 = vst [vmem:[#allocation20_spill] sm:$0xff] %v3708_v16  ;;  %1115 = vmatmul.bf16.gmra.mxu3 %v3708_v16  ;;  %1293 = vmatmul.bf16.gmra.mxu1 %v3708_v16  ;;  %v3729_v8 = vpop.f32.mrf.mxu2  ;;  %v3735_v16 = vpack.c.bf16 %v528_v63, %v526_v25  ;;  %v465_v53 = vmul.f32 0.2, %v306_v27  ;;  %v2837_v63 = vld [vmem:[#allocation2 + $0x48] sm:$0xf] }
 0x116   :  { %1204 = vmatmul.bf16.gmra.mxu0 %v3706_v15  ;;  %v461_v50 = vmul.f32 0.2, %v301_v40 }
 0x117   :  { %4353 = vst [vmem:[#allocation22_spill] sm:$0xff] %v3735_v16 }
 0x118   :  { %v525_v12 = vmax.f32 %v301_v40, %v461_v50  ;;  %v308_v40 = vadd.f32 %v3585_v33, %v3562_v5 }
 0x11a   :  { %v467_v33 = vmul.f32 0.2, %v308_v40 }
 0x11b   :  { %v302_v49 = vpop.f32.mrf.mxu0 }
 0x11c   :  { %v303_v52 = vadd.f32 %v302_v49, %v3562_v5  ;;  %v2983_v49 = vld [vmem:[#allocation2 + $0x178] sm:$0xf0] }
 0x11d   :  { %v2986_v13 = vor.u32 %v3244_v46, %v2983_v49  ;;  %v531_v49 = vmax.f32 %v308_v40, %v467_v33 }
 0x11e   :  { %v463_v10 = vmul.f32 0.2, %v303_v52 }
 0x11f   :  { %1610 = vmatpush.bf16.msra.mxu1 %v2986_v13 }
 0x120   :  { %v527_v14 = vmax.f32 %v303_v52, %v463_v10 }
 0x122   :  { %v3733_v44 = vpack.c.bf16 %v527_v14, %v525_v12  ;;  %v1259_v45 = vpop.f32.mrf.mxu1  ;;  %v3210_v12 = vld [vmem:[#allocation2 + $0x54] sm:$0xf0]  ;;  %v468_v14 = vmul.f32 0.2, %v397_v48 }
 0x123   :  { %v1170_v15 = vpop.f32.mrf.mxu0  ;;  %v2838_v13 = vor.u32 %v3210_v12, %v2837_v63 }
 0x124   :  { %4352 = vst [vmem:[#allocation21_spill] sm:$0xff] %v3733_v44  ;;  %v1171_v4 = vadd.f32 %v1170_v15, %v3731_v29  ;;  %1031 = vmatmul.bf16.gmra.mxu2 %v3733_v44  ;;  %v395_v15 = vadd.f32 %v3588_v38, %v3560_v2  ;;  %v529_v38 = vmax.f32 %v306_v27, %v465_v53 }
 0x125   :  { %1120 = vmatmul.bf16.gmra.mxu3 %v3735_v16  ;;  %1298 = vmatmul.bf16.gmra.mxu1 %v3735_v16  ;;  %v532_v18 = vmax.f32 %v397_v48, %v468_v14  ;;  %v400_v48 = vadd.f32 %v3606_v1, %v3560_v2 }
 0x126   :  { %v1260_v47 = vadd.f32 %v1259_v45, %v1171_v4  ;;  %1209 = vmatmul.bf16.gmra.mxu0 %v3733_v44  ;;  %v466_v4 = vmul.f32 0.2, %v395_v15  ;;  %1344 = vmatpush.bf16.msra.mxu2 %v2838_v13  ;;  %v3212_v44 = vld [vmem:[#allocation2 + $0x6c] sm:$0xf]  ;;  %v3755_v59 = vpack.c.bf16 %v531_v49, %v529_v38 }
 0x127   :  { %v992_v50 = vpop.f32.mrf.mxu2 }
 0x128   :  { %v993_v17 = vadd.f32 %v992_v50, %v3739_v23  ;;  %v1081_v52 = vpop.f32.mrf.mxu3  ;;  %v1696_v56 = vmul.f32 0.2, %v1260_v47  ;;  %v2855_v50 = vld [vmem:[#allocation2 + $0x78] sm:$0xf0]  ;;  %v530_v22 = vmax.f32 %v395_v15, %v466_v4 }
 0x12a   :  { %v1082_v10 = vadd.f32 %v1081_v52, %v993_v17  ;;  %v1261_v25 = vpop.f32.mrf.mxu1  ;;  %v2858_v17 = vor.u32 %v3212_v44, %v2855_v50  ;;  %v1824_v63 = vmax.f32 %v1260_v47, %v1696_v56  ;;  %v3757_v33 = vpack.c.bf16 %v532_v18, %v530_v22  ;;  %v2965_v22 = vld [vmem:[#allocation2 + $0x148] sm:$0xf] }
 0x12b   :  { %v1172_v45 = vpop.f32.mrf.mxu0  ;;  %v313_v47 = vadd.f32 %v3608_v6, %v3562_v5  ;;  %v470_v50 = vmul.f32 0.2, %v400_v48 }
 0x12c   :  { %v1173_v46 = vadd.f32 %v1172_v45, %v3731_v29  ;;  %1521 = vmatpush.bf16.msra.mxu0 %v2858_v17  ;;  %v1695_v12 = vmul.f32 0.2, %v1082_v10 }
 0x12d   :  { %v471_v38 = vmul.f32 0.2, %v313_v47 }
 0x12e   :  { %v1262_v16 = vadd.f32 %v1261_v25, %v1173_v46 }
 0x12f   :  { %v994_v35 = vpop.f32.mrf.mxu2 }
 0x130   :  { %v1700_v52 = vmul.f32 0.2, %v1262_v16  ;;  %v995_v32 = vadd.f32 %v994_v35, %v3739_v23  ;;  %v1083_v61 = vpop.f32.mrf.mxu3  ;;  %v311_v35 = vadd.f32 %v3592_v54, %v3562_v5  ;;  %v402_v54 = vadd.f32 %v3614_v20, %v3560_v2 }
 0x132   :  { %v1828_v27 = vmax.f32 %v1262_v16, %v1700_v52  ;;  %v1084_v40 = vadd.f32 %v1083_v61, %v995_v32  ;;  %v1264_v53 = vpop.f32.mrf.mxu1  ;;  %v1823_v61 = vmax.f32 %v1082_v10, %v1695_v12  ;;  %v3242_v16 = vld [vmem:[#allocation2 + $0x154] sm:$0xf0]  ;;  %v469_v10 = vmul.f32 0.2, %v311_v35 }
 0x133   :  { %v1175_v25 = vpop.f32.mrf.mxu0  ;;  %v2966_v14 = vor.u32 %v3242_v16, %v2965_v22  ;;  %v472_v17 = vmul.f32 0.2, %v402_v54  ;;  %v535_v12 = vmax.f32 %v313_v47, %v471_v38 }
 0x134   :  { %v3759_v45 = vpack.c.bf16 %v1828_v27, %v1824_v63  ;;  %v1699_v15 = vmul.f32 0.2, %v1084_v40  ;;  %v1176_v44 = vadd.f32 %v1175_v25, %v3731_v29  ;;  %1036 = vmatmul.bf16.gmra.mxu2 %v3755_v59  ;;  %v533_v63 = vmax.f32 %v311_v35, %v469_v10 }
 0x135   :  { %1125 = vmatmul.bf16.gmra.mxu3 %v3757_v33  ;;  %1303 = vmatmul.bf16.gmra.mxu1 %v3757_v33 }
 0x136   :  { %v1827_v32 = vmax.f32 %v1084_v40, %v1699_v15  ;;  %v1265_v18 = vadd.f32 %v1264_v53, %v1176_v44  ;;  %1214 = vmatmul.bf16.gmra.mxu0 %v3755_v59  ;;  %1433 = vmatpush.bf16.msra.mxu3 %v2966_v14  ;;  %v534_v40 = vmax.f32 %v400_v48, %v470_v50 }
 0x137   :  { %v997_v4 = vpop.f32.mrf.mxu2  ;;  %v536_v53 = vmax.f32 %v402_v54, %v472_v17 }
 0x138   :  { %v3774_v6 = vpack.c.bf16 %v1827_v32, %v1823_v61  ;;  %v998_v13 = vadd.f32 %v997_v4, %v3739_v23  ;;  %v1086_v46 = vpop.f32.mrf.mxu3  ;;  %v1704_v20 = vmul.f32 0.2, %v1265_v18  ;;  %v3779_v32 = vpack.c.bf16 %v535_v12, %v533_v63 }
 0x139   :  { %v3781_v35 = vpack.c.bf16 %v536_v53, %v534_v40  ;;  %v405_v63 = vadd.f32 %v3626_v37, %v3560_v2  ;;  %v407_v12 = vadd.f32 %v3634_v60, %v3560_v2 }
 0x13a   :  { %v1087_v49 = vadd.f32 %v1086_v46, %v998_v13  ;;  %v1266_v56 = vpop.f32.mrf.mxu1  ;;  %v1832_v22 = vmax.f32 %v1265_v18, %v1704_v20  ;;  %v3240_v46 = vld [vmem:[#allocation2 + $0x14c] sm:$0xf]  ;;  %v316_v18 = vadd.f32 %v3621_v30, %v3562_v5 }
 0x13b   :  { %v1177_v52 = vpop.f32.mrf.mxu0 }
 0x13c   :  { %v1178_v1 = vadd.f32 %v1177_v52, %v3731_v29  ;;  %v1703_v16 = vmul.f32 0.2, %v1087_v49  ;;  %v2967_v52 = vld [vmem:[#allocation2 + $0x158] sm:$0xf0]  ;;  %v473_v40 = vmul.f32 0.2, %v316_v18 }
 0x13d   :  { %v2970_v10 = vor.u32 %v3240_v46, %v2967_v52  ;;  %v3208_v52 = vld [vmem:[#allocation2 + $0x4c] sm:$0xf] }
 0x13e   :  { %v1267_v27 = vadd.f32 %v1266_v56, %v1178_v1  ;;  %v318_v56 = vadd.f32 %v3630_v51, %v3562_v5  ;;  %v1831_v50 = vmax.f32 %v1087_v49, %v1703_v16 }
 0x13f   :  { %v999_v25 = vpop.f32.mrf.mxu2  ;;  %1611 = vmatpush.bf16.msra.mxu1 %v2970_v10 }
 0x140   :  { %v1708_v15 = vmul.f32 0.2, %v1267_v27  ;;  %v1000_v44 = vadd.f32 %v999_v25, %v3739_v23  ;;  %v1088_v61 = vpop.f32.mrf.mxu3  ;;  %v475_v53 = vmul.f32 0.2, %v318_v56 }
 0x142   :  { %v1836_v4 = vmax.f32 %v1267_v27, %v1708_v15  ;;  %v1089_v14 = vadd.f32 %v1088_v61, %v1000_v44  ;;  %v1269_v13 = vpop.f32.mrf.mxu1  ;;  %v2821_v15 = vld [vmem:[#allocation2 + $0x28] sm:$0xf]  ;;  %v3206_v44 = vld [vmem:[#allocation2 + $0x34] sm:$0xf0]  ;;  %v474_v61 = vmul.f32 0.2, %v405_v63  ;;  %v539_v60 = vmax.f32 %v318_v56, %v475_v53 }
 0x143   :  { %v1180_v47 = vpop.f32.mrf.mxu0 }
 0x144   :  { %v1707_v48 = vmul.f32 0.2, %v1089_v14  ;;  %v1181_v54 = vadd.f32 %v1180_v47, %v3731_v29  ;;  %1041 = vmatmul.bf16.gmra.mxu2 %v3779_v32  ;;  %v3785_v38 = vpack.c.bf16 %v1836_v4, %v1832_v22  ;;  %v476_v22 = vmul.f32 0.2, %v407_v12  ;;  %v2839_v47 = vld [vmem:[#allocation2 + $0x58] sm:$0xf0] }
 0x145   :  { %1130 = vmatmul.bf16.gmra.mxu3 %v3781_v35  ;;  %1308 = vmatmul.bf16.gmra.mxu1 %v3781_v35  ;;  %v2822_v4 = vor.u32 %v3206_v44, %v2821_v15  ;;  %v538_v10 = vmax.f32 %v405_v63, %v474_v61  ;;  %v321_v61 = vadd.f32 %v3644_v9, %v3562_v5 }
 0x146   :  { %v1835_v17 = vmax.f32 %v1089_v14, %v1707_v48  ;;  %v1270_v1 = vadd.f32 %v1269_v13, %v1181_v54  ;;  %1219 = vmatmul.bf16.gmra.mxu0 %v3779_v32  ;;  %v537_v14 = vmax.f32 %v316_v18, %v473_v40  ;;  %v540_v48 = vmax.f32 %v407_v12, %v476_v22 }
 0x147   :  { %v1002_v30 = vpop.f32.mrf.mxu2  ;;  %1345 = vmatpush.bf16.msra.mxu2 %v2822_v4  ;;  %v412_v9 = vadd.f32 %v3652_v34, %v3560_v2 }
 0x148   :  { %v1003_v20 = vadd.f32 %v1002_v30, %v3739_v23  ;;  %v1091_v51 = vpop.f32.mrf.mxu3  ;;  %v3799_v27 = vpack.c.bf16 %v1835_v17, %v1831_v50  ;;  %v1712_v13 = vmul.f32 0.2, %v1270_v1  ;;  %v2842_v50 = vor.u32 %v3208_v52, %v2839_v47 }
 0x149   :  { %v3805_v53 = vpack.c.bf16 %v540_v48, %v538_v10 }
 0x14a   :  { %v1092_v49 = vadd.f32 %v1091_v51, %v1003_v20  ;;  %v1271_v25 = vpop.f32.mrf.mxu1  ;;  %v3803_v51 = vpack.c.bf16 %v539_v60, %v537_v14  ;;  %1522 = vmatpush.bf16.msra.mxu0 %v2842_v50  ;;  %v1840_v15 = vmax.f32 %v1270_v1, %v1712_v13  ;;  %v323_v1 = vadd.f32 %v3656_v39, %v3562_v5  ;;  %v2949_v14 = vld [vmem:[#allocation2 + $0x128] sm:$0xf]  ;;  %v3238_v60 = vld [vmem:[#allocation2 + $0x134] sm:$0xf0] }
 0x14b   :  { %v1182_v16 = vpop.f32.mrf.mxu0  ;;  %v410_v13 = vadd.f32 %v3646_v11, %v3560_v2  ;;  %v2950_v52 = vor.u32 %v3238_v60, %v2949_v14 }
 0x14c   :  { %v1183_v37 = vadd.f32 %v1182_v16, %v3731_v29  ;;  %v1711_v44 = vmul.f32 0.2, %v1092_v49  ;;  %v479_v48 = vmul.f32 0.2, %v323_v1 }
 0x14d   :  { %1434 = vmatpush.bf16.msra.mxu3 %v2950_v52 }
 0x14e   :  { %v1272_v46 = vadd.f32 %v1271_v25, %v1183_v37  ;;  %v1839_v22 = vmax.f32 %v1092_v49, %v1711_v44  ;;  %v477_v49 = vmul.f32 0.2, %v321_v61  ;;  %v543_v44 = vmax.f32 %v323_v1, %v479_v48 }
 0x14f   :  { %v1004_v54 = vpop.f32.mrf.mxu2 }
 0x150   :  { %v1716_v17 = vmul.f32 0.2, %v1272_v46  ;;  %v1005_v30 = vadd.f32 %v1004_v54, %v3739_v23  ;;  %v1093_v20 = vpop.f32.mrf.mxu3 }
 0x152   :  { %v1844_v18 = vmax.f32 %v1272_v46, %v1716_v17  ;;  %v1094_v56 = vadd.f32 %v1093_v20, %v1005_v30  ;;  %v1274_v40 = vpop.f32.mrf.mxu1  ;;  %v478_v17 = vmul.f32 0.2, %v410_v13  ;;  %v480_v30 = vmul.f32 0.2, %v412_v9 }
 0x153   :  { %v1185_v25 = vpop.f32.mrf.mxu0 }
 0x154   :  { %v1715_v16 = vmul.f32 0.2, %v1094_v56  ;;  %v1186_v63 = vadd.f32 %v1185_v25, %v3731_v29  ;;  %1046 = vmatmul.bf16.gmra.mxu2 %v3803_v51  ;;  %v3809_v12 = vpack.c.bf16 %v1844_v18, %v1840_v15  ;;  %v541_v15 = vmax.f32 %v321_v61, %v477_v49 }
 0x155   :  { %1135 = vmatmul.bf16.gmra.mxu3 %v3805_v53  ;;  %1313 = vmatmul.bf16.gmra.mxu1 %v3805_v53 }
 0x156   :  { %v1843_v4 = vmax.f32 %v1094_v56, %v1715_v16  ;;  %v1275_v37 = vadd.f32 %v1274_v40, %v1186_v63  ;;  %1224 = vmatmul.bf16.gmra.mxu0 %v3803_v51  ;;  %v542_v56 = vmax.f32 %v410_v13, %v478_v17  ;;  %v544_v40 = vmax.f32 %v412_v9, %v480_v30 }
 0x157   :  { %v1007_v46 = vpop.f32.mrf.mxu2 }
 0x158   :  { %v1008_v39 = vadd.f32 %v1007_v46, %v3739_v23  ;;  %v1096_v47 = vpop.f32.mrf.mxu3  ;;  %v3823_v10 = vpack.c.bf16 %v1843_v4, %v1839_v22  ;;  %v1720_v34 = vmul.f32 0.2, %v1275_v37  ;;  %v3827_v4 = vpack.c.bf16 %v543_v44, %v541_v15 }
 0x159   :  { %v3829_v61 = vpack.c.bf16 %v544_v40, %v542_v56  ;;  %v415_v15 = vadd.f32 %v3665_v3, %v3560_v2  ;;  %v417_v44 = vadd.f32 %v3678_v36, %v3560_v2 }
 0x15a   :  { %v1097_v54 = vadd.f32 %v1096_v47, %v1008_v39  ;;  %v1276_v50 = vpop.f32.mrf.mxu1  ;;  %v1848_v14 = vmax.f32 %v1275_v37, %v1720_v34  ;;  %v3236_v47 = vld [vmem:[#allocation2 + $0x12c] sm:$0xf]  ;;  %v326_v37 = vadd.f32 %v3668_v7, %v3562_v5 }
 0x15b   :  { %v1187_v20 = vpop.f32.mrf.mxu0 }
 0x15c   :  { %v1188_v11 = vadd.f32 %v1187_v20, %v3731_v29  ;;  %v1719_v60 = vmul.f32 0.2, %v1097_v54  ;;  %v2951_v20 = vld [vmem:[#allocation2 + $0x138] sm:$0xf0]  ;;  %v481_v56 = vmul.f32 0.2, %v326_v37 }
 0x15d   :  { %v2954_v49 = vor.u32 %v3236_v47, %v2951_v20  ;;  %v3204_v20 = vld [vmem:[#allocation2 + $0x2c] sm:$0xf] }
 0x15e   :  { %v1277_v18 = vadd.f32 %v1276_v50, %v1188_v11  ;;  %v328_v50 = vadd.f32 %v3681_v41, %v3562_v5  ;;  %v1847_v17 = vmax.f32 %v1097_v54, %v1719_v60 }
 0x15f   :  { %v1009_v25 = vpop.f32.mrf.mxu2  ;;  %1612 = vmatpush.bf16.msra.mxu1 %v2954_v49 }
 0x160   :  { %v1724_v16 = vmul.f32 0.2, %v1277_v18  ;;  %v1010_v63 = vadd.f32 %v1009_v25, %v3739_v23  ;;  %v1098_v22 = vpop.f32.mrf.mxu3  ;;  %v483_v40 = vmul.f32 0.2, %v328_v50 }
 0x162   :  { %v1852_v46 = vmax.f32 %v1277_v18, %v1724_v16  ;;  %v1099_v52 = vadd.f32 %v1098_v22, %v1010_v63  ;;  %v1279_v39 = vpop.f32.mrf.mxu1  ;;  %v2805_v16 = vld [vmem:[#allocation2 + $0x8] sm:$0xf]  ;;  %v3202_v63 = vld [vmem:[#allocation2 + $0x14] sm:$0xf0]  ;;  %v482_v22 = vmul.f32 0.2, %v415_v15  ;;  %v547_v36 = vmax.f32 %v328_v50, %v483_v40 }
 0x163   :  { %v1190_v1 = vpop.f32.mrf.mxu0 }
 0x164   :  { %v1723_v13 = vmul.f32 0.2, %v1099_v52  ;;  %v1191_v9 = vadd.f32 %v1190_v1, %v3731_v29  ;;  %1051 = vmatmul.bf16.gmra.mxu2 %v3827_v4  ;;  %v3833_v48 = vpack.c.bf16 %v1852_v46, %v1848_v14  ;;  %v484_v14 = vmul.f32 0.2, %v417_v44  ;;  %v2823_v1 = vld [vmem:[#allocation2 + $0x38] sm:$0xf0] }
 0x165   :  { %1140 = vmatmul.bf16.gmra.mxu3 %v3829_v61  ;;  %1318 = vmatmul.bf16.gmra.mxu1 %v3829_v61  ;;  %v2806_v46 = vor.u32 %v3202_v63, %v2805_v16  ;;  %v546_v49 = vmax.f32 %v415_v15, %v482_v22  ;;  %v331_v22 = vadd.f32 %v3688_v0, %v3562_v5 }
 0x166   :  { %v1851_v30 = vmax.f32 %v1099_v52, %v1723_v13  ;;  %v1280_v11 = vadd.f32 %v1279_v39, %v1191_v9  ;;  %1229 = vmatmul.bf16.gmra.mxu0 %v3827_v4  ;;  %v545_v52 = vmax.f32 %v326_v37, %v481_v56  ;;  %v548_v13 = vmax.f32 %v417_v44, %v484_v14 }
 0x167   :  { %v1012_v7 = vpop.f32.mrf.mxu2  ;;  %1346 = vmatpush.bf16.msra.mxu2 %v2806_v46  ;;  %v422_v0 = vadd.f32 %v3700_v28, %v3560_v2 }
 0x168   :  { %v1013_v34 = vadd.f32 %v1012_v7, %v3739_v23  ;;  %v1101_v41 = vpop.f32.mrf.mxu3  ;;  %v3847_v18 = vpack.c.bf16 %v1851_v30, %v1847_v17  ;;  %v1728_v39 = vmul.f32 0.2, %v1280_v11  ;;  %v2826_v17 = vor.u32 %v3204_v20, %v2823_v1 }
 0x169   :  { %v3853_v40 = vpack.c.bf16 %v548_v13, %v546_v49 }
 0x16a   :  { %v1102_v54 = vadd.f32 %v1101_v41, %v1013_v34  ;;  %v1281_v25 = vpop.f32.mrf.mxu1  ;;  %v3851_v41 = vpack.c.bf16 %v547_v36, %v545_v52  ;;  %1523 = vmatpush.bf16.msra.mxu0 %v2826_v17  ;;  %v1856_v16 = vmax.f32 %v1280_v11, %v1728_v39  ;;  %v333_v11 = vadd.f32 %v3702_v42, %v3562_v5  ;;  %v2933_v52 = vld [vmem:[#allocation2 + $0x108] sm:$0xf]  ;;  %v3234_v36 = vld [vmem:[#allocation2 + $0x114] sm:$0xf0] }
 0x16b   :  { %v1192_v60 = vpop.f32.mrf.mxu0  ;;  %v420_v39 = vadd.f32 %v3686_v62, %v3560_v2  ;;  %v2934_v20 = vor.u32 %v3234_v36, %v2933_v52 }
 0x16c   :  { %v1193_v3 = vadd.f32 %v1192_v60, %v3731_v29  ;;  %v1727_v63 = vmul.f32 0.2, %v1102_v54  ;;  %v487_v13 = vmul.f32 0.2, %v333_v11 }
 0x16d   :  { %1435 = vmatpush.bf16.msra.mxu3 %v2934_v20 }
 0x16e   :  { %v1282_v47 = vadd.f32 %v1281_v25, %v1193_v3  ;;  %v1855_v14 = vmax.f32 %v1102_v54, %v1727_v63  ;;  %v485_v54 = vmul.f32 0.2, %v331_v22  ;;  %v551_v63 = vmax.f32 %v333_v11, %v487_v13 }
 0x16f   :  { %v1014_v9 = vpop.f32.mrf.mxu2 }
 0x170   :  { %v1732_v30 = vmul.f32 0.2, %v1282_v47  ;;  %v1015_v7 = vadd.f32 %v1014_v9, %v3739_v23  ;;  %v1103_v34 = vpop.f32.mrf.mxu3 }
 0x172   :  { %v1860_v37 = vmax.f32 %v1282_v47, %v1732_v30  ;;  %v1104_v50 = vadd.f32 %v1103_v34, %v1015_v7  ;;  %v1284_v56 = vpop.f32.mrf.mxu1  ;;  %v486_v30 = vmul.f32 0.2, %v420_v39  ;;  %v488_v7 = vmul.f32 0.2, %v422_v0 }
 0x173   :  { %v1195_v25 = vpop.f32.mrf.mxu0 }
 0x174   :  { %v1731_v60 = vmul.f32 0.2, %v1104_v50  ;;  %v1196_v15 = vadd.f32 %v1195_v25, %v3731_v29  ;;  %1056 = vmatmul.bf16.gmra.mxu2 %v3851_v41  ;;  %v3857_v44 = vpack.c.bf16 %v1860_v37, %v1856_v16  ;;  %v549_v16 = vmax.f32 %v331_v22, %v485_v54 }
 0x175   :  { %1145 = vmatmul.bf16.gmra.mxu3 %v3853_v40  ;;  %1323 = vmatmul.bf16.gmra.mxu1 %v3853_v40 }
 0x176   :  { %v1859_v46 = vmax.f32 %v1104_v50, %v1731_v60  ;;  %v1285_v3 = vadd.f32 %v1284_v56, %v1196_v15  ;;  %1234 = vmatmul.bf16.gmra.mxu0 %v3851_v41  ;;  %v550_v50 = vmax.f32 %v420_v39, %v486_v30  ;;  %v552_v56 = vmax.f32 %v422_v0, %v488_v7  ;;  %v3232_v60 = vld [vmem:[#allocation2 + $0x10c] sm:$0xf]  ;;  %v2935_v15 = vld [vmem:[#allocation2 + $0x118] sm:$0xf0] }
 0x177   :  { %v1017_v47 = vpop.f32.mrf.mxu2  ;;  %v2938_v36 = vor.u32 %v3232_v60, %v2935_v15 }
 0x178   :  { %v1018_v42 = vadd.f32 %v1017_v47, %v3739_v23  ;;  %v1106_v1 = vpop.f32.mrf.mxu3  ;;  %v3871_v49 = vpack.c.bf16 %v1859_v46, %v1855_v14  ;;  %v1736_v28 = vmul.f32 0.2, %v1285_v3  ;;  %v3875_v47 = vpack.c.bf16 %v551_v63, %v549_v16 }
 0x179   :  { %1613 = vmatpush.bf16.msra.mxu1 %v2938_v36  ;;  %v3877_v0 = vpack.c.bf16 %v552_v56, %v550_v50  ;;  %v427_v50 = vadd.f32 %v3727_v58, %v3560_v2 }
 0x17a   :  { %v1107_v9 = vadd.f32 %v1106_v1, %v1018_v42  ;;  %v1286_v17 = vpop.f32.mrf.mxu1  ;;  %v1864_v20 = vmax.f32 %v1285_v3, %v1736_v28  ;;  %v3200_v42 = vld [vmem:[#allocation2 + $0xc] sm:$0xf]  ;;  %v2807_v1 = vld [vmem:[#allocation2 + $0x18] sm:$0xf0]  ;;  %v336_v3 = vadd.f32 %v3713_v43, %v3562_v5 }
 0x17b   :  { %v1197_v34 = vpop.f32.mrf.mxu0  ;;  %v2810_v39 = vor.u32 %v3200_v42, %v2807_v1 }
 0x17c   :  { %v1198_v62 = vadd.f32 %v1197_v34, %v3731_v29  ;;  %v1735_v34 = vmul.f32 0.2, %v1107_v9 }
 0x17d   :  { %1524 = vmatpush.bf16.msra.mxu0 %v2810_v39 }
 0x17e   :  { %v1287_v37 = vadd.f32 %v1286_v17, %v1198_v62  ;;  %v338_v62 = vadd.f32 %v3729_v8, %v3562_v5  ;;  %v1863_v16 = vmax.f32 %v1107_v9, %v1735_v34  ;;  %v489_v8 = vmul.f32 0.2, %v336_v3 }
 0x17f   :  { %v1019_v25 = vpop.f32.mrf.mxu2 }
 0x180   :  { %v1740_v14 = vmul.f32 0.2, %v1287_v37  ;;  %v1020_v46 = vadd.f32 %v1019_v25, %v3739_v23  ;;  %v1108_v52 = vpop.f32.mrf.mxu3  ;;  %v491_v60 = vmul.f32 0.2, %v338_v62 }
 0x182   :  { %v1868_v22 = vmax.f32 %v1287_v37, %v1740_v14  ;;  %v1109_v11 = vadd.f32 %v1108_v52, %v1020_v46  ;;  %v1289_v54 = vpop.f32.mrf.mxu1  ;;  %v425_v37 = vadd.f32 %v3711_v31, %v3560_v2  ;;  %v3270_v14 = vld [vmem:[#allocation5 + $0x38] sm:$0xff]  ;;  %v492_v52 = vmul.f32 0.2, %v427_v50 }
 0x183   :  { %v1200_v13 = vpop.f32.mrf.mxu0  ;;  %2275 = vmatpush.bf16.msrb.mxu2 %v3270_v14  ;;  %v553_v31 = vmax.f32 %v336_v3, %v489_v8  ;;  %v555_v42 = vmax.f32 %v338_v62, %v491_v60  ;;  %v3278_v60 = vld [vmem:[#allocation5 + $0x78] sm:$0xff] }
 0x184   :  { %v1739_v17 = vmul.f32 0.2, %v1109_v11  ;;  %v1201_v30 = vadd.f32 %v1200_v13, %v3731_v29  ;;  %1061 = vmatmul.bf16.gmra.mxu2 %v3875_v47  ;;  %v3881_v7 = vpack.c.bf16 %v1868_v22, %v1864_v20  ;;  %v490_v46 = vmul.f32 0.2, %v425_v37  ;;  %2364 = vmatpush.bf16.msrb.mxu3 %v3278_v60 }
 0x185   :  { %1150 = vmatmul.bf16.gmra.mxu3 %v3877_v0  ;;  %1328 = vmatmul.bf16.gmra.mxu1 %v3877_v0  ;;  %v556_v34 = vmax.f32 %v427_v50, %v492_v52  ;;  %v3899_v13 = vpack.c.bf16 %v555_v42, %v553_v31 }
 0x186   :  { %v1867_v63 = vmax.f32 %v1109_v11, %v1739_v17  ;;  %v1290_v28 = vadd.f32 %v1289_v54, %v1201_v30  ;;  %1239 = vmatmul.bf16.gmra.mxu0 %v3875_v47  ;;  %v554_v1 = vmax.f32 %v425_v37, %v490_v46 }
 0x187   :  { %v1022_v56 = vpop.f32.mrf.mxu2 }
 0x188   :  { %v1023_v43 = vadd.f32 %v1022_v56, %v3739_v23  ;;  %v1111_v25 = vpop.f32.mrf.mxu3  ;;  %v3895_v5 = vpack.c.bf16 %v1867_v63, %v1863_v16  ;;  %v1744_v2 = vmul.f32 0.2, %v1290_v28 }
 0x18a   :  { %v1112_v15 = vadd.f32 %v1111_v25, %v1023_v43  ;;  %v1291_v9 = vpop.f32.mrf.mxu1  ;;  %v1872_v17 = vmax.f32 %v1290_v28, %v1744_v2  ;;  %v3901_v43 = vpack.c.bf16 %v556_v34, %v554_v1 }
 0x18b   :  { %v1202_v36 = vpop.f32.mrf.mxu0 }
 0x18c   :  { %v1203_v20 = vadd.f32 %v1202_v36, %v3731_v29  ;;  %v1743_v30 = vmul.f32 0.2, %v1112_v15 }
 0x18e   :  { %v1292_v58 = vadd.f32 %v1291_v9, %v1203_v20  ;;  %v1871_v50 = vmax.f32 %v1112_v15, %v1743_v30 }
 0x18f   :  { %v1024_v22 = vpop.f32.mrf.mxu2 }
 0x190   :  { %v1748_v11 = vmul.f32 0.2, %v1292_v58  ;;  %v1025_v54 = vadd.f32 %v1024_v22, %v3739_v23  ;;  %v1113_v39 = vpop.f32.mrf.mxu3 }
 0x192   :  { %v1876_v16 = vmax.f32 %v1292_v58, %v1748_v11  ;;  %v1114_v63 = vadd.f32 %v1113_v39, %v1025_v54  ;;  %v1294_v56 = vpop.f32.mrf.mxu1 }
 0x193   :  { %v1205_v3 = vpop.f32.mrf.mxu0 }
 0x194   :  { %v1747_v62 = vmul.f32 0.2, %v1114_v63  ;;  %v1206_v25 = vadd.f32 %v1205_v3, %v3731_v29  ;;  %1066 = vmatmul.bf16.gmra.mxu2 %v3899_v13  ;;  %v3905_v37 = vpack.c.bf16 %v1876_v16, %v1872_v17  ;;  %v3294_v16 = vld [vmem:[#allocation5 + $0xf8] sm:$0xff] }
 0x195   :  { %1155 = vmatmul.bf16.gmra.mxu3 %v3901_v43  ;;  %1333 = vmatmul.bf16.gmra.mxu1 %v3901_v43 }
 0x196   :  { %v1875_v28 = vmax.f32 %v1114_v63, %v1747_v62  ;;  %v1295_v8 = vadd.f32 %v1294_v56, %v1206_v25  ;;  %1244 = vmatmul.bf16.gmra.mxu0 %v3899_v13  ;;  %2542 = vmatpush.bf16.msrb.mxu1 %v3294_v16 }
 0x197   :  { %v1027_v9 = vpop.f32.mrf.mxu2 }
 0x198   :  { %v1028_v14 = vadd.f32 %v1027_v9, %v3739_v23  ;;  %v1116_v46 = vpop.f32.mrf.mxu3  ;;  %v3911_v52 = vpack.c.bf16 %v1875_v28, %v1871_v50  ;;  %v1752_v2 = vmul.f32 0.2, %v1295_v8 }
 0x19a   :  { %v1117_v36 = vadd.f32 %v1116_v46, %v1028_v14  ;;  %v1296_v20 = vpop.f32.mrf.mxu1  ;;  %v1880_v11 = vmax.f32 %v1295_v8, %v1752_v2 }
 0x19b   :  { %v1207_v31 = vpop.f32.mrf.mxu0 }
 0x19c   :  { %v1208_v42 = vadd.f32 %v1207_v31, %v3731_v29  ;;  %v1751_v54 = vmul.f32 0.2, %v1117_v36  ;;  %v3269_v31 = vld [vmem:[#allocation5 + $0x30] sm:$0xff] }
 0x19d   :  { %2276 = vmatpush.bf16.msrb.mxu2 %v3269_v31 }
 0x19e   :  { %v1297_v58 = vadd.f32 %v1296_v20, %v1208_v42  ;;  %v1879_v25 = vmax.f32 %v1117_v36, %v1751_v54  ;;  %v3926_v36 = vld [vmem:[#allocation5 + $0xb8] sm:$0xff] }
 0x19f   :  { %v1029_v15 = vpop.f32.mrf.mxu2  ;;  %2453 = vmatpush.bf16.msrb.mxu0 %v3926_v36 }
 0x1a0   :  { %v1756_v1 = vmul.f32 0.2, %v1297_v58  ;;  %v1030_v34 = vadd.f32 %v1029_v15, %v3739_v23  ;;  %v1118_v22 = vpop.f32.mrf.mxu3 }
 0x1a2   :  { %v1884_v39 = vmax.f32 %v1297_v58, %v1756_v1  ;;  %v1119_v17 = vadd.f32 %v1118_v22, %v1030_v34  ;;  %v1299_v30 = vpop.f32.mrf.mxu1 }
 0x1a3   :  { %v1210_v63 = vpop.f32.mrf.mxu0 }
 0x1a4   :  { %v1755_v56 = vmul.f32 0.2, %v1119_v17  ;;  %v1211_v3 = vadd.f32 %v1210_v63, %v3731_v29  ;;  %1347 = vmatmul.bf16.vlgmr.msra.gmra.mxu2 %v3574_v24  ;;  %v3917_v62 = vpack.c.bf16 %v1884_v39, %v1880_v11 }
 0x1a5   :  { %1436 = vmatmul.bf16.vlgmr.msra.gmra.mxu3 %v3578_v26  ;;  %1614 = vmatmul.bf16.vlgmr.msra.gmra.mxu1 %v3578_v26 }
 0x1a6   :  { %v1883_v50 = vmax.f32 %v1119_v17, %v1755_v56  ;;  %v1300_v28 = vadd.f32 %v1299_v30, %v1211_v3  ;;  %1525 = vmatmul.bf16.vlgmr.msra.gmra.mxu0 %v3574_v24 }
 0x1a7   :  { %v1032_v8 = vpop.f32.mrf.mxu2 }
 0x1a8   :  { %v1033_v60 = vadd.f32 %v1032_v8, %v3739_v23  ;;  %v1121_v9 = vpop.f32.mrf.mxu3  ;;  %v3923_v14 = vpack.c.bf16 %v1883_v50, %v1879_v25  ;;  %v1760_v58 = vmul.f32 0.2, %v1300_v28 }
 0x1aa   :  { %v1122_v46 = vadd.f32 %v1121_v9, %v1033_v60  ;;  %v1301_v20 = vpop.f32.mrf.mxu1  ;;  %v1888_v22 = vmax.f32 %v1300_v28, %v1760_v58  ;;  %v3277_v28 = vld [vmem:[#allocation5 + $0x70] sm:$0xff] }
 0x1ab   :  { %v1212_v42 = vpop.f32.mrf.mxu0  ;;  %2365 = vmatpush.bf16.msrb.mxu3 %v3277_v28 }
 0x1ac   :  { %v1213_v2 = vadd.f32 %v1212_v42, %v3731_v29  ;;  %v1759_v11 = vmul.f32 0.2, %v1122_v46 }
 0x1ae   :  { %v1302_v26 = vadd.f32 %v1301_v20, %v1213_v2  ;;  %v1887_v3 = vmax.f32 %v1122_v46, %v1759_v11 }
 0x1af   :  { %v1034_v15 = vpop.f32.mrf.mxu2 }
 0x1b0   :  { %v1764_v1 = vmul.f32 0.2, %v1302_v26  ;;  %v1035_v24 = vadd.f32 %v1034_v15, %v3739_v23  ;;  %v1123_v34 = vpop.f32.mrf.mxu3 }
 0x1b2   :  { %v1892_v54 = vmax.f32 %v1302_v26, %v1764_v1  ;;  %v1124_v39 = vadd.f32 %v1123_v34, %v1035_v24  ;;  %v1304_v17 = vpop.f32.mrf.mxu1 }
 0x1b3   :  { %v1215_v30 = vpop.f32.mrf.mxu0 }
 0x1b4   :  { %v1763_v16 = vmul.f32 0.2, %v1124_v39  ;;  %v1216_v63 = vadd.f32 %v1215_v30, %v3731_v29  ;;  %1352 = vmatmul.bf16.gmra.mxu2 %v3594_v55  ;;  %v3932_v56 = vpack.c.bf16 %v1892_v54, %v1888_v22 }
 0x1b5   :  { %1441 = vmatmul.bf16.gmra.mxu3 %v3598_v57  ;;  %1619 = vmatmul.bf16.gmra.mxu1 %v3598_v57 }
 0x1b6   :  { %v1891_v25 = vmax.f32 %v1124_v39, %v1763_v16  ;;  %v1305_v50 = vadd.f32 %v1304_v17, %v1216_v63  ;;  %1530 = vmatmul.bf16.gmra.mxu0 %v3594_v55  ;;  %v3293_v39 = vld [vmem:[#allocation5 + $0xf0] sm:$0xff] }
 0x1b7   :  { %v1037_v8 = vpop.f32.mrf.mxu2  ;;  %2543 = vmatpush.bf16.msrb.mxu1 %v3293_v39 }
 0x1b8   :  { %v1038_v60 = vadd.f32 %v1037_v8, %v3739_v23  ;;  %v1126_v9 = vpop.f32.mrf.mxu3  ;;  %v3938_v20 = vpack.c.bf16 %v1891_v25, %v1887_v3  ;;  %v1768_v26 = vmul.f32 0.2, %v1305_v50 }
 0x1ba   :  { %v1127_v31 = vadd.f32 %v1126_v9, %v1038_v60  ;;  %v1306_v42 = vpop.f32.mrf.mxu1  ;;  %v1896_v24 = vmax.f32 %v1305_v50, %v1768_v26 }
 0x1bb   :  { %v1217_v2 = vpop.f32.mrf.mxu0 }
 0x1bc   :  { %v1218_v58 = vadd.f32 %v1217_v2, %v3731_v29  ;;  %v1767_v34 = vmul.f32 0.2, %v1127_v31 }
 0x1be   :  { %v1307_v57 = vadd.f32 %v1306_v42, %v1218_v58  ;;  %v1895_v3 = vmax.f32 %v1127_v31, %v1767_v34  ;;  %v3268_v58 = vld [vmem:[#allocation5 + $0x28] sm:$0xff]  ;;  %v3953_v31 = vld [vmem:[#allocation5 + $0xb0] sm:$0xff] }
 0x1bf   :  { %v1039_v46 = vpop.f32.mrf.mxu2  ;;  %2277 = vmatpush.bf16.msrb.mxu2 %v3268_v58  ;;  %2454 = vmatpush.bf16.msrb.mxu0 %v3953_v31 }
 0x1c0   :  { %v1772_v15 = vmul.f32 0.2, %v1307_v57  ;;  %v1040_v1 = vadd.f32 %v1039_v46, %v3739_v23  ;;  %v1128_v55 = vpop.f32.mrf.mxu3 }
 0x1c2   :  { %v1900_v22 = vmax.f32 %v1307_v57, %v1772_v15  ;;  %v1129_v11 = vadd.f32 %v1128_v55, %v1040_v1  ;;  %v1309_v54 = vpop.f32.mrf.mxu1 }
 0x1c3   :  { %v1220_v17 = vpop.f32.mrf.mxu0 }
 0x1c4   :  { %v1771_v30 = vmul.f32 0.2, %v1129_v11  ;;  %v1221_v16 = vadd.f32 %v1220_v17, %v3731_v29  ;;  %1357 = vmatmul.bf16.gmra.mxu2 %v3612_v19  ;;  %v3944_v63 = vpack.c.bf16 %v1900_v22, %v1896_v24 }
 0x1c5   :  { %1446 = vmatmul.bf16.gmra.mxu3 %v3616_v21  ;;  %1624 = vmatmul.bf16.gmra.mxu1 %v3616_v21 }
 0x1c6   :  { %v1899_v25 = vmax.f32 %v1129_v11, %v1771_v30  ;;  %v1310_v50 = vadd.f32 %v1309_v54, %v1221_v16  ;;  %1535 = vmatmul.bf16.gmra.mxu0 %v3612_v19  ;;  %v4354_v16 = vld [vmem:[#allocation11_spill] sm:$0xff] }
 0x1c7   :  { %v1042_v28 = vpop.f32.mrf.mxu2 }
 0x1c8   :  { %v1043_v8 = vadd.f32 %v1042_v28, %v3739_v23  ;;  %v1131_v60 = vpop.f32.mrf.mxu3  ;;  %v3950_v9 = vpack.c.bf16 %v1899_v25, %v1895_v3  ;;  %v1776_v46 = vmul.f32 0.2, %v1310_v50  ;;  %v4356_v25 = vld [vmem:[#allocation12_spill] sm:$0xff] }
 0x1ca   :  { %v1132_v42 = vadd.f32 %v1131_v60, %v1043_v8  ;;  %v1311_v2 = vpop.f32.mrf.mxu1  ;;  %v1904_v24 = vmax.f32 %v1310_v50, %v1776_v46  ;;  %v3276_v50 = vld [vmem:[#allocation5 + $0x68] sm:$0xff] }
 0x1cb   :  { %v1222_v26 = vpop.f32.mrf.mxu0  ;;  %2366 = vmatpush.bf16.msrb.mxu3 %v3276_v50  ;;  %v4357_v50 = vld [vmem:[#allocation13_spill] sm:$0xff] }
 0x1cc   :  { %v1223_v57 = vadd.f32 %v1222_v26, %v3731_v29  ;;  %v1775_v34 = vmul.f32 0.2, %v1132_v42 }
 0x1ce   :  { %v1312_v21 = vadd.f32 %v1311_v2, %v1223_v57  ;;  %v1903_v28 = vmax.f32 %v1132_v42, %v1775_v34 }
 0x1cf   :  { %v1044_v15 = vpop.f32.mrf.mxu2 }
 0x1d0   :  { %v1780_v1 = vmul.f32 0.2, %v1312_v21  ;;  %v1045_v19 = vadd.f32 %v1044_v15, %v3739_v23  ;;  %v1133_v55 = vpop.f32.mrf.mxu3 }
 0x1d2   :  { %v1908_v22 = vmax.f32 %v1312_v21, %v1780_v1  ;;  %v1134_v11 = vadd.f32 %v1133_v55, %v1045_v19  ;;  %v1314_v54 = vpop.f32.mrf.mxu1 }
 0x1d3   :  { %v1225_v39 = vpop.f32.mrf.mxu0 }
 0x1d4   :  { %v1779_v17 = vmul.f32 0.2, %v1134_v11  ;;  %v1226_v30 = vadd.f32 %v1225_v39, %v3731_v29  ;;  %1362 = vmatmul.bf16.gmra.mxu2 %v4354_v16  ;;  %v3959_v3 = vpack.c.bf16 %v1908_v22, %v1904_v24 }
 0x1d5   :  { %1451 = vmatmul.bf16.gmra.mxu3 %v4356_v25  ;;  %1629 = vmatmul.bf16.gmra.mxu1 %v4356_v25 }
 0x1d6   :  { %4355 = vst [vmem:[#allocation11_spill] sm:$0xff] %v3959_v3  ;;  %v1907_v8 = vmax.f32 %v1134_v11, %v1779_v17  ;;  %v1315_v60 = vadd.f32 %v1314_v54, %v1226_v30  ;;  %1540 = vmatmul.bf16.gmra.mxu0 %v4354_v16  ;;  %v3292_v16 = vld [vmem:[#allocation5 + $0xe8] sm:$0xff] }
 0x1d7   :  { %v1047_v2 = vpop.f32.mrf.mxu2  ;;  %2544 = vmatpush.bf16.msrb.mxu1 %v3292_v16 }
 0x1d8   :  { %v1048_v58 = vadd.f32 %v1047_v2, %v3739_v23  ;;  %v1136_v26 = vpop.f32.mrf.mxu3  ;;  %v3965_v57 = vpack.c.bf16 %v1907_v8, %v1903_v28  ;;  %v1784_v19 = vmul.f32 0.2, %v1315_v60 }
 0x1da   :  { %v1137_v46 = vadd.f32 %v1136_v26, %v1048_v58  ;;  %v1316_v21 = vpop.f32.mrf.mxu1  ;;  %v1912_v11 = vmax.f32 %v1315_v60, %v1784_v19  ;;  %v4359_v58 = vld [vmem:[#allocation14_spill] sm:$0xff] }
 0x1db   :  { %v1227_v15 = vpop.f32.mrf.mxu0 }
 0x1dc   :  { %v1228_v1 = vadd.f32 %v1227_v15, %v3731_v29  ;;  %v1783_v54 = vmul.f32 0.2, %v1137_v46 }
 0x1de   :  { %v1317_v55 = vadd.f32 %v1316_v21, %v1228_v1  ;;  %v1911_v26 = vmax.f32 %v1137_v46, %v1783_v54  ;;  %v3980_v46 = vld [vmem:[#allocation5 + $0xa8] sm:$0xff] }
 0x1df   :  { %v1049_v42 = vpop.f32.mrf.mxu2  ;;  %2455 = vmatpush.bf16.msrb.mxu0 %v3980_v46 }
 0x1e0   :  { %v1788_v24 = vmul.f32 0.2, %v1317_v55  ;;  %v1050_v34 = vadd.f32 %v1049_v42, %v3739_v23  ;;  %v1138_v22 = vpop.f32.mrf.mxu3 }
 0x1e2   :  { %v1916_v39 = vmax.f32 %v1317_v55, %v1788_v24  ;;  %v1139_v17 = vadd.f32 %v1138_v22, %v1050_v34  ;;  %v1319_v30 = vpop.f32.mrf.mxu1  ;;  %v3267_v34 = vld [vmem:[#allocation5 + $0x20] sm:$0xff] }
 0x1e3   :  { %v1230_v25 = vpop.f32.mrf.mxu0  ;;  %2278 = vmatpush.bf16.msrb.mxu2 %v3267_v34  ;;  %v4363_v34 = vld [vmem:[#allocation16_spill] sm:$0xff] }
 0x1e4   :  { %v1787_v28 = vmul.f32 0.2, %v1139_v17  ;;  %v1231_v8 = vadd.f32 %v1230_v25, %v3731_v29  ;;  %1367 = vmatmul.bf16.gmra.mxu2 %v4357_v50  ;;  %v3971_v2 = vpack.c.bf16 %v1916_v39, %v1912_v11 }
 0x1e5   :  { %1456 = vmatmul.bf16.gmra.mxu3 %v4359_v58  ;;  %1634 = vmatmul.bf16.gmra.mxu1 %v4359_v58 }
 0x1e6   :  { %4358 = vst [vmem:[#allocation12_spill] sm:$0xff] %v3971_v2  ;;  %v1915_v60 = vmax.f32 %v1139_v17, %v1787_v28  ;;  %v1320_v21 = vadd.f32 %v1319_v30, %v1231_v8  ;;  %1545 = vmatmul.bf16.gmra.mxu0 %v4357_v50 }
 0x1e7   :  { %v1052_v15 = vpop.f32.mrf.mxu2 }
 0x1e8   :  { %v1053_v1 = vadd.f32 %v1052_v15, %v3739_v23  ;;  %v1141_v19 = vpop.f32.mrf.mxu3  ;;  %v3977_v55 = vpack.c.bf16 %v1915_v60, %v1911_v26  ;;  %v1792_v39 = vmul.f32 0.2, %v1320_v21 }
 0x1ea   :  { %4360 = vst [vmem:[#allocation13_spill] sm:$0xff] %v3977_v55  ;;  %v1142_v42 = vadd.f32 %v1141_v19, %v1053_v1  ;;  %v1321_v24 = vpop.f32.mrf.mxu1  ;;  %v1920_v28 = vmax.f32 %v1320_v21, %v1792_v39  ;;  %v4361_v19 = vld [vmem:[#allocation15_spill] sm:$0xff] }
 0x1eb   :  { %v1232_v22 = vpop.f32.mrf.mxu0  ;;  %v3275_v21 = vld [vmem:[#allocation5 + $0x60] sm:$0xff] }
 0x1ec   :  { %v1233_v11 = vadd.f32 %v1232_v22, %v3731_v29  ;;  %v1791_v8 = vmul.f32 0.2, %v1142_v42  ;;  %2367 = vmatpush.bf16.msrb.mxu3 %v3275_v21  ;;  %v3291_v21 = vld [vmem:[#allocation5 + $0xe0] sm:$0xff] }
 0x1ed   :  { %2545 = vmatpush.bf16.msrb.mxu1 %v3291_v21  ;;  %v3266_v21 = vld [vmem:[#allocation5 + $0x18] sm:$0xff] }
 0x1ee   :  { %v1322_v16 = vadd.f32 %v1321_v24, %v1233_v11  ;;  %v1919_v22 = vmax.f32 %v1142_v42, %v1791_v8  ;;  %2279 = vmatpush.bf16.msrb.mxu2 %v3266_v21 }
 0x1ef   :  { %v1054_v54 = vpop.f32.mrf.mxu2 }
 0x1f0   :  { %v1796_v17 = vmul.f32 0.2, %v1322_v16  ;;  %v1055_v30 = vadd.f32 %v1054_v54, %v3739_v23  ;;  %v1143_v25 = vpop.f32.mrf.mxu3 }
 0x1f2   :  { %v1924_v50 = vmax.f32 %v1322_v16, %v1796_v17  ;;  %v1144_v58 = vadd.f32 %v1143_v25, %v1055_v30  ;;  %v1324_v26 = vpop.f32.mrf.mxu1 }
 0x1f3   :  { %v1235_v60 = vpop.f32.mrf.mxu0 }
 0x1f4   :  { %v1795_v15 = vmul.f32 0.2, %v1144_v58  ;;  %v1236_v1 = vadd.f32 %v1235_v60, %v3731_v29  ;;  %1372 = vmatmul.bf16.gmra.mxu2 %v4361_v19  ;;  %v3986_v24 = vpack.c.bf16 %v1924_v50, %v1920_v28 }
 0x1f5   :  { %1461 = vmatmul.bf16.gmra.mxu3 %v4363_v34  ;;  %1639 = vmatmul.bf16.gmra.mxu1 %v4363_v34 }
 0x1f6   :  { %4362 = vst [vmem:[#allocation14_spill] sm:$0xff] %v3986_v24  ;;  %v1923_v11 = vmax.f32 %v1144_v58, %v1795_v15  ;;  %v1325_v54 = vadd.f32 %v1324_v26, %v1236_v1  ;;  %1550 = vmatmul.bf16.gmra.mxu0 %v4361_v19 }
 0x1f7   :  { %v1057_v39 = vpop.f32.mrf.mxu2 }
 0x1f8   :  { %v1058_v16 = vadd.f32 %v1057_v39, %v3739_v23  ;;  %v1146_v17 = vpop.f32.mrf.mxu3  ;;  %v3992_v30 = vpack.c.bf16 %v1923_v11, %v1919_v22  ;;  %v1800_v24 = vmul.f32 0.2, %v1325_v54 }
 0x1fa   :  { %4364 = vst [vmem:[#allocation15_spill] sm:$0xff] %v3992_v30  ;;  %v1147_v25 = vadd.f32 %v1146_v17, %v1058_v16  ;;  %v1326_v28 = vpop.f32.mrf.mxu1  ;;  %v1928_v15 = vmax.f32 %v1325_v54, %v1800_v24  ;;  %v4365_v17 = vld [vmem:[#allocation17_spill] sm:$0xff] }
 0x1fb   :  { %v1237_v50 = vpop.f32.mrf.mxu0 }
 0x1fc   :  { %v1238_v60 = vadd.f32 %v1237_v50, %v3731_v29  ;;  %v1799_v1 = vmul.f32 0.2, %v1147_v25 }
 0x1fe   :  { %v1327_v34 = vadd.f32 %v1326_v28, %v1238_v60  ;;  %v4367_v28 = vld [vmem:[#allocation18_spill] sm:$0xff]  ;;  %v1927_v60 = vmax.f32 %v1147_v25, %v1799_v1  ;;  %v4007_v25 = vld [vmem:[#allocation5 + $0xa0] sm:$0xff] }
 0x1ff   :  { %v1059_v42 = vpop.f32.mrf.mxu2  ;;  %2456 = vmatpush.bf16.msrb.mxu0 %v4007_v25 }
 0x200   :  { %v1804_v8 = vmul.f32 0.2, %v1327_v34  ;;  %v1060_v58 = vadd.f32 %v1059_v42, %v3739_v23  ;;  %v1148_v26 = vpop.f32.mrf.mxu3 }
 0x202   :  { %v1932_v19 = vmax.f32 %v1327_v34, %v1804_v8  ;;  %v1149_v39 = vadd.f32 %v1148_v26, %v1060_v58  ;;  %v1329_v2 = vpop.f32.mrf.mxu1 }
 0x203   :  { %v1240_v22 = vpop.f32.mrf.mxu0 }
 0x204   :  { %v1803_v11 = vmul.f32 0.2, %v1149_v39  ;;  %v1241_v16 = vadd.f32 %v1240_v22, %v3731_v29  ;;  %1377 = vmatmul.bf16.gmra.mxu2 %v4365_v17  ;;  %v3998_v50 = vpack.c.bf16 %v1932_v19, %v1928_v15 }
 0x205   :  { %1466 = vmatmul.bf16.gmra.mxu3 %v4367_v28  ;;  %1644 = vmatmul.bf16.gmra.mxu1 %v4367_v28 }
 0x206   :  { %4366 = vst [vmem:[#allocation16_spill] sm:$0xff] %v3998_v50  ;;  %v1931_v24 = vmax.f32 %v1149_v39, %v1803_v11  ;;  %v1330_v54 = vadd.f32 %v1329_v2, %v1241_v16  ;;  %1555 = vmatmul.bf16.gmra.mxu0 %v4365_v17 }
 0x207   :  { %v1062_v34 = vpop.f32.mrf.mxu2 }
 0x208   :  { %v1063_v42 = vadd.f32 %v1062_v34, %v3739_v23  ;;  %v1151_v8 = vpop.f32.mrf.mxu3  ;;  %v4004_v58 = vpack.c.bf16 %v1931_v24, %v1927_v60  ;;  %v1808_v50 = vmul.f32 0.2, %v1330_v54 }
 0x20a   :  { %4368 = vst [vmem:[#allocation17_spill] sm:$0xff] %v4004_v58  ;;  %v1152_v26 = vadd.f32 %v1151_v8, %v1063_v42  ;;  %v1331_v22 = vpop.f32.mrf.mxu1  ;;  %v1936_v16 = vmax.f32 %v1330_v54, %v1808_v50 }
 0x20b   :  { %v1242_v15 = vpop.f32.mrf.mxu0 }
 0x20c   :  { %v1243_v19 = vadd.f32 %v1242_v15, %v3731_v29  ;;  %v1807_v17 = vmul.f32 0.2, %v1152_v26  ;;  %v4369_v15 = vld [vmem:[#allocation19_spill] sm:$0xff] }
 0x20e   :  { %v1332_v28 = vadd.f32 %v1331_v22, %v1243_v19  ;;  %v4371_v19 = vld [vmem:[#allocation20_spill] sm:$0xff] }
 0x20f   :  { %v1064_v2 = vpop.f32.mrf.mxu2 }
 0x210   :  { %v1812_v1 = vmul.f32 0.2, %v1332_v28  ;;  %v1065_v39 = vadd.f32 %v1064_v2, %v3739_v23  ;;  %v1153_v11 = vpop.f32.mrf.mxu3  ;;  %v1935_v2 = vmax.f32 %v1152_v26, %v1807_v17 }
 0x212   :  { %v1940_v60 = vmax.f32 %v1332_v28, %v1812_v1  ;;  %v1154_v24 = vadd.f32 %v1153_v11, %v1065_v39  ;;  %v1334_v34 = vpop.f32.mrf.mxu1  ;;  %v3274_v1 = vld [vmem:[#allocation5 + $0x58] sm:$0xff] }
 0x213   :  { %v1245_v42 = vpop.f32.mrf.mxu0  ;;  %2368 = vmatpush.bf16.msrb.mxu3 %v3274_v1 }
 0x214   :  { %v1811_v8 = vmul.f32 0.2, %v1154_v24  ;;  %v1246_v21 = vadd.f32 %v1245_v42, %v3731_v29  ;;  %1382 = vmatmul.bf16.gmra.mxu2 %v4369_v15  ;;  %v4013_v22 = vpack.c.bf16 %v1940_v60, %v1936_v16 }
 0x215   :  { %1471 = vmatmul.bf16.gmra.mxu3 %v4371_v19  ;;  %1649 = vmatmul.bf16.gmra.mxu1 %v4371_v19 }
 0x216   :  { %4370 = vst [vmem:[#allocation18_spill] sm:$0xff] %v4013_v22  ;;  %v1939_v58 = vmax.f32 %v1154_v24, %v1811_v8  ;;  %v1335_v30 = vadd.f32 %v1334_v34, %v1246_v21  ;;  %1560 = vmatmul.bf16.gmra.mxu0 %v4369_v15  ;;  %v3317_v8 = vld [vmem:[%s4314_s4] sm:$0xf] }
 0x217   :  { %v1067_v50 = vpop.f32.mrf.mxu2  ;;  %v4026_v21 = vperm.slane %v3317_v8, 3 }
 0x218   :  { %v1068_v54 = vadd.f32 %v1067_v50, %v3739_v23  ;;  %v1156_v28 = vpop.f32.mrf.mxu3  ;;  %v4019_v39 = vpack.c.bf16 %v1939_v58, %v1935_v2  ;;  %v1816_v22 = vmul.f32 0.2, %v1335_v30 }
 0x21a   :  { %4372 = vst [vmem:[#allocation19_spill] sm:$0xff] %v4019_v39  ;;  %v1157_v11 = vadd.f32 %v1156_v28, %v1068_v54  ;;  %v1336_v42 = vpop.f32.mrf.mxu1  ;;  %v1944_v58 = vmax.f32 %v1335_v30, %v1816_v22  ;;  %v3290_v28 = vld [vmem:[#allocation5 + $0xd8] sm:$0xff] }
 0x21b   :  { %v1247_v16 = vpop.f32.mrf.mxu0  ;;  %2546 = vmatpush.bf16.msrb.mxu1 %v3290_v28  ;;  %v3265_v28 = vld [vmem:[#allocation5 + $0x10] sm:$0xff] }
 0x21c   :  { %v1248_v60 = vadd.f32 %v1247_v16, %v3731_v29  ;;  %v1815_v15 = vmul.f32 0.2, %v1157_v11  ;;  %v4373_v16 = vld [vmem:[#allocation21_spill] sm:$0xff]  ;;  %2280 = vmatpush.bf16.msrb.mxu2 %v3265_v28 }
 0x21e   :  { %v1337_v19 = vadd.f32 %v1336_v42, %v1248_v60  ;;  %v1943_v30 = vmax.f32 %v1157_v11, %v1815_v15  ;;  %v4041_v11 = vld [vmem:[#allocation5 + $0x98] sm:$0xff] }
 0x21f   :  { %v1069_v26 = vpop.f32.mrf.mxu2  ;;  %2457 = vmatpush.bf16.msrb.mxu0 %v4041_v11 }
 0x220   :  { %v1820_v17 = vmul.f32 0.2, %v1337_v19  ;;  %v1070_v24 = vadd.f32 %v1069_v26, %v3739_v23  ;;  %v1158_v34 = vpop.f32.mrf.mxu3  ;;  %v4030_v23 = vperm.slane %v3317_v8, 2  ;;  %v4375_v26 = vld [vmem:[#allocation22_spill] sm:$0xff] }
 0x222   :  { %v1948_v2 = vmax.f32 %v1337_v19, %v1820_v17  ;;  %v1159_v50 = vadd.f32 %v1158_v34, %v1070_v24  ;;  %v1615_v54 = vpop.f32.mrf.mxu1 }
 0x223   :  { %v1526_v29 = vpop.f32.mrf.mxu0 }
 0x224   :  { %v1819_v1 = vmul.f32 0.2, %v1159_v50  ;;  %v1527_v42 = vadd.f32 %v1526_v29, %v4026_v21  ;;  %1387 = vmatmul.bf16.gmra.mxu2 %v4373_v16  ;;  %v4032_v60 = vpack.c.bf16 %v1948_v2, %v1944_v58 }
 0x225   :  { %1476 = vmatmul.bf16.gmra.mxu3 %v4375_v26  ;;  %1654 = vmatmul.bf16.gmra.mxu1 %v4375_v26 }
 0x226   :  { %4374 = vst [vmem:[#allocation20_spill] sm:$0xff] %v4032_v60  ;;  %v1947_v22 = vmax.f32 %v1159_v50, %v1819_v1  ;;  %v1616_v19 = vadd.f32 %v1615_v54, %v1527_v42  ;;  %1565 = vmatmul.bf16.gmra.mxu0 %v4373_v16 }
 0x227   :  { %v1348_v17 = vpop.f32.mrf.mxu2 }
 0x228   :  { %v1349_v24 = vadd.f32 %v1348_v17, %v4030_v23  ;;  %v1437_v34 = vpop.f32.mrf.mxu3  ;;  %v4038_v29 = vpack.c.bf16 %v1947_v22, %v1943_v30  ;;  %v1698_v60 = vmul.f32 0.2, %v1616_v19 }
 0x22a   :  { %4376 = vst [vmem:[#allocation21_spill] sm:$0xff] %v4038_v29  ;;  %v1438_v8 = vadd.f32 %v1437_v34, %v1349_v24  ;;  %v1617_v39 = vpop.f32.mrf.mxu1  ;;  %v1826_v42 = vmax.f32 %v1616_v19, %v1698_v60  ;;  %v3273_v60 = vld [vmem:[#allocation5 + $0x50] sm:$0xff] }
 0x22b   :  { %v1528_v58 = vpop.f32.mrf.mxu0  ;;  %2369 = vmatpush.bf16.msrb.mxu3 %v3273_v60 }
 0x22c   :  { %v1529_v2 = vadd.f32 %v1528_v58, %v4026_v21  ;;  %v1697_v16 = vmul.f32 0.2, %v1438_v8 }
 0x22e   :  { %v1618_v26 = vadd.f32 %v1617_v39, %v1529_v2  ;;  %v1825_v58 = vmax.f32 %v1438_v8, %v1697_v16 }
 0x22f   :  { %v1350_v15 = vpop.f32.mrf.mxu2 }
 0x230   :  { %v1702_v50 = vmul.f32 0.2, %v1618_v26  ;;  %v1351_v54 = vadd.f32 %v1350_v15, %v4030_v23  ;;  %v1439_v1 = vpop.f32.mrf.mxu3 }
 0x232   :  { %v1830_v30 = vmax.f32 %v1618_v26, %v1702_v50  ;;  %v1440_v22 = vadd.f32 %v1439_v1, %v1351_v54  ;;  %v1620_v17 = vpop.f32.mrf.mxu1 }
 0x233   :  { %v1531_v24 = vpop.f32.mrf.mxu0 }
 0x234   :  { %v4045_v34 = vpack.c.bf16 %v1830_v30, %v1826_v42  ;;  %v1701_v28 = vmul.f32 0.2, %v1440_v22  ;;  %v1532_v39 = vadd.f32 %v1531_v24, %v4026_v21  ;;  %1392 = vmatmul.bf16.gmra.mxu2 %v3755_v59 }
 0x235   :  { %1481 = vmatmul.bf16.gmra.mxu3 %v3757_v33  ;;  %1659 = vmatmul.bf16.gmra.mxu1 %v3757_v33 }
 0x236   :  { %v1829_v2 = vmax.f32 %v1440_v22, %v1701_v28  ;;  %v1621_v15 = vadd.f32 %v1620_v17, %v1532_v39  ;;  %1570 = vmatmul.bf16.gmra.mxu0 %v3755_v59 }
 0x237   :  { %v1353_v19 = vpop.f32.mrf.mxu2 }
 0x238   :  { %v4052_v26 = vpack.c.bf16 %v1829_v2, %v1825_v58  ;;  %v1354_v50 = vadd.f32 %v1353_v19, %v4030_v23  ;;  %v1442_v54 = vpop.f32.mrf.mxu3  ;;  %v1706_v29 = vmul.f32 0.2, %v1621_v15  ;;  %v3289_v19 = vld [vmem:[#allocation5 + $0xd0] sm:$0xff] }
 0x239   :  { %2547 = vmatpush.bf16.msrb.mxu1 %v3289_v19 }
 0x23a   :  { %v1443_v1 = vadd.f32 %v1442_v54, %v1354_v50  ;;  %v1622_v42 = vpop.f32.mrf.mxu1  ;;  %v1834_v17 = vmax.f32 %v1621_v15, %v1706_v29 }
 0x23b   :  { %v1533_v30 = vpop.f32.mrf.mxu0 }
 0x23c   :  { %v1534_v24 = vadd.f32 %v1533_v30, %v4026_v21  ;;  %v1705_v28 = vmul.f32 0.2, %v1443_v1 }
 0x23e   :  { %v1623_v33 = vadd.f32 %v1622_v42, %v1534_v24  ;;  %v1833_v42 = vmax.f32 %v1443_v1, %v1705_v28  ;;  %v4068_v1 = vld [vmem:[#allocation5 + $0x90] sm:$0xff] }
 0x23f   :  { %v1355_v8 = vpop.f32.mrf.mxu2  ;;  %2458 = vmatpush.bf16.msrb.mxu0 %v4068_v1 }
 0x240   :  { %v1710_v16 = vmul.f32 0.2, %v1623_v33  ;;  %v1356_v22 = vadd.f32 %v1355_v8, %v4030_v23  ;;  %v1444_v59 = vpop.f32.mrf.mxu3 }
 0x242   :  { %v1838_v39 = vmax.f32 %v1623_v33, %v1710_v16  ;;  %v1445_v58 = vadd.f32 %v1444_v59, %v1356_v22  ;;  %v1625_v2 = vpop.f32.mrf.mxu1  ;;  %v3264_v22 = vld [vmem:[#allocation5 + $0x8] sm:$0xff] }
 0x243   :  { %v1536_v55 = vpop.f32.mrf.mxu0  ;;  %2281 = vmatpush.bf16.msrb.mxu2 %v3264_v22 }
 0x244   :  { %v1709_v60 = vmul.f32 0.2, %v1445_v58  ;;  %v1537_v50 = vadd.f32 %v1536_v55, %v4026_v21  ;;  %1397 = vmatmul.bf16.gmra.mxu2 %v3779_v32  ;;  %v4059_v54 = vpack.c.bf16 %v1838_v39, %v1834_v17 }
 0x245   :  { %1486 = vmatmul.bf16.gmra.mxu3 %v3781_v35  ;;  %1664 = vmatmul.bf16.gmra.mxu1 %v3781_v35 }
 0x246   :  { %v1837_v29 = vmax.f32 %v1445_v58, %v1709_v60  ;;  %v1626_v15 = vadd.f32 %v1625_v2, %v1537_v50  ;;  %1575 = vmatmul.bf16.gmra.mxu0 %v3779_v32 }
 0x247   :  { %v1358_v30 = vpop.f32.mrf.mxu2 }
 0x248   :  { %v1359_v24 = vadd.f32 %v1358_v30, %v4030_v23  ;;  %v1447_v33 = vpop.f32.mrf.mxu3  ;;  %v4065_v8 = vpack.c.bf16 %v1837_v29, %v1833_v42  ;;  %v1714_v39 = vmul.f32 0.2, %v1626_v15 }
 0x24a   :  { %v1448_v55 = vadd.f32 %v1447_v33, %v1359_v24  ;;  %v1627_v16 = vpop.f32.mrf.mxu1  ;;  %v1842_v19 = vmax.f32 %v1626_v15, %v1714_v39  ;;  %v3272_v15 = vld [vmem:[#allocation5 + $0x48] sm:$0xff] }
 0x24b   :  { %v1538_v59 = vpop.f32.mrf.mxu0  ;;  %2370 = vmatpush.bf16.msrb.mxu3 %v3272_v15  ;;  %v3288_v15 = vld [vmem:[#allocation5 + $0xc8] sm:$0xff] }
 0x24c   :  { %v1539_v17 = vadd.f32 %v1538_v59, %v4026_v21  ;;  %v1713_v60 = vmul.f32 0.2, %v1448_v55  ;;  %2548 = vmatpush.bf16.msrb.mxu1 %v3288_v15 }
 0x24e   :  { %v1628_v35 = vadd.f32 %v1627_v16, %v1539_v17  ;;  %v1841_v22 = vmax.f32 %v1448_v55, %v1713_v60 }
 0x24f   :  { %v1360_v28 = vpop.f32.mrf.mxu2 }
 0x250   :  { %v1718_v58 = vmul.f32 0.2, %v1628_v35  ;;  %v1361_v32 = vadd.f32 %v1360_v28, %v4030_v23  ;;  %v1449_v2 = vpop.f32.mrf.mxu3 }
 0x252   :  { %v1846_v50 = vmax.f32 %v1628_v35, %v1718_v58  ;;  %v1450_v42 = vadd.f32 %v1449_v2, %v1361_v32  ;;  %v1630_v29 = vpop.f32.mrf.mxu1 }
 0x253   :  { %v1541_v30 = vpop.f32.mrf.mxu0 }
 0x254   :  { %v1717_v24 = vmul.f32 0.2, %v1450_v42  ;;  %v1542_v33 = vadd.f32 %v1541_v30, %v4026_v21  ;;  %1402 = vmatmul.bf16.gmra.mxu2 %v3803_v51  ;;  %v4074_v16 = vpack.c.bf16 %v1846_v50, %v1842_v19 }
 0x255   :  { %1491 = vmatmul.bf16.gmra.mxu3 %v3805_v53  ;;  %1669 = vmatmul.bf16.gmra.mxu1 %v3805_v53 }
 0x256   :  { %v1845_v59 = vmax.f32 %v1450_v42, %v1717_v24  ;;  %v1631_v17 = vadd.f32 %v1630_v29, %v1542_v33  ;;  %1580 = vmatmul.bf16.gmra.mxu0 %v3803_v51 }
 0x257   :  { %v1363_v39 = vpop.f32.mrf.mxu2 }
 0x258   :  { %v1364_v35 = vadd.f32 %v1363_v39, %v4030_v23  ;;  %v1452_v28 = vpop.f32.mrf.mxu3  ;;  %v4080_v58 = vpack.c.bf16 %v1845_v59, %v1841_v22  ;;  %v1722_v30 = vmul.f32 0.2, %v1631_v17 }
 0x25a   :  { %v1453_v32 = vadd.f32 %v1452_v28, %v1364_v35  ;;  %v1632_v2 = vpop.f32.mrf.mxu1  ;;  %v1850_v29 = vmax.f32 %v1631_v17, %v1722_v30 }
 0x25b   :  { %v1543_v19 = vpop.f32.mrf.mxu0 }
 0x25c   :  { %v1544_v50 = vadd.f32 %v1543_v19, %v4026_v21  ;;  %v1721_v24 = vmul.f32 0.2, %v1453_v32 }
 0x25e   :  { %v1633_v53 = vadd.f32 %v1632_v2, %v1544_v50  ;;  %v1849_v2 = vmax.f32 %v1453_v32, %v1721_v24 }
 0x25f   :  { %v1365_v55 = vpop.f32.mrf.mxu2 }
 0x260   :  { %v1726_v60 = vmul.f32 0.2, %v1633_v53  ;;  %v1366_v42 = vadd.f32 %v1365_v55, %v4030_v23  ;;  %v1454_v51 = vpop.f32.mrf.mxu3 }
 0x262   :  { %v1854_v33 = vmax.f32 %v1633_v53, %v1726_v60  ;;  %v1455_v39 = vadd.f32 %v1454_v51, %v1366_v42  ;;  %v1635_v3 = vpop.f32.mrf.mxu1  ;;  %v3263_v51 = vld [vmem:[#allocation5] sm:$0xff] }
 0x263   :  { %v1546_v22 = vpop.f32.mrf.mxu0  ;;  %2282 = vmatpush.bf16.msrb.mxu2 %v3263_v51 }
 0x264   :  { %v1725_v59 = vmul.f32 0.2, %v1455_v39  ;;  %v1547_v35 = vadd.f32 %v1546_v22, %v4026_v21  ;;  %1407 = vmatmul.bf16.gmra.mxu2 %v3827_v4  ;;  %v4086_v28 = vpack.c.bf16 %v1854_v33, %v1850_v29 }
 0x265   :  { %1496 = vmatmul.bf16.gmra.mxu3 %v3829_v61  ;;  %1674 = vmatmul.bf16.gmra.mxu1 %v3829_v61 }
 0x266   :  { %v1853_v17 = vmax.f32 %v1455_v39, %v1725_v59  ;;  %v1636_v19 = vadd.f32 %v1635_v3, %v1547_v35  ;;  %1585 = vmatmul.bf16.gmra.mxu0 %v3827_v4  ;;  %v3280_v3 = vld [vmem:[#allocation5 + $0x88] sm:$0xff] }
 0x267   :  { %v1368_v50 = vpop.f32.mrf.mxu2  ;;  %3299 = vmatpush.bf16.msra.mxu2 %v3926_v36  ;;  %2459 = vmatpush.bf16.msrb.mxu0 %v3280_v3 }
 0x268   :  { %v1369_v30 = vadd.f32 %v1368_v50, %v4030_v23  ;;  %v1457_v53 = vpop.f32.mrf.mxu3  ;;  %v4092_v55 = vpack.c.bf16 %v1853_v17, %v1849_v2  ;;  %v1730_v61 = vmul.f32 0.2, %v1636_v19 }
 0x26a   :  { %v1458_v60 = vadd.f32 %v1457_v53, %v1369_v30  ;;  %v1637_v42 = vpop.f32.mrf.mxu1  ;;  %v1858_v22 = vmax.f32 %v1636_v19, %v1730_v61  ;;  %v3271_v19 = vld [vmem:[#allocation5 + $0x40] sm:$0xff] }
 0x26b   :  { %v1548_v29 = vpop.f32.mrf.mxu0  ;;  %3300 = vmatpush.bf16.msra.mxu2 %v3953_v31  ;;  %2371 = vmatpush.bf16.msrb.mxu3 %v3271_v19 }
 0x26c   :  { %v1549_v33 = vadd.f32 %v1548_v29, %v4026_v21  ;;  %v1729_v59 = vmul.f32 0.2, %v1458_v60 }
 0x26e   :  { %v1638_v32 = vadd.f32 %v1637_v42, %v1549_v33  ;;  %v1857_v42 = vmax.f32 %v1458_v60, %v1729_v59 }
 0x26f   :  { %v1370_v24 = vpop.f32.mrf.mxu2  ;;  %3301 = vmatpush.bf16.msra.mxu2 %v3980_v46 }
 0x270   :  { %v1734_v4 = vmul.f32 0.2, %v1638_v32  ;;  %v1371_v39 = vadd.f32 %v1370_v24, %v4030_v23  ;;  %v1459_v15 = vpop.f32.mrf.mxu3 }
 0x272   :  { %v1862_v35 = vmax.f32 %v1638_v32, %v1734_v4  ;;  %v1460_v2 = vadd.f32 %v1459_v15, %v1371_v39  ;;  %v1640_v17 = vpop.f32.mrf.mxu1 }
 0x273   :  { %v1551_v50 = vpop.f32.mrf.mxu0  ;;  %3302 = vmatpush.bf16.msra.mxu2 %v4007_v25  ;;  %v3279_v25 = vld [vmem:[#allocation5 + $0x80] sm:$0xff] }
 0x274   :  { %v1733_v30 = vmul.f32 0.2, %v1460_v2  ;;  %v1552_v36 = vadd.f32 %v1551_v50, %v4026_v21  ;;  %1412 = vmatmul.bf16.gmra.mxu2 %v3851_v41  ;;  %v4100_v53 = vpack.c.bf16 %v1862_v35, %v1858_v22  ;;  %v3287_v35 = vld [vmem:[#allocation5 + $0xc0] sm:$0xff]  ;;  %2460 = vmatpush.bf16.msrb.mxu0 %v3279_v25 }
 0x275   :  { %1501 = vmatmul.bf16.gmra.mxu3 %v3853_v40  ;;  %1679 = vmatmul.bf16.gmra.mxu1 %v3853_v40 }
 0x276   :  { %v1861_v51 = vmax.f32 %v1460_v2, %v1733_v30  ;;  %v1641_v31 = vadd.f32 %v1640_v17, %v1552_v36  ;;  %1590 = vmatmul.bf16.gmra.mxu0 %v3851_v41  ;;  %2549 = vmatpush.bf16.msrb.mxu1 %v3287_v35 }
 0x277   :  { %v1373_v29 = vpop.f32.mrf.mxu2  ;;  %3303 = vmatpush.bf16.msra.mxu2 %v4041_v11 }
 0x278   :  { %v1374_v33 = vadd.f32 %v1373_v29, %v4030_v23  ;;  %v1462_v61 = vpop.f32.mrf.mxu3  ;;  %v4107_v32 = vpack.c.bf16 %v1861_v51, %v1857_v42  ;;  %v1738_v39 = vmul.f32 0.2, %v1641_v31 }
 0x27a   :  { %v1463_v24 = vadd.f32 %v1462_v61, %v1374_v33  ;;  %v1642_v4 = vpop.f32.mrf.mxu1  ;;  %v1866_v2 = vmax.f32 %v1641_v31, %v1738_v39 }
 0x27b   :  { %v1553_v40 = vpop.f32.mrf.mxu0  ;;  %3304 = vmatpush.bf16.msra.mxu2 %v4068_v1 }
 0x27c   :  { %v1554_v60 = vadd.f32 %v1553_v40, %v4026_v21  ;;  %v1737_v17 = vmul.f32 0.2, %v1463_v24 }
 0x27e   :  { %v1643_v15 = vadd.f32 %v1642_v4, %v1554_v60  ;;  %v1865_v31 = vmax.f32 %v1463_v24, %v1737_v17 }
 0x27f   :  { %v1375_v41 = vpop.f32.mrf.mxu2  ;;  %3305 = vmatpush.bf16.msra.mxu2 %v3280_v3 }
 0x280   :  { %v1742_v46 = vmul.f32 0.2, %v1643_v15  ;;  %v1376_v22 = vadd.f32 %v1375_v41, %v4030_v23  ;;  %v1464_v59 = vpop.f32.mrf.mxu3 }
 0x282   :  { %v1870_v50 = vmax.f32 %v1643_v15, %v1742_v46  ;;  %v1465_v30 = vadd.f32 %v1464_v59, %v1376_v22  ;;  %v1645_v36 = vpop.f32.mrf.mxu1 }
 0x283   :  { %v1556_v42 = vpop.f32.mrf.mxu0  ;;  %3306 = vmatpush.bf16.msra.mxu2 %v3279_v25 }
 0x284   :  { %v1741_v51 = vmul.f32 0.2, %v1465_v30  ;;  %v1557_v19 = vadd.f32 %v1556_v42, %v4026_v21  ;;  %1417 = vmatmul.bf16.gmra.mxu2 %v3875_v47  ;;  %v4116_v11 = vpack.c.bf16 %v1870_v50, %v1866_v2 }
 0x285   :  { %1506 = vmatmul.bf16.gmra.mxu3 %v3877_v0  ;;  %1684 = vmatmul.bf16.gmra.mxu1 %v3877_v0 }
 0x286   :  { %v1869_v29 = vmax.f32 %v1465_v30, %v1741_v51  ;;  %v1646_v33 = vadd.f32 %v1645_v36, %v1557_v19  ;;  %1595 = vmatmul.bf16.gmra.mxu0 %v3875_v47 }
 0x287   :  { %v1378_v1 = vpop.f32.mrf.mxu2 }
 0x288   :  { %v1379_v61 = vadd.f32 %v1378_v1, %v4030_v23  ;;  %v1467_v4 = vpop.f32.mrf.mxu3  ;;  %v4122_v40 = vpack.c.bf16 %v1869_v29, %v1865_v31  ;;  %v1746_v46 = vmul.f32 0.2, %v1646_v33 }
 0x28a   :  { %v1468_v60 = vadd.f32 %v1467_v4, %v1379_v61  ;;  %v1647_v39 = vpop.f32.mrf.mxu1  ;;  %v1874_v3 = vmax.f32 %v1646_v33, %v1746_v46 }
 0x28b   :  { %v1558_v15 = vpop.f32.mrf.mxu0 }
 0x28c   :  { %v1559_v41 = vadd.f32 %v1558_v15, %v4026_v21  ;;  %v1745_v35 = vmul.f32 0.2, %v1468_v60 }
 0x28e   :  { %v1648_v0 = vadd.f32 %v1647_v39, %v1559_v41  ;;  %v1873_v51 = vmax.f32 %v1468_v60, %v1745_v35 }
 0x28f   :  { %v1380_v24 = vpop.f32.mrf.mxu2 }
 0x290   :  { %v1750_v22 = vmul.f32 0.2, %v1648_v0  ;;  %v1381_v59 = vadd.f32 %v1380_v24, %v4030_v23  ;;  %v1469_v47 = vpop.f32.mrf.mxu3 }
 0x292   :  { %v1878_v2 = vmax.f32 %v1648_v0, %v1750_v22  ;;  %v1470_v17 = vadd.f32 %v1469_v47, %v1381_v59  ;;  %v1650_v50 = vpop.f32.mrf.mxu1 }
 0x293   :  { %v1561_v30 = vpop.f32.mrf.mxu0 }
 0x294   :  { %v1749_v36 = vmul.f32 0.2, %v1470_v17  ;;  %v1562_v42 = vadd.f32 %v1561_v30, %v4026_v21  ;;  %1422 = vmatmul.bf16.gmra.mxu2 %v3899_v13  ;;  %v4128_v25 = vpack.c.bf16 %v1878_v2, %v1874_v3 }
 0x295   :  { %1511 = vmatmul.bf16.gmra.mxu3 %v3901_v43  ;;  %1689 = vmatmul.bf16.gmra.mxu1 %v3901_v43 }
 0x296   :  { %v1877_v19 = vmax.f32 %v1470_v17, %v1749_v36  ;;  %v1651_v31 = vadd.f32 %v1650_v50, %v1562_v42  ;;  %1600 = vmatmul.bf16.gmra.mxu0 %v3899_v13 }
 0x297   :  { %v1383_v29 = vpop.f32.mrf.mxu2 }
 0x298   :  { %v1384_v33 = vadd.f32 %v1383_v29, %v4030_v23  ;;  %v1472_v1 = vpop.f32.mrf.mxu3  ;;  %v4134_v61 = vpack.c.bf16 %v1877_v19, %v1873_v51  ;;  %v1754_v46 = vmul.f32 0.2, %v1651_v31 }
 0x29a   :  { %v1473_v4 = vadd.f32 %v1472_v1, %v1384_v33  ;;  %v1652_v39 = vpop.f32.mrf.mxu1  ;;  %v1882_v59 = vmax.f32 %v1651_v31, %v1754_v46 }
 0x29b   :  { %v1563_v15 = vpop.f32.mrf.mxu0 }
 0x29c   :  { %v1564_v41 = vadd.f32 %v1563_v15, %v4026_v21  ;;  %v1753_v13 = vmul.f32 0.2, %v1473_v4 }
 0x29e   :  { %v1653_v0 = vadd.f32 %v1652_v39, %v1564_v41  ;;  %v1881_v36 = vmax.f32 %v1473_v4, %v1753_v13 }
 0x29f   :  { %v1385_v24 = vpop.f32.mrf.mxu2 }
 0x2a0   :  { %v1758_v43 = vmul.f32 0.2, %v1653_v0  ;;  %v1386_v60 = vadd.f32 %v1385_v24, %v4030_v23  ;;  %v1474_v22 = vpop.f32.mrf.mxu3 }
 0x2a2   :  { %v1886_v47 = vmax.f32 %v1653_v0, %v1758_v43  ;;  %v1475_v3 = vadd.f32 %v1474_v22, %v1386_v60  ;;  %v1655_v35 = vpop.f32.mrf.mxu1 }
 0x2a3   :  { %v1566_v2 = vpop.f32.mrf.mxu0 }
 0x2a4   :  { %v1757_v17 = vmul.f32 0.2, %v1475_v3  ;;  %v1567_v50 = vadd.f32 %v1566_v2, %v4026_v21  ;;  %2283 = vmatmul.bf16.vlgmr.msrb.gmra.mxu2 %v3774_v6  ;;  %v4140_v30 = vpack.c.bf16 %v1886_v47, %v1882_v59 }
 0x2a5   :  { %2372 = vmatmul.bf16.vlgmr.msrb.gmra.mxu3 %v3759_v45  ;;  %2550 = vmatmul.bf16.vlgmr.msrb.gmra.mxu1 %v4045_v34 }
 0x2a6   :  { %v1885_v42 = vmax.f32 %v1475_v3, %v1757_v17  ;;  %v1656_v51 = vadd.f32 %v1655_v35, %v1567_v50  ;;  %2461 = vmatmul.bf16.vlgmr.msrb.gmra.mxu0 %v4052_v26 }
 0x2a7   :  { %v1388_v19 = vpop.f32.mrf.mxu2 }
 0x2a8   :  { %v1389_v31 = vadd.f32 %v1388_v19, %v4030_v23  ;;  %v1477_v29 = vpop.f32.mrf.mxu3  ;;  %v4146_v33 = vpack.c.bf16 %v1885_v42, %v1881_v36  ;;  %v1762_v41 = vmul.f32 0.2, %v1656_v51 }
 0x2aa   :  { %v1478_v1 = vadd.f32 %v1477_v29, %v1389_v31  ;;  %v1657_v39 = vpop.f32.mrf.mxu1  ;;  %v1890_v24 = vmax.f32 %v1656_v51, %v1762_v41 }
 0x2ab   :  { %v1568_v6 = vpop.f32.mrf.mxu0 }
 0x2ac   :  { %v1569_v15 = vadd.f32 %v1568_v6, %v4026_v21  ;;  %v1761_v26 = vmul.f32 0.2, %v1478_v1 }
 0x2ae   :  { %v1658_v45 = vadd.f32 %v1657_v39, %v1569_v15  ;;  %v1889_v35 = vmax.f32 %v1478_v1, %v1761_v26 }
 0x2af   :  { %v1390_v46 = vpop.f32.mrf.mxu2 }
 0x2b0   :  { %v1766_v34 = vmul.f32 0.2, %v1658_v45  ;;  %v1391_v4 = vadd.f32 %v1390_v46, %v4030_v23  ;;  %v1479_v0 = vpop.f32.mrf.mxu3 }
 0x2b2   :  { %v1894_v43 = vmax.f32 %v1658_v45, %v1766_v34  ;;  %v1480_v60 = vadd.f32 %v1479_v0, %v1391_v4  ;;  %v1660_v22 = vpop.f32.mrf.mxu1 }
 0x2b3   :  { %v1571_v59 = vpop.f32.mrf.mxu0 }
 0x2b4   :  { %v1765_v13 = vmul.f32 0.2, %v1480_v60  ;;  %v1572_v47 = vadd.f32 %v1571_v59, %v4026_v21  ;;  %2288 = vmatmul.bf16.gmra.mxu2 %v3799_v27  ;;  %v4152_v3 = vpack.c.bf16 %v1894_v43, %v1890_v24 }
 0x2b5   :  { %2377 = vmatmul.bf16.gmra.mxu3 %v3785_v38  ;;  %2555 = vmatmul.bf16.gmra.mxu1 %v4059_v54 }
 0x2b6   :  { %v1893_v2 = vmax.f32 %v1480_v60, %v1765_v13  ;;  %v1661_v17 = vadd.f32 %v1660_v22, %v1572_v47  ;;  %2466 = vmatmul.bf16.gmra.mxu0 %v4065_v8 }
 0x2b7   :  { %v1393_v50 = vpop.f32.mrf.mxu2 }
 0x2b8   :  { %v1394_v36 = vadd.f32 %v1393_v50, %v4030_v23  ;;  %v1482_v42 = vpop.f32.mrf.mxu3  ;;  %v4158_v51 = vpack.c.bf16 %v1893_v2, %v1889_v35  ;;  %v1770_v39 = vmul.f32 0.2, %v1661_v17 }
 0x2ba   :  { %v1483_v19 = vadd.f32 %v1482_v42, %v1394_v36  ;;  %v1662_v31 = vpop.f32.mrf.mxu1  ;;  %v1898_v41 = vmax.f32 %v1661_v17, %v1770_v39 }
 0x2bb   :  { %v1573_v27 = vpop.f32.mrf.mxu0 }
 0x2bc   :  { %v1574_v29 = vadd.f32 %v1573_v27, %v4026_v21  ;;  %v1769_v8 = vmul.f32 0.2, %v1483_v19 }
 0x2be   :  { %v1663_v38 = vadd.f32 %v1662_v31, %v1574_v29  ;;  %v1897_v43 = vmax.f32 %v1483_v19, %v1769_v8 }
 0x2bf   :  { %v1395_v6 = vpop.f32.mrf.mxu2 }
 0x2c0   :  { %v1774_v54 = vmul.f32 0.2, %v1663_v38  ;;  %v1396_v1 = vadd.f32 %v1395_v6, %v4030_v23  ;;  %v1484_v15 = vpop.f32.mrf.mxu3 }
 0x2c2   :  { %v1902_v45 = vmax.f32 %v1663_v38, %v1774_v54  ;;  %v1485_v46 = vadd.f32 %v1484_v15, %v1396_v1  ;;  %v1665_v34 = vpop.f32.mrf.mxu1 }
 0x2c3   :  { %v1576_v4 = vpop.f32.mrf.mxu0 }
 0x2c4   :  { %v1773_v0 = vmul.f32 0.2, %v1485_v46  ;;  %v1577_v24 = vadd.f32 %v1576_v4, %v4026_v21  ;;  %2293 = vmatmul.bf16.gmra.mxu2 %v3823_v10  ;;  %v4164_v26 = vpack.c.bf16 %v1902_v45, %v1898_v41 }
 0x2c5   :  { %2382 = vmatmul.bf16.gmra.mxu3 %v3809_v12  ;;  %2560 = vmatmul.bf16.gmra.mxu1 %v4074_v16 }
 0x2c6   :  { %v1901_v60 = vmax.f32 %v1485_v46, %v1773_v0  ;;  %v1666_v22 = vadd.f32 %v1665_v34, %v1577_v24  ;;  %2471 = vmatmul.bf16.gmra.mxu0 %v4080_v58 }
 0x2c7   :  { %v1398_v59 = vpop.f32.mrf.mxu2 }
 0x2c8   :  { %v1399_v13 = vadd.f32 %v1398_v59, %v4030_v23  ;;  %v1487_v47 = vpop.f32.mrf.mxu3  ;;  %v4170_v35 = vpack.c.bf16 %v1901_v60, %v1897_v43  ;;  %v1778_v36 = vmul.f32 0.2, %v1666_v22 }
 0x2ca   :  { %v1488_v2 = vadd.f32 %v1487_v47, %v1399_v13  ;;  %v1667_v17 = vpop.f32.mrf.mxu1  ;;  %v1906_v27 = vmax.f32 %v1666_v22, %v1778_v36 }
 0x2cb   :  { %v1578_v10 = vpop.f32.mrf.mxu0 }
 0x2cc   :  { %v1579_v50 = vadd.f32 %v1578_v10, %v4026_v21  ;;  %v1777_v58 = vmul.f32 0.2, %v1488_v2 }
 0x2ce   :  { %v1668_v12 = vadd.f32 %v1667_v17, %v1579_v50  ;;  %v1905_v41 = vmax.f32 %v1488_v2, %v1777_v58 }
 0x2cf   :  { %v1400_v42 = vpop.f32.mrf.mxu2 }
 0x2d0   :  { %v1782_v16 = vmul.f32 0.2, %v1668_v12  ;;  %v1401_v19 = vadd.f32 %v1400_v42, %v4030_v23  ;;  %v1489_v31 = vpop.f32.mrf.mxu3 }
 0x2d2   :  { %v1910_v29 = vmax.f32 %v1668_v12, %v1782_v16  ;;  %v1490_v39 = vadd.f32 %v1489_v31, %v1401_v19  ;;  %v1670_v38 = vpop.f32.mrf.mxu1 }
 0x2d3   :  { %v1581_v6 = vpop.f32.mrf.mxu0 }
 0x2d4   :  { %v1781_v54 = vmul.f32 0.2, %v1490_v39  ;;  %v1582_v1 = vadd.f32 %v1581_v6, %v4026_v21  ;;  %2298 = vmatmul.bf16.gmra.mxu2 %v3847_v18  ;;  %v4176_v15 = vpack.c.bf16 %v1910_v29, %v1906_v27 }
 0x2d5   :  { %2387 = vmatmul.bf16.gmra.mxu3 %v3833_v48  ;;  %2565 = vmatmul.bf16.gmra.mxu1 %v4086_v28 }
 0x2d6   :  { %v1909_v8 = vmax.f32 %v1490_v39, %v1781_v54  ;;  %v1671_v45 = vadd.f32 %v1670_v38, %v1582_v1  ;;  %2476 = vmatmul.bf16.gmra.mxu0 %v4092_v55 }
 0x2d7   :  { %v1403_v46 = vpop.f32.mrf.mxu2 }
 0x2d8   :  { %v1404_v34 = vadd.f32 %v1403_v46, %v4030_v23  ;;  %v1492_v4 = vpop.f32.mrf.mxu3  ;;  %v4182_v0 = vpack.c.bf16 %v1909_v8, %v1905_v41  ;;  %v1786_v22 = vmul.f32 0.2, %v1671_v45 }
 0x2da   :  { %v1493_v24 = vadd.f32 %v1492_v4, %v1404_v34  ;;  %v1672_v43 = vpop.f32.mrf.mxu1  ;;  %v1914_v2 = vmax.f32 %v1671_v45, %v1786_v22 }
 0x2db   :  { %v1583_v18 = vpop.f32.mrf.mxu0 }
 0x2dc   :  { %v1584_v60 = vadd.f32 %v1583_v18, %v4026_v21  ;;  %v1785_v55 = vmul.f32 0.2, %v1493_v24 }
 0x2de   :  { %v1673_v48 = vadd.f32 %v1672_v43, %v1584_v60  ;;  %v1913_v19 = vmax.f32 %v1493_v24, %v1785_v55 }
 0x2df   :  { %v1405_v59 = vpop.f32.mrf.mxu2 }
 0x2e0   :  { %v1790_v28 = vmul.f32 0.2, %v1673_v48  ;;  %v1406_v13 = vadd.f32 %v1405_v59, %v4030_v23  ;;  %v1494_v47 = vpop.f32.mrf.mxu3 }
 0x2e2   :  { %v1918_v17 = vmax.f32 %v1673_v48, %v1790_v28  ;;  %v1495_v10 = vadd.f32 %v1494_v47, %v1406_v13  ;;  %v1675_v50 = vpop.f32.mrf.mxu1 }
 0x2e3   :  { %v1586_v36 = vpop.f32.mrf.mxu0 }
 0x2e4   :  { %v1789_v12 = vmul.f32 0.2, %v1495_v10  ;;  %v1587_v42 = vadd.f32 %v1586_v36, %v4026_v21  ;;  %2303 = vmatmul.bf16.gmra.mxu2 %v3871_v49  ;;  %v4188_v16 = vpack.c.bf16 %v1918_v17, %v1914_v2 }
 0x2e5   :  { %2392 = vmatmul.bf16.gmra.mxu3 %v3857_v44  ;;  %2570 = vmatmul.bf16.gmra.mxu1 %v4100_v53 }
 0x2e6   :  { %v1917_v31 = vmax.f32 %v1495_v10, %v1789_v12  ;;  %v1676_v27 = vadd.f32 %v1675_v50, %v1587_v42  ;;  %2481 = vmatmul.bf16.gmra.mxu0 %v4107_v32 }
 0x2e7   :  { %v1408_v58 = vpop.f32.mrf.mxu2 }
 0x2e8   :  { %v1409_v29 = vadd.f32 %v1408_v58, %v4030_v23  ;;  %v1497_v39 = vpop.f32.mrf.mxu3  ;;  %v4194_v38 = vpack.c.bf16 %v1917_v31, %v1913_v19  ;;  %v1794_v41 = vmul.f32 0.2, %v1676_v27 }
 0x2ea   :  { %v1498_v6 = vadd.f32 %v1497_v39, %v1409_v29  ;;  %v1677_v54 = vpop.f32.mrf.mxu1  ;;  %v1922_v34 = vmax.f32 %v1676_v27, %v1794_v41 }
 0x2eb   :  { %v1588_v49 = vpop.f32.mrf.mxu0 }
 0x2ec   :  { %v1589_v1 = vadd.f32 %v1588_v49, %v4026_v21  ;;  %v1793_v32 = vmul.f32 0.2, %v1498_v6 }
 0x2ee   :  { %v1678_v44 = vadd.f32 %v1677_v54, %v1589_v1  ;;  %v1921_v59 = vmax.f32 %v1498_v6, %v1793_v32 }
 0x2ef   :  { %v1410_v8 = vpop.f32.mrf.mxu2 }
 0x2f0   :  { %v1798_v53 = vmul.f32 0.2, %v1678_v44  ;;  %v1411_v45 = vadd.f32 %v1410_v8, %v4030_v23  ;;  %v1499_v46 = vpop.f32.mrf.mxu3 }
 0x2f2   :  { %v1926_v4 = vmax.f32 %v1678_v44, %v1798_v53  ;;  %v1500_v24 = vadd.f32 %v1499_v46, %v1411_v45  ;;  %v1680_v43 = vpop.f32.mrf.mxu1 }
 0x2f3   :  { %v1591_v18 = vpop.f32.mrf.mxu0 }
 0x2f4   :  { %v1797_v60 = vmul.f32 0.2, %v1500_v24  ;;  %v1592_v22 = vadd.f32 %v1591_v18, %v4026_v21  ;;  %2308 = vmatmul.bf16.gmra.mxu2 %v3895_v5  ;;  %v4200_v48 = vpack.c.bf16 %v1926_v4, %v1922_v34 }
 0x2f5   :  { %2397 = vmatmul.bf16.gmra.mxu3 %v3881_v7  ;;  %2575 = vmatmul.bf16.gmra.mxu1 %v4116_v11 }
 0x2f6   :  { %v1925_v28 = vmax.f32 %v1500_v24, %v1797_v60  ;;  %v1681_v13 = vadd.f32 %v1680_v43, %v1592_v22  ;;  %2486 = vmatmul.bf16.gmra.mxu0 %v4122_v40 }
 0x2f7   :  { %v1413_v47 = vpop.f32.mrf.mxu2 }
 0x2f8   :  { %v1414_v2 = vadd.f32 %v1413_v47, %v4030_v23  ;;  %v1502_v55 = vpop.f32.mrf.mxu3  ;;  %v4206_v17 = vpack.c.bf16 %v1925_v28, %v1921_v59  ;;  %v1802_v12 = vmul.f32 0.2, %v1681_v13 }
 0x2fa   :  { %v1503_v10 = vadd.f32 %v1502_v55, %v1414_v2  ;;  %v1682_v50 = vpop.f32.mrf.mxu1  ;;  %v1930_v27 = vmax.f32 %v1681_v13, %v1802_v12 }
 0x2fb   :  { %v1593_v5 = vpop.f32.mrf.mxu0 }
 0x2fc   :  { %v1594_v36 = vadd.f32 %v1593_v5, %v4026_v21  ;;  %v1801_v40 = vmul.f32 0.2, %v1503_v10 }
 0x2fe   :  { %v1683_v7 = vadd.f32 %v1682_v50, %v1594_v36  ;;  %v1929_v41 = vmax.f32 %v1503_v10, %v1801_v40 }
 0x2ff   :  { %v1415_v42 = vpop.f32.mrf.mxu2 }
 0x300   :  { %v1806_v11 = vmul.f32 0.2, %v1683_v7  ;;  %v1416_v19 = vadd.f32 %v1415_v42, %v4030_v23  ;;  %v1504_v31 = vpop.f32.mrf.mxu3 }
 0x302   :  { %v1934_v58 = vmax.f32 %v1683_v7, %v1806_v11  ;;  %v1505_v29 = vadd.f32 %v1504_v31, %v1416_v19  ;;  %v1685_v39 = vpop.f32.mrf.mxu1 }
 0x303   :  { %v1596_v6 = vpop.f32.mrf.mxu0 }
 0x304   :  { %v1805_v54 = vmul.f32 0.2, %v1505_v29  ;;  %v1597_v49 = vadd.f32 %v1596_v6, %v4026_v21  ;;  %2313 = vmatmul.bf16.gmra.mxu2 %v3911_v52  ;;  %v4212_v1 = vpack.c.bf16 %v1934_v58, %v1930_v27 }
 0x305   :  { %2402 = vmatmul.bf16.gmra.mxu3 %v3905_v37  ;;  %2580 = vmatmul.bf16.gmra.mxu1 %v4128_v25 }
 0x306   :  { %v1933_v44 = vmax.f32 %v1505_v29, %v1805_v54  ;;  %v1686_v8 = vadd.f32 %v1685_v39, %v1597_v49  ;;  %2491 = vmatmul.bf16.gmra.mxu0 %v4134_v61 }
 0x307   :  { %v1418_v53 = vpop.f32.mrf.mxu2 }
 0x308   :  { %v1419_v45 = vadd.f32 %v1418_v53, %v4030_v23  ;;  %v1507_v46 = vpop.f32.mrf.mxu3  ;;  %v4218_v34 = vpack.c.bf16 %v1933_v44, %v1929_v41  ;;  %v1810_v43 = vmul.f32 0.2, %v1686_v8 }
 0x30a   :  { %v1508_v32 = vadd.f32 %v1507_v46, %v1419_v45  ;;  %v1687_v4 = vpop.f32.mrf.mxu1  ;;  %v1938_v59 = vmax.f32 %v1686_v8, %v1810_v43 }
 0x30b   :  { %v1598_v52 = vpop.f32.mrf.mxu0 }
 0x30c   :  { %v1599_v24 = vadd.f32 %v1598_v52, %v4026_v21  ;;  %v1809_v61 = vmul.f32 0.2, %v1508_v32 }
 0x30e   :  { %v1688_v37 = vadd.f32 %v1687_v4, %v1599_v24  ;;  %v1937_v5 = vmax.f32 %v1508_v32, %v1809_v61 }
 0x30f   :  { %v1420_v18 = vpop.f32.mrf.mxu2 }
 0x310   :  { %v1814_v25 = vmul.f32 0.2, %v1688_v37  ;;  %v1421_v60 = vadd.f32 %v1420_v18, %v4030_v23  ;;  %v1509_v22 = vpop.f32.mrf.mxu3 }
 0x312   :  { %v1942_v28 = vmax.f32 %v1688_v37, %v1814_v25  ;;  %v1510_v13 = vadd.f32 %v1509_v22, %v1421_v60  ;;  %v1690_v47 = vpop.f32.mrf.mxu1 }
 0x313   :  { %v1601_v2 = vpop.f32.mrf.mxu0 }
 0x314   :  { %v1813_v55 = vmul.f32 0.2, %v1510_v13  ;;  %v1602_v10 = vadd.f32 %v1601_v2, %v4026_v21  ;;  %2318 = vmatmul.bf16.gmra.mxu2 %v3923_v14  ;;  %v4224_v50 = vpack.c.bf16 %v1942_v28, %v1938_v59 }
 0x315   :  { %2407 = vmatmul.bf16.gmra.mxu3 %v3917_v62  ;;  %2585 = vmatmul.bf16.gmra.mxu1 %v4140_v30 }
 0x316   :  { %v1941_v36 = vmax.f32 %v1510_v13, %v1813_v55  ;;  %v1691_v12 = vadd.f32 %v1690_v47, %v1602_v10  ;;  %2496 = vmatmul.bf16.gmra.mxu0 %v4146_v33 }
 0x317   :  { %v1423_v7 = vpop.f32.mrf.mxu2 }
 0x318   :  { %v1424_v42 = vadd.f32 %v1423_v7, %v4030_v23  ;;  %v1512_v11 = vpop.f32.mrf.mxu3  ;;  %v4230_v19 = vpack.c.bf16 %v1941_v36, %v1937_v5  ;;  %v1818_v58 = vmul.f32 0.2, %v1691_v12 }
 0x31a   :  { %v1513_v31 = vadd.f32 %v1512_v11, %v1424_v42  ;;  %v1692_v27 = vpop.f32.mrf.mxu1  ;;  %v1946_v54 = vmax.f32 %v1691_v12, %v1818_v58 }
 0x31b   :  { %v1603_v14 = vpop.f32.mrf.mxu0 }
 0x31c   :  { %v1604_v40 = vadd.f32 %v1603_v14, %v4026_v21  ;;  %v1817_v33 = vmul.f32 0.2, %v1513_v31  ;;  %v4238_v21 = vld [vmem:[%s4316_s6] ss:$0 sm:$0xff]  ;;  %s3402_s6 = smov [#allocation7]  }
 0x31d   :  { %s2667_s15 = sshll.u32 %s3402_s6, 4  ;;  %s2668_s15 = int_to_ptr.vmem [resolvable:$true] %s2667_s15 }
 0x31e   :  { %v1693_v62 = vadd.f32 %v1692_v27, %v1604_v40 }
 0x31f   :  { %v1425_v29 = vpop.f32.mrf.mxu2 }
 0x320   :  { %v1822_v30 = vmul.f32 0.2, %v1693_v62  ;;  %v1426_v39 = vadd.f32 %v1425_v29, %v4030_v23  ;;  %v1514_v6 = vpop.f32.mrf.mxu3  ;;  %v1945_v23 = vmax.f32 %v1513_v31, %v1817_v33 }
 0x322   :  { %v1950_v49 = vmax.f32 %v1693_v62, %v1822_v30  ;;  %v1515_v41 = vadd.f32 %v1514_v6, %v1426_v39  ;;  %v2551_v44 = vpop.f32.mrf.mxu1 }
 0x323   :  { %v2462_v8 = vpop.f32.mrf.mxu0 }
 0x324   :  { %v1821_v53 = vmul.f32 0.2, %v1515_v41  ;;  %2323 = vmatmul.bf16.gmra.mxu2 %v3938_v20  ;;  %v4240_v45 = vpack.c.bf16 %v1950_v49, %v1946_v54 }
 0x325   :  { %2412 = vmatmul.bf16.gmra.mxu3 %v3932_v56  ;;  %2590 = vmatmul.bf16.gmra.mxu1 %v4152_v3 }
 0x326   :  { %v1949_v46 = vmax.f32 %v1515_v41, %v1821_v53  ;;  %2501 = vmatmul.bf16.gmra.mxu0 %v4158_v51 }
 0x327   :  { %v2284_v32 = vpop.f32.mrf.mxu2 }
 0x328   :  { %v4245_v4 = vpack.c.bf16 %v1949_v46, %v1945_v23  ;;  %v2285_v20 = vadd.f32 %v4238_v21, %v2284_v32  ;;  %v2373_v52 = vpop.f32.mrf.mxu3 }
 0x32a   :  { %v2374_v24 = vadd.f32 %v2373_v52, %v2285_v20  ;;  %v2553_v43 = vpop.f32.mrf.mxu1 }
 0x32b   :  { %v2464_v37 = vpop.f32.mrf.mxu0 }
 0x32c   :  { %v2463_v18 = vadd.f32 %v2462_v8, %v2374_v24  ;;  %v4379_v8 = vld [vmem:[#allocation12_spill] sm:$0xff] }
 0x32e   :  { %v2552_v25 = vadd.f32 %v2551_v44, %v2463_v18 }
 0x32f   :  { %v2286_v60 = vpop.f32.mrf.mxu2 }
 0x330   :  { %2631 = vst [vmem:[#allocation7] sm:$0xff] %v2552_v25  ;;  %v2287_v56 = vadd.f32 %v4238_v21, %v2286_v60  ;;  %v2375_v3 = vpop.f32.mrf.mxu3 }
 0x332   :  { %v2376_v22 = vadd.f32 %v2375_v3, %v2287_v56  ;;  %v2556_v59 = vpop.f32.mrf.mxu1 }
 0x333   :  { %v2467_v61 = vpop.f32.mrf.mxu0 }
 0x334   :  { %v2465_v51 = vadd.f32 %v2464_v37, %v2376_v22  ;;  %2328 = vmatmul.bf16.gmra.mxu2 %v3950_v9 }
 0x335   :  { %2417 = vmatmul.bf16.gmra.mxu3 %v3944_v63  ;;  %2595 = vmatmul.bf16.gmra.mxu1 %v4164_v26 }
 0x336   :  { %v2554_v28 = vadd.f32 %v2553_v43, %v2465_v51  ;;  %2506 = vmatmul.bf16.gmra.mxu0 %v4170_v35  ;;  %v4377_v35 = vld [vmem:[#allocation11_spill] sm:$0xff] }
 0x337   :  { %v2289_v13 = vpop.f32.mrf.mxu2 }
 0x338   :  { %2632 = vst [vmem:[#allocation7 + $0x8] sm:$0xff] %v2554_v28  ;;  %v2290_v47 = vadd.f32 %v4238_v21, %v2289_v13  ;;  %v2378_v2 = vpop.f32.mrf.mxu3 }
 0x33a   :  { %v2379_v55 = vadd.f32 %v2378_v2, %v2290_v47  ;;  %v2558_v10 = vpop.f32.mrf.mxu1 }
 0x33b   :  { %v2469_v5 = vpop.f32.mrf.mxu0 }
 0x33c   :  { %v2468_v36 = vadd.f32 %v2467_v61, %v2379_v55 }
 0x33e   :  { %v2557_v12 = vadd.f32 %v2556_v59, %v2468_v36  ;;  %v4381_v59 = vld [vmem:[#allocation14_spill] sm:$0xff] }
 0x33f   :  { %v2291_v7 = vpop.f32.mrf.mxu2 }
 0x340   :  { %2633 = vst [vmem:[#allocation7 + $0x10] sm:$0xff] %v2557_v12  ;;  %v2292_v9 = vadd.f32 %v4238_v21, %v2291_v7  ;;  %v2380_v63 = vpop.f32.mrf.mxu3 }
 0x342   :  { %v2381_v42 = vadd.f32 %v2380_v63, %v2292_v9  ;;  %v2561_v26 = vpop.f32.mrf.mxu1 }
 0x343   :  { %v2472_v11 = vpop.f32.mrf.mxu0 }
 0x344   :  { %v2470_v31 = vadd.f32 %v2469_v5, %v2381_v42  ;;  %2333 = vmatmul.bf16.gmra.mxu2 %v3965_v57 }
 0x345   :  { %2422 = vmatmul.bf16.gmra.mxu3 %v4377_v35  ;;  %2600 = vmatmul.bf16.gmra.mxu1 %v4176_v15 }
 0x346   :  { %v2559_v27 = vadd.f32 %v2558_v10, %v2470_v31  ;;  %2511 = vmatmul.bf16.gmra.mxu0 %v4182_v0  ;;  %v4378_v0 = vld [vmem:[#allocation13_spill] sm:$0xff] }
 0x347   :  { %v2294_v14 = vpop.f32.mrf.mxu2 }
 0x348   :  { %2634 = vst [vmem:[#allocation7 + $0x18] sm:$0xff] %v2559_v27  ;;  %v2295_v40 = vadd.f32 %v4238_v21, %v2294_v14  ;;  %v2383_v58 = vpop.f32.mrf.mxu3 }
 0x34a   :  { %v2384_v62 = vadd.f32 %v2383_v58, %v2295_v40  ;;  %v2563_v29 = vpop.f32.mrf.mxu1 }
 0x34b   :  { %v2474_v30 = vpop.f32.mrf.mxu0 }
 0x34c   :  { %v2473_v39 = vadd.f32 %v2472_v11, %v2384_v62 }
 0x34e   :  { %v2562_v6 = vadd.f32 %v2561_v26, %v2473_v39  ;;  %v4383_v26 = vld [vmem:[#allocation16_spill] sm:$0xff] }
 0x34f   :  { %v2296_v54 = vpop.f32.mrf.mxu2 }
 0x350   :  { %2635 = vst [vmem:[#allocation7 + $0x20] sm:$0xff] %v2562_v6  ;;  %v2297_v57 = vadd.f32 %v4238_v21, %v2296_v54  ;;  %v2385_v33 = vpop.f32.mrf.mxu3 }
 0x352   :  { %v2386_v49 = vadd.f32 %v2385_v33, %v2297_v57  ;;  %v2566_v15 = vpop.f32.mrf.mxu1 }
 0x353   :  { %v2477_v41 = vpop.f32.mrf.mxu0 }
 0x354   :  { %v2475_v44 = vadd.f32 %v2474_v30, %v2386_v49  ;;  %2338 = vmatmul.bf16.gmra.mxu2 %v4378_v0  ;;  %v4385_v49 = vld [vmem:[#allocation18_spill] sm:$0xff] }
 0x355   :  { %2427 = vmatmul.bf16.gmra.mxu3 %v4379_v8  ;;  %2605 = vmatmul.bf16.gmra.mxu1 %v4188_v16 }
 0x356   :  { %v2564_v53 = vadd.f32 %v2563_v29, %v2475_v44  ;;  %2516 = vmatmul.bf16.gmra.mxu0 %v4194_v38  ;;  %v4380_v38 = vld [vmem:[#allocation15_spill] sm:$0xff] }
 0x357   :  { %v2299_v23 = vpop.f32.mrf.mxu2 }
 0x358   :  { %2636 = vst [vmem:[#allocation7 + $0x28] sm:$0xff] %v2564_v53  ;;  %v2300_v46 = vadd.f32 %v4238_v21, %v2299_v23  ;;  %v2388_v32 = vpop.f32.mrf.mxu3 }
 0x35a   :  { %v2389_v20 = vadd.f32 %v2388_v32, %v2300_v46  ;;  %v2568_v52 = vpop.f32.mrf.mxu1 }
 0x35b   :  { %v2479_v24 = vpop.f32.mrf.mxu0 }
 0x35c   :  { %v2478_v43 = vadd.f32 %v2477_v41, %v2389_v20 }
 0x35e   :  { %v2567_v37 = vadd.f32 %v2566_v15, %v2478_v43 }
 0x35f   :  { %v2301_v18 = vpop.f32.mrf.mxu2 }
 0x360   :  { %2637 = vst [vmem:[#allocation7 + $0x30] sm:$0xff] %v2567_v37  ;;  %v2302_v25 = vadd.f32 %v4238_v21, %v2301_v18  ;;  %v2390_v60 = vpop.f32.mrf.mxu3 }
 0x362   :  { %v2391_v56 = vadd.f32 %v2390_v60, %v2302_v25  ;;  %v2571_v16 = vpop.f32.mrf.mxu1  ;;  %v4387_v25 = vld [vmem:[#allocation20_spill] sm:$0xff] }
 0x363   :  { %v2482_v3 = vpop.f32.mrf.mxu0 }
 0x364   :  { %v2480_v22 = vadd.f32 %v2479_v24, %v2391_v56  ;;  %2343 = vmatmul.bf16.gmra.mxu2 %v4380_v38 }
 0x365   :  { %2432 = vmatmul.bf16.gmra.mxu3 %v4381_v59  ;;  %2610 = vmatmul.bf16.gmra.mxu1 %v4200_v48 }
 0x366   :  { %v2569_v61 = vadd.f32 %v2568_v52, %v2480_v22  ;;  %2521 = vmatmul.bf16.gmra.mxu0 %v4206_v17  ;;  %v4382_v17 = vld [vmem:[#allocation17_spill] sm:$0xff] }
 0x367   :  { %v2304_v51 = vpop.f32.mrf.mxu2 }
 0x368   :  { %2638 = vst [vmem:[#allocation7 + $0x38] sm:$0xff] %v2569_v61  ;;  %v2305_v28 = vadd.f32 %v4238_v21, %v2304_v51  ;;  %v2393_v13 = vpop.f32.mrf.mxu3 }
 0x36a   :  { %v2394_v47 = vadd.f32 %v2393_v13, %v2305_v28  ;;  %v2573_v2 = vpop.f32.mrf.mxu1 }
 0x36b   :  { %v2484_v55 = vpop.f32.mrf.mxu0 }
 0x36c   :  { %v2483_v10 = vadd.f32 %v2482_v3, %v2394_v47 }
 0x36e   :  { %v2572_v5 = vadd.f32 %v2571_v16, %v2483_v10 }
 0x36f   :  { %v2306_v36 = vpop.f32.mrf.mxu2 }
 0x370   :  { %2639 = vst [vmem:[#allocation7 + $0x40] sm:$0xff] %v2572_v5  ;;  %v2307_v12 = vadd.f32 %v4238_v21, %v2306_v36  ;;  %v2395_v7 = vpop.f32.mrf.mxu3 }
 0x372   :  { %v2396_v9 = vadd.f32 %v2395_v7, %v2307_v12  ;;  %v2576_v48 = vpop.f32.mrf.mxu1 }
 0x373   :  { %v2487_v63 = vpop.f32.mrf.mxu0 }
 0x374   :  { %v2485_v42 = vadd.f32 %v2484_v55, %v2396_v9  ;;  %2348 = vmatmul.bf16.gmra.mxu2 %v4382_v17 }
 0x375   :  { %2437 = vmatmul.bf16.gmra.mxu3 %v4383_v26  ;;  %2615 = vmatmul.bf16.gmra.mxu1 %v4212_v1 }
 0x376   :  { %v2574_v11 = vadd.f32 %v2573_v2, %v2485_v42  ;;  %2526 = vmatmul.bf16.gmra.mxu0 %v4218_v34  ;;  %v4384_v34 = vld [vmem:[#allocation19_spill] sm:$0xff] }
 0x377   :  { %v2309_v31 = vpop.f32.mrf.mxu2 }
 0x378   :  { %2640 = vst [vmem:[#allocation7 + $0x48] sm:$0xff] %v2574_v11  ;;  %v2310_v35 = vadd.f32 %v4238_v21, %v2309_v31  ;;  %v2398_v27 = vpop.f32.mrf.mxu3 }
 0x37a   :  { %v2399_v14 = vadd.f32 %v2398_v27, %v2310_v35  ;;  %v2578_v40 = vpop.f32.mrf.mxu1 }
 0x37b   :  { %v2489_v58 = vpop.f32.mrf.mxu0 }
 0x37c   :  { %v2488_v62 = vadd.f32 %v2487_v63, %v2399_v14 }
 0x37e   :  { %v2577_v29 = vadd.f32 %v2576_v48, %v2488_v62 }
 0x37f   :  { %v2311_v30 = vpop.f32.mrf.mxu2 }
 0x380   :  { %2641 = vst [vmem:[#allocation7 + $0x50] sm:$0xff] %v2577_v29  ;;  %v2312_v39 = vadd.f32 %v4238_v21, %v2311_v30  ;;  %v2400_v6 = vpop.f32.mrf.mxu3 }
 0x382   :  { %v2401_v54 = vadd.f32 %v2400_v6, %v2312_v39  ;;  %v2581_v1 = vpop.f32.mrf.mxu1 }
 0x383   :  { %v2492_v57 = vpop.f32.mrf.mxu0 }
 0x384   :  { %v2490_v33 = vadd.f32 %v2489_v58, %v2401_v54  ;;  %2353 = vmatmul.bf16.gmra.mxu2 %v4384_v34 }
 0x385   :  { %2442 = vmatmul.bf16.gmra.mxu3 %v4385_v49  ;;  %2620 = vmatmul.bf16.gmra.mxu1 %v4224_v50 }
 0x386   :  { %v2579_v15 = vadd.f32 %v2578_v40, %v2490_v33  ;;  %2531 = vmatmul.bf16.gmra.mxu0 %v4230_v19  ;;  %v4386_v19 = vld [vmem:[#allocation21_spill] sm:$0xff] }
 0x387   :  { %v2314_v41 = vpop.f32.mrf.mxu2 }
 0x388   :  { %2642 = vst [vmem:[#allocation7 + $0x58] sm:$0xff] %v2579_v15  ;;  %v2315_v44 = vadd.f32 %v4238_v21, %v2314_v41  ;;  %v2403_v0 = vpop.f32.mrf.mxu3 }
 0x38a   :  { %v2404_v8 = vadd.f32 %v2403_v0, %v2315_v44  ;;  %v2583_v53 = vpop.f32.mrf.mxu1 }
 0x38b   :  { %v2494_v23 = vpop.f32.mrf.mxu0 }
 0x38c   :  { %v2493_v46 = vadd.f32 %v2492_v57, %v2404_v8 }
 0x38e   :  { %v2582_v32 = vadd.f32 %v2581_v1, %v2493_v46 }
 0x38f   :  { %v2316_v20 = vpop.f32.mrf.mxu2 }
 0x390   :  { %2643 = vst [vmem:[#allocation7 + $0x60] sm:$0xff] %v2582_v32  ;;  %v2317_v52 = vadd.f32 %v4238_v21, %v2316_v20  ;;  %v2405_v24 = vpop.f32.mrf.mxu3 }
 0x392   :  { %v2406_v43 = vadd.f32 %v2405_v24, %v2317_v52  ;;  %v2586_v50 = vpop.f32.mrf.mxu1 }
 0x393   :  { %v2497_v37 = vpop.f32.mrf.mxu0 }
 0x394   :  { %v2495_v18 = vadd.f32 %v2494_v23, %v2406_v43  ;;  %2358 = vmatmul.bf16.gmra.mxu2 %v4386_v19 }
 0x395   :  { %2447 = vmatmul.bf16.gmra.mxu3 %v4387_v25  ;;  %2625 = vmatmul.bf16.gmra.mxu1 %v4240_v45 }
 0x396   :  { %v2584_v60 = vadd.f32 %v2583_v53, %v2495_v18 }
 0x397   :  { %v2319_v56 = vpop.f32.mrf.mxu2 }
 0x398   :  { %2644 = vst [vmem:[#allocation7 + $0x68] sm:$0xff] %v2584_v60  ;;  %v2320_v16 = vadd.f32 %v4238_v21, %v2319_v56  ;;  %v2408_v3 = vpop.f32.mrf.mxu3 }
 0x39a   :  { %v2409_v22 = vadd.f32 %v2408_v3, %v2320_v16  ;;  %v2588_v38 = vpop.f32.mrf.mxu1 }
 0x39b   :  { %v2499_v59 = vpop.f32.mrf.mxu0 }
 0x39c   :  { %v2498_v61 = vadd.f32 %v2497_v37, %v2409_v22 }
 0x39e   :  { %v2587_v51 = vadd.f32 %v2586_v50, %v2498_v61 }
 0x39f   :  { %v2321_v28 = vpop.f32.mrf.mxu2 }
 0x3a0   :  { %2645 = vst [vmem:[#allocation7 + $0x70] sm:$0xff] %v2587_v51  ;;  %v2322_v13 = vadd.f32 %v4238_v21, %v2321_v28  ;;  %v2410_v47 = vpop.f32.mrf.mxu3 }
 0x3a2   :  { %v2411_v2 = vadd.f32 %v2410_v47, %v2322_v13  ;;  %v2591_v55 = vpop.f32.mrf.mxu1 }
 0x3a3   :  { %v2502_v10 = vpop.f32.mrf.mxu0 }
 0x3a4   :  { %v2500_v45 = vadd.f32 %v2499_v59, %v2411_v2  ;;  %2536 = vmatmul.bf16.vlgmr.msra.gmra.mxu2 %v4245_v4 }
 0x3a6   :  { %v2589_v5 = vadd.f32 %v2588_v38, %v2500_v45 }
 0x3a7   :  { %v2324_v36 = vpop.f32.mrf.mxu2 }
 0x3a8   :  { %2646 = vst [vmem:[#allocation7 + $0x78] sm:$0xff] %v2589_v5  ;;  %v2325_v12 = vadd.f32 %v4238_v21, %v2324_v36  ;;  %v2413_v7 = vpop.f32.mrf.mxu3 }
 0x3aa   :  { %v2414_v9 = vadd.f32 %v2413_v7, %v2325_v12  ;;  %v2593_v48 = vpop.f32.mrf.mxu1 }
 0x3ab   :  { %v2504_v63 = vpop.f32.mrf.mxu0 }
 0x3ac   :  { %v2503_v42 = vadd.f32 %v2502_v10, %v2414_v9 }
 0x3ae   :  { %v2592_v17 = vadd.f32 %v2591_v55, %v2503_v42 }
 0x3af   :  { %v2326_v26 = vpop.f32.mrf.mxu2 }
 0x3b0   :  { %2647 = vst [vmem:[#allocation7 + $0x80] sm:$0xff] %v2592_v17  ;;  %v2327_v11 = vadd.f32 %v4238_v21, %v2326_v26  ;;  %v2415_v31 = vpop.f32.mrf.mxu3 }
 0x3b2   :  { %v2416_v35 = vadd.f32 %v2415_v31, %v2327_v11  ;;  %v2596_v27 = vpop.f32.mrf.mxu1 }
 0x3b3   :  { %v2507_v14 = vpop.f32.mrf.mxu0 }
 0x3b4   :  { %v2505_v4 = vadd.f32 %v2504_v63, %v2416_v35 }
 0x3b6   :  { %v2594_v40 = vadd.f32 %v2593_v48, %v2505_v4 }
 0x3b7   :  { %v2329_v58 = vpop.f32.mrf.mxu2 }
 0x3b8   :  { %2648 = vst [vmem:[#allocation7 + $0x88] sm:$0xff] %v2594_v40  ;;  %v2330_v62 = vadd.f32 %v4238_v21, %v2329_v58  ;;  %v2418_v29 = vpop.f32.mrf.mxu3 }
 0x3ba   :  { %v2419_v30 = vadd.f32 %v2418_v29, %v2330_v62  ;;  %v2598_v39 = vpop.f32.mrf.mxu1 }
 0x3bb   :  { %v2509_v6 = vpop.f32.mrf.mxu0 }
 0x3bc   :  { %v2508_v54 = vadd.f32 %v2507_v14, %v2419_v30 }
 0x3be   :  { %v2597_v1 = vadd.f32 %v2596_v27, %v2508_v54 }
 0x3bf   :  { %v2331_v57 = vpop.f32.mrf.mxu2 }
 0x3c0   :  { %2649 = vst [vmem:[#allocation7 + $0x90] sm:$0xff] %v2597_v1  ;;  %v2332_v33 = vadd.f32 %v4238_v21, %v2331_v57  ;;  %v2420_v34 = vpop.f32.mrf.mxu3 }
 0x3c2   :  { %v2421_v49 = vadd.f32 %v2420_v34, %v2332_v33  ;;  %v2601_v15 = vpop.f32.mrf.mxu1 }
 0x3c3   :  { %v2512_v41 = vpop.f32.mrf.mxu0 }
 0x3c4   :  { %v2510_v44 = vadd.f32 %v2509_v6, %v2421_v49 }
 0x3c6   :  { %v2599_v0 = vadd.f32 %v2598_v39, %v2510_v44 }
 0x3c7   :  { %v2334_v8 = vpop.f32.mrf.mxu2 }
 0x3c8   :  { %2650 = vst [vmem:[#allocation7 + $0x98] sm:$0xff] %v2599_v0  ;;  %v2335_v53 = vadd.f32 %v4238_v21, %v2334_v8  ;;  %v2423_v23 = vpop.f32.mrf.mxu3 }
 0x3ca   :  { %v2424_v46 = vadd.f32 %v2423_v23, %v2335_v53  ;;  %v2603_v32 = vpop.f32.mrf.mxu1 }
 0x3cb   :  { %v2514_v20 = vpop.f32.mrf.mxu0 }
 0x3cc   :  { %v2513_v52 = vadd.f32 %v2512_v41, %v2424_v46 }
 0x3ce   :  { %v2602_v24 = vadd.f32 %v2601_v15, %v2513_v52 }
 0x3cf   :  { %v2336_v43 = vpop.f32.mrf.mxu2 }
 0x3d0   :  { %2651 = vst [vmem:[#allocation7 + $0xa0] sm:$0xff] %v2602_v24  ;;  %v2337_v50 = vadd.f32 %v4238_v21, %v2336_v43  ;;  %v2425_v37 = vpop.f32.mrf.mxu3 }
 0x3d2   :  { %v2426_v18 = vadd.f32 %v2425_v37, %v2337_v50  ;;  %v2606_v19 = vpop.f32.mrf.mxu1 }
 0x3d3   :  { %v2517_v25 = vpop.f32.mrf.mxu0 }
 0x3d4   :  { %v2515_v60 = vadd.f32 %v2514_v20, %v2426_v18 }
 0x3d6   :  { %v2604_v56 = vadd.f32 %v2603_v32, %v2515_v60 }
 0x3d7   :  { %v2339_v16 = vpop.f32.mrf.mxu2 }
 0x3d8   :  { %2652 = vst [vmem:[#allocation7 + $0xa8] sm:$0xff] %v2604_v56  ;;  %v2340_v3 = vadd.f32 %v4238_v21, %v2339_v16  ;;  %v2428_v22 = vpop.f32.mrf.mxu3 }
 0x3da   :  { %v2429_v38 = vadd.f32 %v2428_v22, %v2340_v3  ;;  %v2608_v59 = vpop.f32.mrf.mxu1 }
 0x3db   :  { %v2519_v61 = vpop.f32.mrf.mxu0 }
 0x3dc   :  { %v2518_v51 = vadd.f32 %v2517_v25, %v2429_v38 }
 0x3de   :  { %v2607_v28 = vadd.f32 %v2606_v19, %v2518_v51 }
 0x3df   :  { %v2341_v13 = vpop.f32.mrf.mxu2 }
 0x3e0   :  { %2653 = vst [vmem:[#allocation7 + $0xb0] sm:$0xff] %v2607_v28  ;;  %v2342_v47 = vadd.f32 %v4238_v21, %v2341_v13  ;;  %v2430_v2 = vpop.f32.mrf.mxu3 }
 0x3e2   :  { %v2431_v55 = vadd.f32 %v2430_v2, %v2342_v47  ;;  %v2611_v10 = vpop.f32.mrf.mxu1 }
 0x3e3   :  { %v2522_v45 = vpop.f32.mrf.mxu0 }
 0x3e4   :  { %v2520_v5 = vadd.f32 %v2519_v61, %v2431_v55 }
 0x3e6   :  { %v2609_v36 = vadd.f32 %v2608_v59, %v2520_v5 }
 0x3e7   :  { %v2344_v12 = vpop.f32.mrf.mxu2 }
 0x3e8   :  { %2654 = vst [vmem:[#allocation7 + $0xb8] sm:$0xff] %v2609_v36  ;;  %v2345_v7 = vadd.f32 %v4238_v21, %v2344_v12  ;;  %v2433_v9 = vpop.f32.mrf.mxu3 }
 0x3ea   :  { %v2434_v48 = vadd.f32 %v2433_v9, %v2345_v7  ;;  %v2613_v17 = vpop.f32.mrf.mxu1 }
 0x3eb   :  { %v2524_v63 = vpop.f32.mrf.mxu0 }
 0x3ec   :  { %v2523_v42 = vadd.f32 %v2522_v45, %v2434_v48 }
 0x3ee   :  { %v2612_v26 = vadd.f32 %v2611_v10, %v2523_v42 }
 0x3ef   :  { %v2346_v11 = vpop.f32.mrf.mxu2 }
 0x3f0   :  { %2655 = vst [vmem:[#allocation7 + $0xc0] sm:$0xff] %v2612_v26  ;;  %v2347_v31 = vadd.f32 %v4238_v21, %v2346_v11  ;;  %v2435_v35 = vpop.f32.mrf.mxu3 }
 0x3f2   :  { %v2436_v27 = vadd.f32 %v2435_v35, %v2347_v31  ;;  %v2616_v58 = vpop.f32.mrf.mxu1 }
 0x3f3   :  { %v2527_v4 = vpop.f32.mrf.mxu0 }
 0x3f4   :  { %v2525_v14 = vadd.f32 %v2524_v63, %v2436_v27 }
 0x3f6   :  { %v2614_v40 = vadd.f32 %v2613_v17, %v2525_v14 }
 0x3f7   :  { %v2349_v62 = vpop.f32.mrf.mxu2 }
 0x3f8   :  { %2656 = vst [vmem:[#allocation7 + $0xc8] sm:$0xff] %v2614_v40  ;;  %v2350_v29 = vadd.f32 %v4238_v21, %v2349_v62  ;;  %v2438_v30 = vpop.f32.mrf.mxu3 }
 0x3fa   :  { %v2439_v39 = vadd.f32 %v2438_v30, %v2350_v29  ;;  %v2618_v49 = vpop.f32.mrf.mxu1 }
 0x3fb   :  { %v2529_v1 = vpop.f32.mrf.mxu0 }
 0x3fc   :  { %v2528_v6 = vadd.f32 %v2527_v4, %v2439_v39 }
 0x3fe   :  { %v2617_v54 = vadd.f32 %v2616_v58, %v2528_v6 }
 0x3ff   :  { %v2351_v57 = vpop.f32.mrf.mxu2 }
 0x400   :  { %2657 = vst [vmem:[#allocation7 + $0xd0] sm:$0xff] %v2617_v54  ;;  %v2352_v33 = vadd.f32 %v4238_v21, %v2351_v57  ;;  %v2440_v34 = vpop.f32.mrf.mxu3 }
 0x402   :  { %v2441_v15 = vadd.f32 %v2440_v34, %v2352_v33  ;;  %v2621_v32 = vpop.f32.mrf.mxu1 }
 0x403   :  { %v2532_v23 = vpop.f32.mrf.mxu0 }
 0x404   :  { %v2530_v41 = vadd.f32 %v2529_v1, %v2441_v15 }
 0x406   :  { %v2619_v44 = vadd.f32 %v2618_v49, %v2530_v41 }
 0x407   :  { %v2354_v0 = vpop.f32.mrf.mxu2 }
 0x408   :  { %2658 = vst [vmem:[#allocation7 + $0xd8] sm:$0xff] %v2619_v44  ;;  %v2355_v8 = vadd.f32 %v4238_v21, %v2354_v0  ;;  %v2443_v53 = vpop.f32.mrf.mxu3 }
 0x40a   :  { %v2444_v46 = vadd.f32 %v2443_v53, %v2355_v8  ;;  %v2623_v25 = vpop.f32.mrf.mxu1 }
 0x40b   :  { %v2534_v18 = vpop.f32.mrf.mxu0 }
 0x40c   :  { %v2533_v20 = vadd.f32 %v2532_v23, %v2444_v46 }
 0x40e   :  { %v2622_v52 = vadd.f32 %v2621_v32, %v2533_v20 }
 0x40f   :  { %v2356_v24 = vpop.f32.mrf.mxu2 }
 0x410   :  { %2659 = vst [vmem:[#allocation7 + $0xe0] sm:$0xff] %v2622_v52  ;;  %v2357_v43 = vadd.f32 %v4238_v21, %v2356_v24  ;;  %v2445_v50 = vpop.f32.mrf.mxu3 }
 0x412   :  { %v2446_v37 = vadd.f32 %v2445_v50, %v2357_v43  ;;  %v2626_v59 = vpop.f32.mrf.mxu1 }
 0x414   :  { %v2535_v19 = vadd.f32 %v2534_v18, %v2446_v37 }
 0x416   :  { %v2624_v60 = vadd.f32 %v2623_v25, %v2535_v19 }
 0x417   :  { %v2359_v56 = vpop.f32.mrf.mxu2 }
 0x418   :  { %2660 = vst [vmem:[#allocation7 + $0xe8] sm:$0xff] %v2624_v60  ;;  %v2360_v3 = vadd.f32 %v4238_v21, %v2359_v56  ;;  %v2448_v22 = vpop.f32.mrf.mxu3 }
 0x41a   :  { %v2449_v38 = vadd.f32 %v2448_v22, %v2360_v3  ;;  %v2628_v45 = vpop.f32.mrf.mxu1 }
 0x41f   :  { %v2361_v16 = vpop.f32.mrf.mxu2 }
 0x420   :  { %v2362_v28 = vadd.f32 %v4238_v21, %v2361_v16  ;;  %v2450_v47 = vpop.f32.mrf.mxu3 }
 0x422   :  { %v2451_v2 = vadd.f32 %v2450_v47, %v2362_v28 }
 0x427   :  { %v2537_v61 = vpop.f32.mrf.mxu2 }
 0x428   :  { %v2538_v51 = vadd.f32 %v2537_v61, %v2449_v38 }
 0x42a   :  { %v2627_v13 = vadd.f32 %v2626_v59, %v2538_v51 }
 0x42c   :  { %2661 = vst [vmem:[#allocation7 + $0xf0] sm:$0xff] %v2627_v13 }
 0x42f   :  { %v2539_v55 = vpop.f32.mrf.mxu2 }
 0x430   :  { %v2540_v10 = vadd.f32 %v2539_v55, %v2451_v2 }
 0x432   :  { %v2629_v5 = vadd.f32 %v2628_v45, %v2540_v10 }
 0x434   :  { %2662 = vst [vmem:[#allocation7 + $0xf8] sm:$0xff] %v2629_v5 }
 0x435   :  { %2675 = dma.vmem_to_hbm [thread:$0]  %s2668_s15, 4096, %s2670_s17, [#allocation4], %s3403_s18, %s3403_s18, %s3404_s19  }
 0x436   :  { %3394 = dma.done.wait [#allocation4], 4096  }
 0x437   :  { %3395 = vsyncadd [#allocation4], 4294963200 }
 0x438   :  { %2680 = vsyncpa [#allocation3], 1 }
 0x439   :  { %2681 = vsyncpa [#allocation6], 1 }
 0x43a   :  { %2682 = vsyncpa [#allocation4], 1 }

</bundles_post_ra>
